<compile_context>
chip_gen: v7x
topology: tpu7x:2x2x1
jax: 0.10.0
libtpu: 0.0.40
codegen_flags: <defaults>
</compile_context>

<pallas_src>
import jax
import jax.numpy as jnp
from jax import lax
from jax.experimental import pallas as pl
from jax.experimental.pallas import tpu as pltpu

ACT_DTYPE = jnp.bfloat16      # off-chip storage dtype for activations & weights


# ----------------------------------------------------------------------------
# Pallas kernel: y = relu(x @ w + b), f32 accumulate, cast at the store.
# ----------------------------------------------------------------------------
def _mbr_kernel(x_ref, w_ref, b_ref, o_ref):
    acc = jnp.dot(x_ref[0], w_ref[...], preferred_element_type=jnp.float32)
    o_ref[0] = jnp.maximum(acc + b_ref[...], 0.0).astype(o_ref.dtype)


def _pick_row_tiles(n_rows):
    """Row-tile count: multiple pipelined steps per image for the big layers
    (keeps both v7x TensorCores busy), single step for the tiny ones."""
    for r in (4, 2):
        if n_rows % (r * 16) == 0 and n_rows // r >= 256:
            return r
    return 1


def _matmul_bias_relu(x, w, b, out_dtype, row_tiles=1):
    """x: (G, R, K) bf16, w: (K, N) bf16, b: (1, N) f32 -> (G, R, N) out_dtype."""
    G, R, K = x.shape
    N = w.shape[1]
    rows = R // row_tiles
    return pl.pallas_call(
        _mbr_kernel,
        out_shape=jax.ShapeDtypeStruct((G, R, N), out_dtype),
        grid_spec=pltpu.PrefetchScalarGridSpec(
            num_scalar_prefetch=0,
            grid=(G, row_tiles),
            in_specs=[
                pl.BlockSpec((1, rows, K), lambda g, r: (g, r, 0)),   # streamed LHS tile
                pl.BlockSpec((K, N), lambda g, r: (0, 0)),            # resident weights
                pl.BlockSpec((1, N), lambda g, r: (0, 0)),            # resident bias (f32)
            ],
            out_specs=pl.BlockSpec((1, rows, N), lambda g, r: (g, r, 0)),
        ),
        compiler_params=pltpu.CompilerParams(
            dimension_semantics=("parallel", "parallel"),
        ),
    )(x, w, b)


# ----------------------------------------------------------------------------
# Thin XLA glue: space-to-depth + pad + 4-tap concat (pure data movement).
# LHS row (i*m + j) holds, for tap t=(a,b) in {0,1}^2 and parity group g=(p,q),
# the value a_pad[i+a, j+b, g*cin + c]; matching weight rows are packed below.
# ----------------------------------------------------------------------------
def _conv_lhs(x):
    """(B, 2m, 2m, C) NHWC bf16 -> ((B, m*m, 16*C) bf16, m)."""
    B, H, W, C = x.shape
    m = H // 2
    a = x.reshape(B, m, 2, m, 2, C)
    a = a.transpose(0, 1, 3, 2, 4, 5).reshape(B, m, m, 4 * C)   # groups (p, q, c)
    a = jnp.pad(a, ((0, 0), (1, 1), (1, 1), (0, 0)))            # conv halo
    taps = [a[:, s:s + m, t:t + m, :] for s in (0, 1) for t in (0, 1)]
    lhs = jnp.concatenate(taps, axis=-1).reshape(B, m * m, 16 * C)
    return lhs, m


# ----------------------------------------------------------------------------
# Parameters: PyTorch layouts -> packed kernel layouts
# ----------------------------------------------------------------------------
def init_encoder_params(key, n_channel, dim_bottleneck):
    """Parameters in PyTorch layouts: conv (Cout, Cin, 3, 3), fc (out, in)."""
    chans = [n_channel, 8, 16, 32, 64, 128]
    params = {"conv_w": [], "conv_b": []}
    for i in range(5):
        cin, cout = chans[i], chans[i + 1]
        key, kw, kb = jax.random.split(key, 3)
        bound = 1.0 / (cin * 9) ** 0.5
        params["conv_w"].append(
            jax.random.uniform(kw, (cout, cin, 3, 3), jnp.float32, -bound, bound))
        params["conv_b"].append(
            jax.random.uniform(kb, (cout,), jnp.float32, -bound, bound))
    key, kw, kb = jax.random.split(key, 3)
    bound = 1.0 / (128 * 16) ** 0.5
    params["fc_w"] = jax.random.uniform(
        kw, (dim_bottleneck, 128 * 16), jnp.float32, -bound, bound)
    params["fc_b"] = jax.random.uniform(
        kb, (dim_bottleneck,), jnp.float32, -bound, bound)
    return params


_KIDX = {(0, 1): 0, (1, 0): 1, (1, 1): 2}   # (block offset a|b, parity p|q) -> kh|kw


def _pack_conv_w(w_oihw):
    """PyTorch (Cout, Cin, 3, 3) -> (16*Cin, Cout) concatenated-tap matrix (bf16)."""
    cout, cin = w_oihw.shape[0], w_oihw.shape[1]
    wcat = jnp.zeros((16 * cin, cout), jnp.float32)
    for a in (0, 1):
        for b in (0, 1):
            t = a * 2 + b
            for p in (0, 1):
                for q in (0, 1):
                    if (a, p) in _KIDX and (b, q) in _KIDX:
                        kh, kw = _KIDX[(a, p)], _KIDX[(b, q)]
                        g = p * 2 + q
                        row0 = t * 4 * cin + g * cin
                        wcat = wcat.at[row0:row0 + cin, :].set(
                            jnp.transpose(w_oihw[:, :, kh, kw]))
    return wcat.astype(ACT_DTYPE)


def pack_encoder_params(params, dim_bottleneck):
    packed = {"conv_w": [], "conv_b": []}
    for w, b in zip(params["conv_w"], params["conv_b"]):
        packed["conv_w"].append(_pack_conv_w(w))
        packed["conv_b"].append(b.reshape(1, -1).astype(jnp.float32))
    # Fold PyTorch's NCHW flatten order into the FC weight: kernel produces rows in
    # (h, w) order with channels minor; PyTorch flattens (c, h, w).
    c_last = params["conv_w"][-1].shape[0]                        # 128
    wfc = params["fc_w"].reshape(dim_bottleneck, c_last, 4, 4)    # (n, c, h, w)
    wfc = jnp.transpose(wfc, (2, 3, 1, 0))                        # (h, w, c, n)
    packed["fc_w"] = wfc.reshape(16 * c_last, dim_bottleneck).astype(ACT_DTYPE)
    packed["fc_b"] = params["fc_b"].reshape(1, dim_bottleneck).astype(jnp.float32)
    return packed


# ----------------------------------------------------------------------------
# Forward pass matching EncoderTorch.forward
# ----------------------------------------------------------------------------
def encoder_forward(packed, x_nchw):
    B = x_nchw.shape[0]
    x = jnp.transpose(x_nchw, (0, 2, 3, 1)).astype(ACT_DTYPE)    # NCHW -> NHWC, bf16
    m = x.shape[1] // 2
    for wcat, bias in zip(packed["conv_w"], packed["conv_b"]):
        lhs, m = _conv_lhs(x)
        y = _matmul_bias_relu(lhs, wcat, bias, out_dtype=ACT_DTYPE,
                              row_tiles=_pick_row_tiles(lhs.shape[1]))
        x = y.reshape(B, m, m, wcat.shape[1])                     # NHWC for next layer
    # Final conv output (B, 4, 4, 128): flatten (h, w, c)-minor; fc_w was permuted at
    # pack time to consume this order directly.
    flat = x.reshape(1, B, -1)
    out = _matmul_bias_relu(flat, packed["fc_w"], packed["fc_b"],
                            out_dtype=jnp.float32, row_tiles=1)
    return out.reshape(B, -1)


# ----------------------------------------------------------------------------
# Pure-JAX reference (exactly the PyTorch forward semantics, f32)
# ----------------------------------------------------------------------------
def reference_forward(params, x_nchw):
    x = x_nchw
    for w, b in zip(params["conv_w"], params["conv_b"]):
        x = lax.conv_general_dilated(
            x, w, window_strides=(2, 2), padding=((1, 1), (1, 1)),
            dimension_numbers=("NCHW", "OIHW", "NCHW"))
        x = jnp.maximum(x + b.reshape(1, -1, 1, 1), 0.0)
    flat = x.reshape(x.shape[0], -1)
    return jnp.maximum(flat @ params["fc_w"].T + params["fc_b"], 0.0)


if __name__ == "__main__":
    n_channel, dim_bottleneck = 3, 32
    # Spatial 128x128 is implied by Linear(128*16, ...) after five stride-2 convs.
    batch, height, width = 2, 128, 128

    key = jax.random.PRNGKey(0)
    key, kx = jax.random.split(key)
    x = jax.random.normal(kx, (batch, n_channel, height, width), jnp.float32)

    params = init_encoder_params(key, n_channel, dim_bottleneck)
    packed = pack_encoder_params(params, dim_bottleneck)

    out = jax.block_until_ready(jax.jit(encoder_forward)(packed, x))
    assert out.shape == (batch, dim_bottleneck), out.shape
    assert out.dtype == jnp.float32

    ref = jax.block_until_ready(jax.jit(reference_forward)(params, x))
    max_err = float(jnp.max(jnp.abs(out - ref)))
    assert jnp.allclose(out, ref, atol=5e-2, rtol=5e-2), max_err

    print("KERNEL_OK")
</pallas_src>

<mosaic_0001>
module attributes {stable_mosaic.version = 11 : i64} {
  func.func @_mbr_kernel(%arg0: i32, %arg1: i32, %arg2: memref<1x1024x48xbf16, #tpu.memory_space<vmem>>, %arg3: memref<48x8xbf16, #tpu.memory_space<vmem>>, %arg4: memref<1x8xf32, #tpu.memory_space<vmem>>, %arg5: memref<1x1024x8xbf16, #tpu.memory_space<vmem>>) attributes {dimension_semantics = [#tpu.dimension_semantics<parallel>, #tpu.dimension_semantics<parallel>], iteration_bounds = array<i64: 2, 4>, scalar_prefetch = 0 : i64, scratch_operands = 0 : i64, tpu.core_type = #tpu.core_type<tc>, window_params = [{transform_indices = @transform_0, window_bounds = array<i64: 1, 1024, 48>}, {pipeline_mode = #tpu.pipeline_mode<synchronous>, transform_indices = @transform_1, window_bounds = array<i64: 48, 8>}, {pipeline_mode = #tpu.pipeline_mode<synchronous>, transform_indices = @transform_2, window_bounds = array<i64: 1, 8>}, {transform_indices = @transform_3, window_bounds = array<i64: 1, 1024, 8>}]} {
    %c0 = arith.constant 0 : index
    %c0_0 = arith.constant 0 : index
    %c0_1 = arith.constant 0 : index
    %0 = vector.load %arg2[%c0, %c0_0, %c0_1] : memref<1x1024x48xbf16, #tpu.memory_space<vmem>>, vector<1x1024x48xbf16>
    %1 = vector.shape_cast %0 : vector<1x1024x48xbf16> to vector<1024x48xbf16>
    %c0_2 = arith.constant 0 : index
    %c0_3 = arith.constant 0 : index
    %2 = vector.load %arg3[%c0_2, %c0_3] : memref<48x8xbf16, #tpu.memory_space<vmem>>, vector<48x8xbf16>
    %cst = arith.constant dense<0.000000e+00> : vector<1024x8xf32>
    %3 = tpu.matmul %1, %2, %cst {dimension_numbers = #tpu.dot_dimension_numbers<[1], [0], [0], [1], [0, 0, 1, 1], [], []>} : vector<1024x48xbf16>, vector<48x8xbf16>, vector<1024x8xf32> -> vector<1024x8xf32>
    %c0_4 = arith.constant 0 : index
    %c0_5 = arith.constant 0 : index
    %4 = vector.load %arg4[%c0_4, %c0_5] : memref<1x8xf32, #tpu.memory_space<vmem>>, vector<1x8xf32>
    %5 = vector.broadcast %4 : vector<1x8xf32> to vector<1024x8xf32>
    %6 = arith.addf %3, %5 : vector<1024x8xf32>
    %cst_6 = arith.constant 0.000000e+00 : f32
    %7 = vector.broadcast %cst_6 : f32 to vector<1024x8xf32>
    %8 = arith.maximumf %6, %7 : vector<1024x8xf32>
    %9 = arith.truncf %8 : vector<1024x8xf32> to vector<1024x8xbf16>
    %c0_7 = arith.constant 0 : index
    %c0_8 = arith.constant 0 : index
    %c0_9 = arith.constant 0 : index
    %10 = vector.load %arg5[%c0_7, %c0_8, %c0_9] : memref<1x1024x8xbf16, #tpu.memory_space<vmem>>, vector<1x1024x8xbf16>
    %11 = vector.shape_cast %10 : vector<1x1024x8xbf16> to vector<1024x8xbf16>
    %12 = vector.shape_cast %9 : vector<1024x8xbf16> to vector<1x1024x8xbf16>
    tpu.vector_store %arg5[%c0_7, %c0_8, %c0_9], %12 {strides = array<i32>} : memref<1x1024x8xbf16, #tpu.memory_space<vmem>>, vector<1x1024x8xbf16>,
    return
  }
  func.func @transform_0(%arg0: i32, %arg1: i32) -> (i32, i32, i32) {
    %c0_i32 = arith.constant 0 : i32
    %c0_i32_0 = arith.constant 0 : i32
    return %arg0, %arg1, %c0_i32 : i32, i32, i32
  }
  func.func @transform_1(%arg0: i32, %arg1: i32) -> (i32, i32) {
    %c0_i32 = arith.constant 0 : i32
    %c0_i32_0 = arith.constant 0 : i32
    %c0_i32_1 = arith.constant 0 : i32
    return %c0_i32, %c0_i32_0 : i32, i32
  }
  func.func @transform_2(%arg0: i32, %arg1: i32) -> (i32, i32) {
    %c0_i32 = arith.constant 0 : i32
    %c0_i32_0 = arith.constant 0 : i32
    %c0_i32_1 = arith.constant 0 : i32
    return %c0_i32, %c0_i32_0 : i32, i32
  }
  func.func @transform_3(%arg0: i32, %arg1: i32) -> (i32, i32, i32) {
    %c0_i32 = arith.constant 0 : i32
    %c0_i32_0 = arith.constant 0 : i32
    return %arg0, %arg1, %c0_i32 : i32, i32, i32
  }
}

module attributes {stable_mosaic.version = 11 : i64} {
  func.func @_mbr_kernel(%arg0: i32, %arg1: i32, %arg2: memref<1x256x128xbf16, #tpu.memory_space<vmem>>, %arg3: memref<128x16xbf16, #tpu.memory_space<vmem>>, %arg4: memref<1x16xf32, #tpu.memory_space<vmem>>, %arg5: memref<1x256x16xbf16, #tpu.memory_space<vmem>>) attributes {dimension_semantics = [#tpu.dimension_semantics<parallel>, #tpu.dimension_semantics<parallel>], iteration_bounds = array<i64: 2, 4>, scalar_prefetch = 0 : i64, scratch_operands = 0 : i64, tpu.core_type = #tpu.core_type<tc>, window_params = [{transform_indices = @transform_0, window_bounds = array<i64: 1, 256, 128>}, {pipeline_mode = #tpu.pipeline_mode<synchronous>, transform_indices = @transform_1, window_bounds = array<i64: 128, 16>}, {pipeline_mode = #tpu.pipeline_mode<synchronous>, transform_indices = @transform_2, window_bounds = array<i64: 1, 16>}, {transform_indices = @transform_3, window_bounds = array<i64: 1, 256, 16>}]} {
    %c0 = arith.constant 0 : index
    %c0_0 = arith.constant 0 : index
    %c0_1 = arith.constant 0 : index
    %0 = vector.load %arg2[%c0, %c0_0, %c0_1] : memref<1x256x128xbf16, #tpu.memory_space<vmem>>, vector<1x256x128xbf16>
    %1 = vector.shape_cast %0 : vector<1x256x128xbf16> to vector<256x128xbf16>
    %c0_2 = arith.constant 0 : index
    %c0_3 = arith.constant 0 : index
    %2 = vector.load %arg3[%c0_2, %c0_3] : memref<128x16xbf16, #tpu.memory_space<vmem>>, vector<128x16xbf16>
    %cst = arith.constant dense<0.000000e+00> : vector<256x16xf32>
    %3 = tpu.matmul %1, %2, %cst {dimension_numbers = #tpu.dot_dimension_numbers<[1], [0], [0], [1], [0, 0, 1, 1], [], []>} : vector<256x128xbf16>, vector<128x16xbf16>, vector<256x16xf32> -> vector<256x16xf32>
    %c0_4 = arith.constant 0 : index
    %c0_5 = arith.constant 0 : index
    %4 = vector.load %arg4[%c0_4, %c0_5] : memref<1x16xf32, #tpu.memory_space<vmem>>, vector<1x16xf32>
    %5 = vector.broadcast %4 : vector<1x16xf32> to vector<256x16xf32>
    %6 = arith.addf %3, %5 : vector<256x16xf32>
    %cst_6 = arith.constant 0.000000e+00 : f32
    %7 = vector.broadcast %cst_6 : f32 to vector<256x16xf32>
    %8 = arith.maximumf %6, %7 : vector<256x16xf32>
    %9 = arith.truncf %8 : vector<256x16xf32> to vector<256x16xbf16>
    %c0_7 = arith.constant 0 : index
    %c0_8 = arith.constant 0 : index
    %c0_9 = arith.constant 0 : index
    %10 = vector.load %arg5[%c0_7, %c0_8, %c0_9] : memref<1x256x16xbf16, #tpu.memory_space<vmem>>, vector<1x256x16xbf16>
    %11 = vector.shape_cast %10 : vector<1x256x16xbf16> to vector<256x16xbf16>
    %12 = vector.shape_cast %9 : vector<256x16xbf16> to vector<1x256x16xbf16>
    tpu.vector_store %arg5[%c0_7, %c0_8, %c0_9], %12 {strides = array<i32>} : memref<1x256x16xbf16, #tpu.memory_space<vmem>>, vector<1x256x16xbf16>,
    return
  }
  func.func @transform_0(%arg0: i32, %arg1: i32) -> (i32, i32, i32) {
    %c0_i32 = arith.constant 0 : i32
    %c0_i32_0 = arith.constant 0 : i32
    return %arg0, %arg1, %c0_i32 : i32, i32, i32
  }
  func.func @transform_1(%arg0: i32, %arg1: i32) -> (i32, i32) {
    %c0_i32 = arith.constant 0 : i32
    %c0_i32_0 = arith.constant 0 : i32
    %c0_i32_1 = arith.constant 0 : i32
    return %c0_i32, %c0_i32_0 : i32, i32
  }
  func.func @transform_2(%arg0: i32, %arg1: i32) -> (i32, i32) {
    %c0_i32 = arith.constant 0 : i32
    %c0_i32_0 = arith.constant 0 : i32
    %c0_i32_1 = arith.constant 0 : i32
    return %c0_i32, %c0_i32_0 : i32, i32
  }
  func.func @transform_3(%arg0: i32, %arg1: i32) -> (i32, i32, i32) {
    %c0_i32 = arith.constant 0 : i32
    %c0_i32_0 = arith.constant 0 : i32
    return %arg0, %arg1, %c0_i32 : i32, i32, i32
  }
}

module attributes {stable_mosaic.version = 11 : i64} {
  func.func @_mbr_kernel(%arg0: i32, %arg1: i32, %arg2: memref<1x256x256xbf16, #tpu.memory_space<vmem>>, %arg3: memref<256x32xbf16, #tpu.memory_space<vmem>>, %arg4: memref<1x32xf32, #tpu.memory_space<vmem>>, %arg5: memref<1x256x32xbf16, #tpu.memory_space<vmem>>) attributes {dimension_semantics = [#tpu.dimension_semantics<parallel>, #tpu.dimension_semantics<parallel>], iteration_bounds = array<i64: 2, 1>, scalar_prefetch = 0 : i64, scratch_operands = 0 : i64, tpu.core_type = #tpu.core_type<tc>, window_params = [{transform_indices = @transform_0, window_bounds = array<i64: 1, 256, 256>}, {pipeline_mode = #tpu.pipeline_mode<synchronous>, transform_indices = @transform_1, window_bounds = array<i64: 256, 32>}, {pipeline_mode = #tpu.pipeline_mode<synchronous>, transform_indices = @transform_2, window_bounds = array<i64: 1, 32>}, {transform_indices = @transform_3, window_bounds = array<i64: 1, 256, 32>}]} {
    %c0 = arith.constant 0 : index
    %c0_0 = arith.constant 0 : index
    %c0_1 = arith.constant 0 : index
    %0 = vector.load %arg2[%c0, %c0_0, %c0_1] : memref<1x256x256xbf16, #tpu.memory_space<vmem>>, vector<1x256x256xbf16>
    %1 = vector.shape_cast %0 : vector<1x256x256xbf16> to vector<256x256xbf16>
    %c0_2 = arith.constant 0 : index
    %c0_3 = arith.constant 0 : index
    %2 = vector.load %arg3[%c0_2, %c0_3] : memref<256x32xbf16, #tpu.memory_space<vmem>>, vector<256x32xbf16>
    %cst = arith.constant dense<0.000000e+00> : vector<256x32xf32>
    %3 = tpu.matmul %1, %2, %cst {dimension_numbers = #tpu.dot_dimension_numbers<[1], [0], [0], [1], [0, 0, 1, 1], [], []>} : vector<256x256xbf16>, vector<256x32xbf16>, vector<256x32xf32> -> vector<256x32xf32>
    %c0_4 = arith.constant 0 : index
    %c0_5 = arith.constant 0 : index
    %4 = vector.load %arg4[%c0_4, %c0_5] : memref<1x32xf32, #tpu.memory_space<vmem>>, vector<1x32xf32>
    %5 = vector.broadcast %4 : vector<1x32xf32> to vector<256x32xf32>
    %6 = arith.addf %3, %5 : vector<256x32xf32>
    %cst_6 = arith.constant 0.000000e+00 : f32
    %7 = vector.broadcast %cst_6 : f32 to vector<256x32xf32>
    %8 = arith.maximumf %6, %7 : vector<256x32xf32>
    %9 = arith.truncf %8 : vector<256x32xf32> to vector<256x32xbf16>
    %c0_7 = arith.constant 0 : index
    %c0_8 = arith.constant 0 : index
    %c0_9 = arith.constant 0 : index
    %10 = vector.load %arg5[%c0_7, %c0_8, %c0_9] : memref<1x256x32xbf16, #tpu.memory_space<vmem>>, vector<1x256x32xbf16>
    %11 = vector.shape_cast %10 : vector<1x256x32xbf16> to vector<256x32xbf16>
    %12 = vector.shape_cast %9 : vector<256x32xbf16> to vector<1x256x32xbf16>
    tpu.vector_store %arg5[%c0_7, %c0_8, %c0_9], %12 {strides = array<i32>} : memref<1x256x32xbf16, #tpu.memory_space<vmem>>, vector<1x256x32xbf16>,
    return
  }
  func.func @transform_0(%arg0: i32, %arg1: i32) -> (i32, i32, i32) {
    %c0_i32 = arith.constant 0 : i32
    %c0_i32_0 = arith.constant 0 : i32
    return %arg0, %arg1, %c0_i32 : i32, i32, i32
  }
  func.func @transform_1(%arg0: i32, %arg1: i32) -> (i32, i32) {
    %c0_i32 = arith.constant 0 : i32
    %c0_i32_0 = arith.constant 0 : i32
    %c0_i32_1 = arith.constant 0 : i32
    return %c0_i32, %c0_i32_0 : i32, i32
  }
  func.func @transform_2(%arg0: i32, %arg1: i32) -> (i32, i32) {
    %c0_i32 = arith.constant 0 : i32
    %c0_i32_0 = arith.constant 0 : i32
    %c0_i32_1 = arith.constant 0 : i32
    return %c0_i32, %c0_i32_0 : i32, i32
  }
  func.func @transform_3(%arg0: i32, %arg1: i32) -> (i32, i32, i32) {
    %c0_i32 = arith.constant 0 : i32
    %c0_i32_0 = arith.constant 0 : i32
    return %arg0, %arg1, %c0_i32 : i32, i32, i32
  }
}

module attributes {stable_mosaic.version = 11 : i64} {
  func.func @_mbr_kernel(%arg0: i32, %arg1: i32, %arg2: memref<1x64x512xbf16, #tpu.memory_space<vmem>>, %arg3: memref<512x64xbf16, #tpu.memory_space<vmem>>, %arg4: memref<1x64xf32, #tpu.memory_space<vmem>>, %arg5: memref<1x64x64xbf16, #tpu.memory_space<vmem>>) attributes {dimension_semantics = [#tpu.dimension_semantics<parallel>, #tpu.dimension_semantics<parallel>], iteration_bounds = array<i64: 2, 1>, scalar_prefetch = 0 : i64, scratch_operands = 0 : i64, tpu.core_type = #tpu.core_type<tc>, window_params = [{transform_indices = @transform_0, window_bounds = array<i64: 1, 64, 512>}, {pipeline_mode = #tpu.pipeline_mode<synchronous>, transform_indices = @transform_1, window_bounds = array<i64: 512, 64>}, {pipeline_mode = #tpu.pipeline_mode<synchronous>, transform_indices = @transform_2, window_bounds = array<i64: 1, 64>}, {transform_indices = @transform_3, window_bounds = array<i64: 1, 64, 64>}]} {
    %c0 = arith.constant 0 : index
    %c0_0 = arith.constant 0 : index
    %c0_1 = arith.constant 0 : index
    %0 = vector.load %arg2[%c0, %c0_0, %c0_1] : memref<1x64x512xbf16, #tpu.memory_space<vmem>>, vector<1x64x512xbf16>
    %1 = vector.shape_cast %0 : vector<1x64x512xbf16> to vector<64x512xbf16>
    %c0_2 = arith.constant 0 : index
    %c0_3 = arith.constant 0 : index
    %2 = vector.load %arg3[%c0_2, %c0_3] : memref<512x64xbf16, #tpu.memory_space<vmem>>, vector<512x64xbf16>
    %cst = arith.constant dense<0.000000e+00> : vector<64x64xf32>
    %3 = tpu.matmul %1, %2, %cst {dimension_numbers = #tpu.dot_dimension_numbers<[1], [0], [0], [1], [0, 0, 1, 1], [], []>} : vector<64x512xbf16>, vector<512x64xbf16>, vector<64x64xf32> -> vector<64x64xf32>
    %c0_4 = arith.constant 0 : index
    %c0_5 = arith.constant 0 : index
    %4 = vector.load %arg4[%c0_4, %c0_5] : memref<1x64xf32, #tpu.memory_space<vmem>>, vector<1x64xf32>
    %5 = vector.broadcast %4 : vector<1x64xf32> to vector<64x64xf32>
    %6 = arith.addf %3, %5 : vector<64x64xf32>
    %cst_6 = arith.constant 0.000000e+00 : f32
    %7 = vector.broadcast %cst_6 : f32 to vector<64x64xf32>
    %8 = arith.maximumf %6, %7 : vector<64x64xf32>
    %9 = arith.truncf %8 : vector<64x64xf32> to vector<64x64xbf16>
    %c0_7 = arith.constant 0 : index
    %c0_8 = arith.constant 0 : index
    %c0_9 = arith.constant 0 : index
    %10 = vector.load %arg5[%c0_7, %c0_8, %c0_9] : memref<1x64x64xbf16, #tpu.memory_space<vmem>>, vector<1x64x64xbf16>
    %11 = vector.shape_cast %10 : vector<1x64x64xbf16> to vector<64x64xbf16>
    %12 = vector.shape_cast %9 : vector<64x64xbf16> to vector<1x64x64xbf16>
    tpu.vector_store %arg5[%c0_7, %c0_8, %c0_9], %12 {strides = array<i32>} : memref<1x64x64xbf16, #tpu.memory_space<vmem>>, vector<1x64x64xbf16>,
    return
  }
  func.func @transform_0(%arg0: i32, %arg1: i32) -> (i32, i32, i32) {
    %c0_i32 = arith.constant 0 : i32
    %c0_i32_0 = arith.constant 0 : i32
    return %arg0, %arg1, %c0_i32 : i32, i32, i32
  }
  func.func @transform_1(%arg0: i32, %arg1: i32) -> (i32, i32) {
    %c0_i32 = arith.constant 0 : i32
    %c0_i32_0 = arith.constant 0 : i32
    %c0_i32_1 = arith.constant 0 : i32
    return %c0_i32, %c0_i32_0 : i32, i32
  }
  func.func @transform_2(%arg0: i32, %arg1: i32) -> (i32, i32) {
    %c0_i32 = arith.constant 0 : i32
    %c0_i32_0 = arith.constant 0 : i32
    %c0_i32_1 = arith.constant 0 : i32
    return %c0_i32, %c0_i32_0 : i32, i32
  }
  func.func @transform_3(%arg0: i32, %arg1: i32) -> (i32, i32, i32) {
    %c0_i32 = arith.constant 0 : i32
    %c0_i32_0 = arith.constant 0 : i32
    return %arg0, %arg1, %c0_i32 : i32, i32, i32
  }
}

module attributes {stable_mosaic.version = 11 : i64} {
  func.func @_mbr_kernel(%arg0: i32, %arg1: i32, %arg2: memref<1x2x2048xbf16, #tpu.memory_space<vmem>>, %arg3: memref<2048x32xbf16, #tpu.memory_space<vmem>>, %arg4: memref<1x32xf32, #tpu.memory_space<vmem>>, %arg5: memref<1x2x32xf32, #tpu.memory_space<vmem>>) attributes {dimension_semantics = [#tpu.dimension_semantics<parallel>, #tpu.dimension_semantics<parallel>], iteration_bounds = array<i64: 1, 1>, scalar_prefetch = 0 : i64, scratch_operands = 0 : i64, tpu.core_type = #tpu.core_type<tc>, window_params = [{transform_indices = @transform_0, window_bounds = array<i64: 1, 2, 2048>}, {pipeline_mode = #tpu.pipeline_mode<synchronous>, transform_indices = @transform_1, window_bounds = array<i64: 2048, 32>}, {pipeline_mode = #tpu.pipeline_mode<synchronous>, transform_indices = @transform_2, window_bounds = array<i64: 1, 32>}, {transform_indices = @transform_3, window_bounds = array<i64: 1, 2, 32>}]} {
    %c0 = arith.constant 0 : index
    %c0_0 = arith.constant 0 : index
    %c0_1 = arith.constant 0 : index
    %0 = vector.load %arg2[%c0, %c0_0, %c0_1] : memref<1x2x2048xbf16, #tpu.memory_space<vmem>>, vector<1x2x2048xbf16>
    %1 = vector.shape_cast %0 : vector<1x2x2048xbf16> to vector<2x2048xbf16>
    %c0_2 = arith.constant 0 : index
    %c0_3 = arith.constant 0 : index
    %2 = vector.load %arg3[%c0_2, %c0_3] : memref<2048x32xbf16, #tpu.memory_space<vmem>>, vector<2048x32xbf16>
    %cst = arith.constant dense<0.000000e+00> : vector<2x32xf32>
    %3 = tpu.matmul %1, %2, %cst {dimension_numbers = #tpu.dot_dimension_numbers<[1], [0], [0], [1], [0, 0, 1, 1], [], []>} : vector<2x2048xbf16>, vector<2048x32xbf16>, vector<2x32xf32> -> vector<2x32xf32>
    %c0_4 = arith.constant 0 : index
    %c0_5 = arith.constant 0 : index
    %4 = vector.load %arg4[%c0_4, %c0_5] : memref<1x32xf32, #tpu.memory_space<vmem>>, vector<1x32xf32>
    %5 = vector.broadcast %4 : vector<1x32xf32> to vector<2x32xf32>
    %6 = arith.addf %3, %5 : vector<2x32xf32>
    %cst_6 = arith.constant 0.000000e+00 : f32
    %7 = vector.broadcast %cst_6 : f32 to vector<2x32xf32>
    %8 = arith.maximumf %6, %7 : vector<2x32xf32>
    %c0_7 = arith.constant 0 : index
    %c0_8 = arith.constant 0 : index
    %c0_9 = arith.constant 0 : index
    %9 = vector.load %arg5[%c0_7, %c0_8, %c0_9] : memref<1x2x32xf32, #tpu.memory_space<vmem>>, vector<1x2x32xf32>
    %10 = vector.shape_cast %9 : vector<1x2x32xf32> to vector<2x32xf32>
    %11 = vector.shape_cast %8 : vector<2x32xf32> to vector<1x2x32xf32>
    tpu.vector_store %arg5[%c0_7, %c0_8, %c0_9], %11 {strides = array<i32>} : memref<1x2x32xf32, #tpu.memory_space<vmem>>, vector<1x2x32xf32>,
    return
  }
  func.func @transform_0(%arg0: i32, %arg1: i32) -> (i32, i32, i32) {
    %c0_i32 = arith.constant 0 : i32
    %c0_i32_0 = arith.constant 0 : i32
    return %arg0, %arg1, %c0_i32 : i32, i32, i32
  }
  func.func @transform_1(%arg0: i32, %arg1: i32) -> (i32, i32) {
    %c0_i32 = arith.constant 0 : i32
    %c0_i32_0 = arith.constant 0 : i32
    %c0_i32_1 = arith.constant 0 : i32
    return %c0_i32, %c0_i32_0 : i32, i32
  }
  func.func @transform_2(%arg0: i32, %arg1: i32) -> (i32, i32) {
    %c0_i32 = arith.constant 0 : i32
    %c0_i32_0 = arith.constant 0 : i32
    %c0_i32_1 = arith.constant 0 : i32
    return %c0_i32, %c0_i32_0 : i32, i32
  }
  func.func @transform_3(%arg0: i32, %arg1: i32) -> (i32, i32, i32) {
    %c0_i32 = arith.constant 0 : i32
    %c0_i32_0 = arith.constant 0 : i32
    return %arg0, %arg1, %c0_i32 : i32, i32, i32
  }
}

module attributes {stable_mosaic.version = 11 : i64} {
  func.func @_mbr_kernel(%arg0: i32, %arg1: i32, %arg2: memref<1x16x1024xbf16, #tpu.memory_space<vmem>>, %arg3: memref<1024x128xbf16, #tpu.memory_space<vmem>>, %arg4: memref<1x128xf32, #tpu.memory_space<vmem>>, %arg5: memref<1x16x128xbf16, #tpu.memory_space<vmem>>) attributes {dimension_semantics = [#tpu.dimension_semantics<parallel>, #tpu.dimension_semantics<parallel>], iteration_bounds = array<i64: 2, 1>, scalar_prefetch = 0 : i64, scratch_operands = 0 : i64, tpu.core_type = #tpu.core_type<tc>, window_params = [{transform_indices = @transform_0, window_bounds = array<i64: 1, 16, 1024>}, {pipeline_mode = #tpu.pipeline_mode<synchronous>, transform_indices = @transform_1, window_bounds = array<i64: 1024, 128>}, {pipeline_mode = #tpu.pipeline_mode<synchronous>, transform_indices = @transform_2, window_bounds = array<i64: 1, 128>}, {transform_indices = @transform_3, window_bounds = array<i64: 1, 16, 128>}]} {
    %c0 = arith.constant 0 : index
    %c0_0 = arith.constant 0 : index
    %c0_1 = arith.constant 0 : index
    %0 = vector.load %arg2[%c0, %c0_0, %c0_1] : memref<1x16x1024xbf16, #tpu.memory_space<vmem>>, vector<1x16x1024xbf16>
    %1 = vector.shape_cast %0 : vector<1x16x1024xbf16> to vector<16x1024xbf16>
    %c0_2 = arith.constant 0 : index
    %c0_3 = arith.constant 0 : index
    %2 = vector.load %arg3[%c0_2, %c0_3] : memref<1024x128xbf16, #tpu.memory_space<vmem>>, vector<1024x128xbf16>
    %cst = arith.constant dense<0.000000e+00> : vector<16x128xf32>
    %3 = tpu.matmul %1, %2, %cst {dimension_numbers = #tpu.dot_dimension_numbers<[1], [0], [0], [1], [0, 0, 1, 1], [], []>} : vector<16x1024xbf16>, vector<1024x128xbf16>, vector<16x128xf32> -> vector<16x128xf32>
    %c0_4 = arith.constant 0 : index
    %c0_5 = arith.constant 0 : index
    %4 = vector.load %arg4[%c0_4, %c0_5] : memref<1x128xf32, #tpu.memory_space<vmem>>, vector<1x128xf32>
    %5 = vector.broadcast %4 : vector<1x128xf32> to vector<16x128xf32>
    %6 = arith.addf %3, %5 : vector<16x128xf32>
    %cst_6 = arith.constant 0.000000e+00 : f32
    %7 = vector.broadcast %cst_6 : f32 to vector<16x128xf32>
    %8 = arith.maximumf %6, %7 : vector<16x128xf32>
    %9 = arith.truncf %8 : vector<16x128xf32> to vector<16x128xbf16>
    %c0_7 = arith.constant 0 : index
    %c0_8 = arith.constant 0 : index
    %c0_9 = arith.constant 0 : index
    %10 = vector.load %arg5[%c0_7, %c0_8, %c0_9] : memref<1x16x128xbf16, #tpu.memory_space<vmem>>, vector<1x16x128xbf16>
    %11 = vector.shape_cast %10 : vector<1x16x128xbf16> to vector<16x128xbf16>
    %12 = vector.shape_cast %9 : vector<16x128xbf16> to vector<1x16x128xbf16>
    tpu.vector_store %arg5[%c0_7, %c0_8, %c0_9], %12 {strides = array<i32>} : memref<1x16x128xbf16, #tpu.memory_space<vmem>>, vector<1x16x128xbf16>,
    return
  }
  func.func @transform_0(%arg0: i32, %arg1: i32) -> (i32, i32, i32) {
    %c0_i32 = arith.constant 0 : i32
    %c0_i32_0 = arith.constant 0 : i32
    return %arg0, %arg1, %c0_i32 : i32, i32, i32
  }
  func.func @transform_1(%arg0: i32, %arg1: i32) -> (i32, i32) {
    %c0_i32 = arith.constant 0 : i32
    %c0_i32_0 = arith.constant 0 : i32
    %c0_i32_1 = arith.constant 0 : i32
    return %c0_i32, %c0_i32_0 : i32, i32
  }
  func.func @transform_2(%arg0: i32, %arg1: i32) -> (i32, i32) {
    %c0_i32 = arith.constant 0 : i32
    %c0_i32_0 = arith.constant 0 : i32
    %c0_i32_1 = arith.constant 0 : i32
    return %c0_i32, %c0_i32_0 : i32, i32
  }
  func.func @transform_3(%arg0: i32, %arg1: i32) -> (i32, i32, i32) {
    %c0_i32 = arith.constant 0 : i32
    %c0_i32_0 = arith.constant 0 : i32
    return %arg0, %arg1, %c0_i32 : i32, i32, i32
  }
}

</mosaic_0001>

<bundles_post_ra>
// kernel: encoder_forward.6
= control target key start
LH: loop header
LB: loop body
LE: loop exit
PB: predicated region body
PF: predicated region fallthrough
CT: control target
= control target key end

     0   :  { %s3063_s12 = smov 0   ;;  %s3065_s13 = smov 0   ;;  %s3659_s0 = inlined_call_operand.vmem [shape: bf16[2,4096,48], index: 0, kind: input, shape index: {}]   ;;  %s3660_s1 = inlined_call_operand.vmem [shape: bf16[48,8], index: 1, kind: input, shape index: {}]   ;;  %s3661_s2 = inlined_call_operand.vmem [shape: f32[1,8], index: 2, kind: input, shape index: {}]   ;;  %s3662_s3 = inlined_call_operand.vmem [shape: bf16[2,4096,8], index: 3, kind: output, shape index: {}]  }
   0x1   :  { %s3067_s14 = smov 0   ;;  %s3069_s15 = smov 0  }
   0x2   :  { %s3071_s16 = smov 0  }
   0x3 LB: > { %s22_s17 = sadd.s32 1, %s3033_s14  ;;  %s25_s18 = sadd.s32 1, %s3037_s15  ;;  %s3041_s16 = sphi %s3071_s16, %s13_s16   ;;  %s3037_s15 = sphi %s3069_s15, %s3666_s15   ;;  %s3033_s14 = sphi %s3067_s14, %s3665_s14   ;;  %s3029_s13 = sphi %s3065_s13, %s3664_s13   ;;  %s3025_s12 = sphi %s3063_s12, %s3663_s12  }
   0x4   : > { %p23_p0 = scmp.ge.s32.totalorder %s22_s17, 4  ;;  %p2291_p1 = scmp.ge.s32.totalorder %s3041_s16, 1 }
   0x5   : > { %p158_p2 = scmp.lt.s32.totalorder %s3041_s16, 9 }
   0x6   : > { %s3668_s17 = smov (%p23_p0, %s22_s17), 0  ;;  %s3670_s18 = smov (!%p23_p0, %s25_s18), %s3037_s15 }
   0x7   : > { %p159_p3 = pnand %p2291_p1, %p158_p2  ;;  %p27_p4 = scmp.ge.s32.totalorder %s3670_s18, 2 }
   0x8   : > { %v2935_v0 = vld [vmem:[%s3660_s1] sm:$0xff] (!%p159_p3)   ;;  %s2292_s21 = sshll.u32 (!%p159_p3), %s3025_s12, 7  ;;  %v2936_v1 = vld [vmem:[%s3660_s1 + $0x8] sm:$0xff] (!%p159_p3)   ;;  %p191_p5 = scmp.lt.s32.totalorder (!%p159_p3), %s3029_s13, 1  ;;  %v2937_v2 = vld [vmem:[%s3660_s1 + $0x10] sm:$0xff] (!%p159_p3)   ;;  %vm690_vm0 = vcmask (!%p159_p3), 392192  }
   0x9   : > { %s3672_s18 = smov (%p27_p4, %s3670_s18), 0  ;;  %162 = sbr.rel (%p159_p3) target bundleno = 366 (0x16e), region = 32 }
   0xa   : > { %2755 = vmatprep.subr.bf16.mxu0 (!%p159_p3), %v2935_v0  ;;  %2889 = vmatprep.subr.bf16.mxu1 (!%p159_p3), %v2935_v0  ;;  %p193_p6 = scmp.lt.s32.totalorder (!%p159_p3), %s2292_s21, 511  ;;  %vm2068_vm1 = vcmask (!%p159_p3), 60416  }
   0xb   : > { %2756 = vmatpush3.bf16.msra.mxu0 (!%p159_p3), %v2935_v0  ;;  %2892 = vmatpush3.bf16.msra.mxu1 (!%p159_p3), %v2935_v0 }
   0xc   : > { %2757 = vmatprep.subr.bf16.mxu0 (!%p159_p3), %v2936_v1  ;;  %2890 = vmatprep.subr.bf16.mxu1 (!%p159_p3), %v2936_v1 }
   0xf   : > { %2758 = vmatpush3.bf16.msra.mxu0 (!%p159_p3), %v2936_v1  ;;  %2893 = vmatpush3.bf16.msra.mxu1 (!%p159_p3), %v2936_v1 }
  0x10   : > { %s3674_s13 = smov (!%p191_p5, %s3029_s13), 1  ;;  %s3676_s21 = smov (!%p193_p6, %s2292_s21), 511  ;;  %2759 = vmatprep.subr.bf16.mxu0 %v2937_v2  ;;  %2891 = vmatprep.subr.bf16.mxu1 %v2937_v2 }
  0x11   : > { %s2293_s26 = sshll.u32 %s3674_s13, 9 }
  0x12   : > { %s3105_s27 = sadd.s32 %s2293_s26, %s3676_s21 }
  0x13   : > { %s2294_s28 = sshll.u32 %s3105_s27, 2  ;;  %2760 = vmatpush3.bf16.msra.mxu0 %v2937_v2  ;;  %2894 = vmatpush3.bf16.msra.mxu1 %v2937_v2 }
  0x14   : > { %s3113_s4 = scalar_lea.vmem %s3659_s0, %s2294_s28  ;;  %s3259_s9 = scalar_lea.vmem %s3662_s3, %s2294_s28 }
  0x15   : > { %v2938_v3 = vld [vmem:[%s3113_s4] sm:$0xff]   ;;  %v2940_v5 = vld [vmem:[%s3113_s4 + $0x8] sm:$0xff]   ;;  %v2942_v7 = vld [vmem:[%s3113_s4 + $0x10] sm:$0xff]  }
  0x16   : > { %v2939_v4 = vld [vmem:[%s3113_s4 + $0x100] sm:$0xff]   ;;  %2761 = vmatprep.mubr.msk.bf16.mxu0 %vm690_vm0, %v2938_v3  ;;  %v2941_v6 = vld [vmem:[%s3113_s4 + $0x108] sm:$0xff]   ;;  %v2943_v8 = vld [vmem:[%s3113_s4 + $0x110] sm:$0xff]  }
  0x17   : > { %2825 = vmatprep.mubr.msk.bf16.mxu1 %vm690_vm0, %v2939_v4  ;;  %2762 = vmatmul.mubr.msk.bf16.vlgmr.msra.gmra.mrb[0].mxu0 %vm690_vm0, %v2940_v5  ;;  %v2944_v9 = vld [vmem:[%s3113_s4 + $0x18] sm:$0xff]   ;;  %v2946_v11 = vld [vmem:[%s3113_s4 + $0x20] sm:$0xff]   ;;  %v2948_v13 = vld [vmem:[%s3113_s4 + $0x28] sm:$0xff]  }
  0x18   : > { %2826 = vmatmul.mubr.msk.bf16.vlgmr.msra.gmra.mrb[0].mxu1 %vm690_vm0, %v2941_v6  ;;  %2765 = vmatprep.mubr.msk.bf16.mxu0 %vm690_vm0, %v2942_v7  ;;  %v2945_v10 = vld [vmem:[%s3113_s4 + $0x118] sm:$0xff]   ;;  %v2947_v12 = vld [vmem:[%s3113_s4 + $0x120] sm:$0xff]   ;;  %v2949_v14 = vld [vmem:[%s3113_s4 + $0x128] sm:$0xff]  }
  0x19   : > { %2829 = vmatprep.mubr.msk.bf16.mxu1 %vm690_vm0, %v2943_v8  ;;  %v2950_v15 = vld [vmem:[%s3113_s4 + $0x30] sm:$0xff]   ;;  %v2952_v17 = vld [vmem:[%s3113_s4 + $0x38] sm:$0xff]   ;;  %v2954_v19 = vld [vmem:[%s3113_s4 + $0x40] sm:$0xff]  }
  0x1a   : > { %v2951_v16 = vld [vmem:[%s3113_s4 + $0x130] sm:$0xff]   ;;  %v2953_v18 = vld [vmem:[%s3113_s4 + $0x138] sm:$0xff]   ;;  %v2955_v20 = vld [vmem:[%s3113_s4 + $0x140] sm:$0xff]  }
  0x1b   : > { %v2956_v21 = vld [vmem:[%s3113_s4 + $0x48] sm:$0xff]   ;;  %v2958_v23 = vld [vmem:[%s3113_s4 + $0x50] sm:$0xff]   ;;  %v2960_v25 = vld [vmem:[%s3113_s4 + $0x58] sm:$0xff]  }
  0x1c   : > { %v2957_v22 = vld [vmem:[%s3113_s4 + $0x148] sm:$0xff]   ;;  %v2959_v24 = vld [vmem:[%s3113_s4 + $0x150] sm:$0xff]   ;;  %v2961_v26 = vld [vmem:[%s3113_s4 + $0x158] sm:$0xff]  }
  0x1d   : > { %v2962_v27 = vld [vmem:[%s3113_s4 + $0x60] sm:$0xff]   ;;  %v2964_v29 = vld [vmem:[%s3113_s4 + $0x68] sm:$0xff]   ;;  %v2966_v31 = vld [vmem:[%s3113_s4 + $0x70] sm:$0xff]  }
  0x1e   : > { %v2963_v28 = vld [vmem:[%s3113_s4 + $0x160] sm:$0xff]   ;;  %v2965_v30 = vld [vmem:[%s3113_s4 + $0x168] sm:$0xff]   ;;  %v2967_v32 = vld [vmem:[%s3113_s4 + $0x170] sm:$0xff]  }
  0x1f   : > { %2766 = vmatmul.mubr.msk.bf16.gmra.mrb[4].mxu0 %vm690_vm0, %v2944_v9  ;;  %v2968_v33 = vld [vmem:[%s3113_s4 + $0x78] sm:$0xff]   ;;  %v2970_v35 = vld [vmem:[%s3113_s4 + $0x80] sm:$0xff]   ;;  %v2972_v37 = vld [vmem:[%s3113_s4 + $0x88] sm:$0xff]  }
  0x20   : > { %2830 = vmatmul.mubr.msk.bf16.gmra.mrb[4].mxu1 %vm690_vm0, %v2945_v10  ;;  %2769 = vmatprep.mubr.msk.bf16.mxu0 %vm690_vm0, %v2946_v11  ;;  %v2969_v34 = vld [vmem:[%s3113_s4 + $0x178] sm:$0xff]   ;;  %v2971_v36 = vld [vmem:[%s3113_s4 + $0x180] sm:$0xff]   ;;  %v2973_v38 = vld [vmem:[%s3113_s4 + $0x188] sm:$0xff]  }
  0x21   : > { %2833 = vmatprep.mubr.msk.bf16.mxu1 %vm690_vm0, %v2947_v12  ;;  %v2974_v39 = vld [vmem:[%s3113_s4 + $0x90] sm:$0xff]   ;;  %v2976_v41 = vld [vmem:[%s3113_s4 + $0x98] sm:$0xff]   ;;  %v2978_v43 = vld [vmem:[%s3113_s4 + $0xa0] sm:$0xff]  }
  0x22   : > { %v2975_v40 = vld [vmem:[%s3113_s4 + $0x190] sm:$0xff]   ;;  %v2977_v42 = vld [vmem:[%s3113_s4 + $0x198] sm:$0xff]   ;;  %v2979_v44 = vld [vmem:[%s3113_s4 + $0x1a0] sm:$0xff]  }
  0x23   : > { %v2980_v45 = vld [vmem:[%s3113_s4 + $0xa8] sm:$0xff]   ;;  %v2982_v47 = vld [vmem:[%s3113_s4 + $0xb0] sm:$0xff]   ;;  %v2984_v49 = vld [vmem:[%s3113_s4 + $0xb8] sm:$0xff]  }
  0x24   : > { %v2981_v46 = vld [vmem:[%s3113_s4 + $0x1a8] sm:$0xff]   ;;  %v2983_v48 = vld [vmem:[%s3113_s4 + $0x1b0] sm:$0xff]   ;;  %v2985_v50 = vld [vmem:[%s3113_s4 + $0x1b8] sm:$0xff]  }
  0x25   : > { %v2986_v51 = vld [vmem:[%s3113_s4 + $0xc0] sm:$0xff]   ;;  %v2988_v53 = vld [vmem:[%s3113_s4 + $0xc8] sm:$0xff]   ;;  %v2990_v55 = vld [vmem:[%s3113_s4 + $0xd0] sm:$0xff]  }
  0x26   : > { %v2987_v52 = vld [vmem:[%s3113_s4 + $0x1c0] sm:$0xff]   ;;  %v2989_v54 = vld [vmem:[%s3113_s4 + $0x1c8] sm:$0xff]   ;;  %v2991_v56 = vld [vmem:[%s3113_s4 + $0x1d0] sm:$0xff]  }
  0x27   : > { %2770 = vmatmul.mubr.msk.bf16.gmra.mrb[8].mxu0 %vm690_vm0, %v2948_v13  ;;  %v2992_v57 = vld [vmem:[%s3113_s4 + $0xd8] sm:$0xff]   ;;  %v2994_v59 = vld [vmem:[%s3113_s4 + $0xe0] sm:$0xff]   ;;  %v2996_v61 = vld [vmem:[%s3113_s4 + $0xe8] sm:$0xff]  }
  0x28   : > { %2834 = vmatmul.mubr.msk.bf16.gmra.mrb[8].mxu1 %vm690_vm0, %v2949_v14  ;;  %2773 = vmatprep.mubr.msk.bf16.mxu0 %vm690_vm0, %v2950_v15  ;;  %v2993_v58 = vld [vmem:[%s3113_s4 + $0x1d8] sm:$0xff]   ;;  %v2995_v60 = vld [vmem:[%s3113_s4 + $0x1e0] sm:$0xff]   ;;  %v2997_v62 = vld [vmem:[%s3113_s4 + $0x1e8] sm:$0xff]  }
  0x29   : > { %2837 = vmatprep.mubr.msk.bf16.mxu1 %vm690_vm0, %v2951_v16  ;;  %v2998_v63 = vld [vmem:[%s3113_s4 + $0xf0] sm:$0xff]   ;;  %v3000_v1 = vld [vmem:[%s3113_s4 + $0xf8] sm:$0xff]   ;;  %v3246_v3 = vld [vmem:[%s3661_s2] ss:$0 sm:$0xff] }
  0x2a   : > { %v2999_v0 = vld [vmem:[%s3113_s4 + $0x1f0] sm:$0xff]   ;;  %v3001_v2 = vld [vmem:[%s3113_s4 + $0x1f8] sm:$0xff]  }
  0x2f   : > { %2774 = vmatmul.mubr.msk.bf16.gmra.mrb[12].mxu0 %vm690_vm0, %v2952_v17 }
  0x30   : > { %2838 = vmatmul.mubr.msk.bf16.gmra.mrb[12].mxu1 %vm690_vm0, %v2953_v18  ;;  %2777 = vmatprep.mubr.msk.bf16.mxu0 %vm690_vm0, %v2954_v19 }
  0x31   : > { %2841 = vmatprep.mubr.msk.bf16.mxu1 %vm690_vm0, %v2955_v20 }
  0x37   : > { %2778 = vmatmul.mubr.msk.bf16.gmra.mrb[16].mxu0 %vm690_vm0, %v2956_v21 }
  0x38   : > { %2842 = vmatmul.mubr.msk.bf16.gmra.mrb[16].mxu1 %vm690_vm0, %v2957_v22  ;;  %2781 = vmatprep.mubr.msk.bf16.mxu0 %vm690_vm0, %v2958_v23 }
  0x39   : > { %2845 = vmatprep.mubr.msk.bf16.mxu1 %vm690_vm0, %v2959_v24 }
  0x3f   : > { %2782 = vmatmul.mubr.msk.bf16.gmra.mrb[20].mxu0 %vm690_vm0, %v2960_v25 }
  0x40   : > { %2846 = vmatmul.mubr.msk.bf16.gmra.mrb[20].mxu1 %vm690_vm0, %v2961_v26  ;;  %2785 = vmatprep.mubr.msk.bf16.mxu0 %vm690_vm0, %v2962_v27 }
  0x41   : > { %2849 = vmatprep.mubr.msk.bf16.mxu1 %vm690_vm0, %v2963_v28 }
  0x47   : > { %2786 = vmatmul.mubr.msk.bf16.gmra.mrb[24].mxu0 %vm690_vm0, %v2964_v29 }
  0x48   : > { %2850 = vmatmul.mubr.msk.bf16.gmra.mrb[24].mxu1 %vm690_vm0, %v2965_v30  ;;  %2789 = vmatprep.mubr.msk.bf16.mxu0 %vm690_vm0, %v2966_v31 }
  0x49   : > { %2853 = vmatprep.mubr.msk.bf16.mxu1 %vm690_vm0, %v2967_v32 }
  0x4f   : > { %2790 = vmatmul.mubr.msk.bf16.gmra.mrb[28].mxu0 %vm690_vm0, %v2968_v33 }
  0x50   : > { %2854 = vmatmul.mubr.msk.bf16.gmra.mrb[28].mxu1 %vm690_vm0, %v2969_v34  ;;  %2793 = vmatprep.mubr.msk.bf16.mxu0 %vm690_vm0, %v2970_v35 }
  0x51   : > { %2857 = vmatprep.mubr.msk.bf16.mxu1 %vm690_vm0, %v2971_v36 }
  0x57   : > { %2794 = vmatmul.mubr.msk.bf16.gmra.mrb[32].mxu0 %vm690_vm0, %v2972_v37 }
  0x58   : > { %2858 = vmatmul.mubr.msk.bf16.gmra.mrb[32].mxu1 %vm690_vm0, %v2973_v38  ;;  %2797 = vmatprep.mubr.msk.bf16.mxu0 %vm690_vm0, %v2974_v39 }
  0x59   : > { %2861 = vmatprep.mubr.msk.bf16.mxu1 %vm690_vm0, %v2975_v40 }
  0x5f   : > { %2798 = vmatmul.mubr.msk.bf16.gmra.mrb[36].mxu0 %vm690_vm0, %v2976_v41 }
  0x60   : > { %2862 = vmatmul.mubr.msk.bf16.gmra.mrb[36].mxu1 %vm690_vm0, %v2977_v42  ;;  %2801 = vmatprep.mubr.msk.bf16.mxu0 %vm690_vm0, %v2978_v43 }
  0x61   : > { %2865 = vmatprep.mubr.msk.bf16.mxu1 %vm690_vm0, %v2979_v44 }
  0x67   : > { %2802 = vmatmul.mubr.msk.bf16.gmra.mrb[40].mxu0 %vm690_vm0, %v2980_v45 }
  0x68   : > { %2866 = vmatmul.mubr.msk.bf16.gmra.mrb[40].mxu1 %vm690_vm0, %v2981_v46  ;;  %2805 = vmatprep.mubr.msk.bf16.mxu0 %vm690_vm0, %v2982_v47 }
  0x69   : > { %2869 = vmatprep.mubr.msk.bf16.mxu1 %vm690_vm0, %v2983_v48 }
  0x6f   : > { %2806 = vmatmul.mubr.msk.bf16.gmra.mrb[44].mxu0 %vm690_vm0, %v2984_v49 }
  0x70   : > { %2870 = vmatmul.mubr.msk.bf16.gmra.mrb[44].mxu1 %vm690_vm0, %v2985_v50  ;;  %2809 = vmatprep.mubr.msk.bf16.mxu0 %vm690_vm0, %v2986_v51 }
  0x71   : > { %2873 = vmatprep.mubr.msk.bf16.mxu1 %vm690_vm0, %v2987_v52 }
  0x77   : > { %2810 = vmatmul.mubr.msk.bf16.gmra.mrb[48].mxu0 %vm690_vm0, %v2988_v53 }
  0x78   : > { %2874 = vmatmul.mubr.msk.bf16.gmra.mrb[48].mxu1 %vm690_vm0, %v2989_v54  ;;  %2813 = vmatprep.mubr.msk.bf16.mxu0 %vm690_vm0, %v2990_v55 }
  0x79   : > { %2877 = vmatprep.mubr.msk.bf16.mxu1 %vm690_vm0, %v2991_v56 }
  0x7f   : > { %2814 = vmatmul.mubr.msk.bf16.gmra.mrb[52].mxu0 %vm690_vm0, %v2992_v57 }
  0x80   : > { %2878 = vmatmul.mubr.msk.bf16.gmra.mrb[52].mxu1 %vm690_vm0, %v2993_v58  ;;  %2817 = vmatprep.mubr.msk.bf16.mxu0 %vm690_vm0, %v2994_v59 }
  0x81   : > { %2881 = vmatprep.mubr.msk.bf16.mxu1 %vm690_vm0, %v2995_v60 }
  0x87   : > { %2818 = vmatmul.mubr.msk.bf16.gmra.mrb[56].mxu0 %vm690_vm0, %v2996_v61 }
  0x88   : > { %2882 = vmatmul.mubr.msk.bf16.gmra.mrb[56].mxu1 %vm690_vm0, %v2997_v62  ;;  %2821 = vmatprep.mubr.msk.bf16.mxu0 %vm690_vm0, %v2998_v63 }
  0x89   : > { %2885 = vmatprep.mubr.msk.bf16.mxu1 %vm690_vm0, %v2999_v0 }
  0x8f   : > { %2822 = vmatmul.mubr.msk.bf16.gmra.mrb[60].mxu0 %vm690_vm0, %v3000_v1 }
  0x90   : > { %2886 = vmatmul.mubr.msk.bf16.gmra.mrb[60].mxu1 %vm690_vm0, %v3001_v2 }
  0xea   : > { %v2763_v4 = vpop.f32.mrb[0].mxu0 }
  0xeb   : > { %v2827_v5 = vpop.f32.mrb[0].mxu1  ;;  %v926_v6 = vadd.f32 %v2763_v4, %v3246_v3  ;;  %v917_v8 = vpop.f32.mrb[1].mxu0 }
  0xec   : > { %v1182_v7 = vadd.f32 %v2827_v5, %v3246_v3  ;;  %v1173_v9 = vpop.f32.mrb[1].mxu1  ;;  %v918_v10 = vadd.f32 %v3246_v3, %v917_v8  ;;  %v2764_v12 = vpop.f32.mrb[2].mxu0 }
  0xed   : > { %v1174_v11 = vadd.f32 %v3246_v3, %v1173_v9  ;;  %v2828_v13 = vpop.f32.mrb[2].mxu1  ;;  %v1430_v14 = vmax.f32 %v926_v6, 0.0  ;;  %v929_v16 = vadd.f32 %v2764_v12, %v3246_v3  ;;  %v920_v18 = vpop.f32.mrb[3].mxu0 }
  0xee   : > { %v1494_v15 = vmax.f32 %v1182_v7, 0.0  ;;  %v1185_v17 = vadd.f32 %v2828_v13, %v3246_v3  ;;  %v1176_v19 = vpop.f32.mrb[3].mxu1  ;;  %v1428_v20 = vmax.f32 %v918_v10, 0.0  ;;  %v921_v22 = vadd.f32 %v3246_v3, %v920_v18 }
  0xef   : > { %v1492_v21 = vmax.f32 %v1174_v11, 0.0  ;;  %v1177_v23 = vadd.f32 %v3246_v3, %v1176_v19  ;;  %v2562_v24 = vpack.c.bf16 %v1430_v14, %v1430_v14  ;;  %v1431_v26 = vmax.f32 %v929_v16, 0.0 }
  0xf0   : > { %v2626_v25 = vpack.c.bf16 %v1494_v15, %v1494_v15  ;;  %v1495_v27 = vmax.f32 %v1185_v17, 0.0  ;;  %v2560_v28 = vpack.c.bf16 %v1428_v20, %v1428_v20  ;;  %v1429_v30 = vmax.f32 %v921_v22, 0.0 }
  0xf1   : > { %v2624_v29 = vpack.c.bf16 %v1492_v21, %v1492_v21  ;;  %v1493_v31 = vmax.f32 %v1177_v23, 0.0  ;;  %2071 = vst.msk [vmem:[%s3259_s9 + $0x8] sm:$0xf] %vm2068_vm1, %v2562_v24  ;;  %v2563_v32 = vpack.c.bf16 %v1431_v26, %v1431_v26 }
  0xf2   : > { %2135 = vst.msk [vmem:[%s3259_s9 + $0x108] sm:$0xf] %vm2068_vm1, %v2626_v25  ;;  %v2627_v33 = vpack.c.bf16 %v1495_v27, %v1495_v27  ;;  %2069 = vst.msk [vmem:[%s3259_s9] sm:$0xf] %vm2068_vm1, %v2560_v28  ;;  %v2561_v34 = vpack.c.bf16 %v1429_v30, %v1429_v30  ;;  %v2767_v36 = vpop.f32.mrb[4].mxu0 }
  0xf3   : > { %2133 = vst.msk [vmem:[%s3259_s9 + $0x100] sm:$0xf] %vm2068_vm1, %v2624_v29  ;;  %v2625_v35 = vpack.c.bf16 %v1493_v31, %v1493_v31  ;;  %v2831_v37 = vpop.f32.mrb[4].mxu1  ;;  %2072 = vst.msk [vmem:[%s3259_s9 + $0xc] sm:$0xf] %vm2068_vm1, %v2563_v32  ;;  %v942_v38 = vadd.f32 %v2767_v36, %v3246_v3  ;;  %v933_v40 = vpop.f32.mrb[5].mxu0 }
  0xf4   : > { %2136 = vst.msk [vmem:[%s3259_s9 + $0x10c] sm:$0xf] %vm2068_vm1, %v2627_v33  ;;  %v1198_v39 = vadd.f32 %v2831_v37, %v3246_v3  ;;  %v1189_v41 = vpop.f32.mrb[5].mxu1  ;;  %2070 = vst.msk [vmem:[%s3259_s9 + $0x4] sm:$0xf] %vm2068_vm1, %v2561_v34  ;;  %v934_v42 = vadd.f32 %v3246_v3, %v933_v40  ;;  %v2768_v44 = vpop.f32.mrb[6].mxu0 }
  0xf5   : > { %2134 = vst.msk [vmem:[%s3259_s9 + $0x104] sm:$0xf] %vm2068_vm1, %v2625_v35  ;;  %v1190_v43 = vadd.f32 %v3246_v3, %v1189_v41  ;;  %v2832_v45 = vpop.f32.mrb[6].mxu1  ;;  %v1434_v46 = vmax.f32 %v942_v38, 0.0  ;;  %v945_v48 = vadd.f32 %v2768_v44, %v3246_v3  ;;  %v936_v50 = vpop.f32.mrb[7].mxu0 }
  0xf6   : > { %v1498_v47 = vmax.f32 %v1198_v39, 0.0  ;;  %v1201_v49 = vadd.f32 %v2832_v45, %v3246_v3  ;;  %v1192_v51 = vpop.f32.mrb[7].mxu1  ;;  %v1432_v52 = vmax.f32 %v934_v42, 0.0  ;;  %v937_v54 = vadd.f32 %v3246_v3, %v936_v50 }
  0xf7   : > { %v1496_v53 = vmax.f32 %v1190_v43, 0.0  ;;  %v1193_v55 = vadd.f32 %v3246_v3, %v1192_v51  ;;  %v2566_v56 = vpack.c.bf16 %v1434_v46, %v1434_v46  ;;  %v1435_v58 = vmax.f32 %v945_v48, 0.0 }
  0xf8   : > { %v2630_v57 = vpack.c.bf16 %v1498_v47, %v1498_v47  ;;  %v1499_v59 = vmax.f32 %v1201_v49, 0.0  ;;  %v2564_v60 = vpack.c.bf16 %v1432_v52, %v1432_v52  ;;  %v1433_v62 = vmax.f32 %v937_v54, 0.0 }
  0xf9   : > { %v2628_v61 = vpack.c.bf16 %v1496_v53, %v1496_v53  ;;  %v1497_v63 = vmax.f32 %v1193_v55, 0.0  ;;  %2075 = vst.msk [vmem:[%s3259_s9 + $0x18] sm:$0xf] %vm2068_vm1, %v2566_v56  ;;  %v2567_v0 = vpack.c.bf16 %v1435_v58, %v1435_v58 }
  0xfa   : > { %2139 = vst.msk [vmem:[%s3259_s9 + $0x118] sm:$0xf] %vm2068_vm1, %v2630_v57  ;;  %v2631_v1 = vpack.c.bf16 %v1499_v59, %v1499_v59  ;;  %2073 = vst.msk [vmem:[%s3259_s9 + $0x10] sm:$0xf] %vm2068_vm1, %v2564_v60  ;;  %v2565_v2 = vpack.c.bf16 %v1433_v62, %v1433_v62  ;;  %v2771_v5 = vpop.f32.mrb[8].mxu0 }
  0xfb   : > { %2137 = vst.msk [vmem:[%s3259_s9 + $0x110] sm:$0xf] %vm2068_vm1, %v2628_v61  ;;  %v2629_v4 = vpack.c.bf16 %v1497_v63, %v1497_v63  ;;  %v2835_v6 = vpop.f32.mrb[8].mxu1  ;;  %2076 = vst.msk [vmem:[%s3259_s9 + $0x1c] sm:$0xf] %vm2068_vm1, %v2567_v0  ;;  %v958_v7 = vadd.f32 %v2771_v5, %v3246_v3  ;;  %v949_v9 = vpop.f32.mrb[9].mxu0 }
  0xfc   : > { %2140 = vst.msk [vmem:[%s3259_s9 + $0x11c] sm:$0xf] %vm2068_vm1, %v2631_v1  ;;  %v1214_v8 = vadd.f32 %v2835_v6, %v3246_v3  ;;  %v1205_v10 = vpop.f32.mrb[9].mxu1  ;;  %2074 = vst.msk [vmem:[%s3259_s9 + $0x14] sm:$0xf] %vm2068_vm1, %v2565_v2  ;;  %v950_v11 = vadd.f32 %v3246_v3, %v949_v9  ;;  %v2772_v13 = vpop.f32.mrb[10].mxu0 }
  0xfd   : > { %2138 = vst.msk [vmem:[%s3259_s9 + $0x114] sm:$0xf] %vm2068_vm1, %v2629_v4  ;;  %v1206_v12 = vadd.f32 %v3246_v3, %v1205_v10  ;;  %v2836_v14 = vpop.f32.mrb[10].mxu1  ;;  %v1438_v15 = vmax.f32 %v958_v7, 0.0  ;;  %v961_v17 = vadd.f32 %v2772_v13, %v3246_v3  ;;  %v952_v19 = vpop.f32.mrb[11].mxu0 }
  0xfe   : > { %v1502_v16 = vmax.f32 %v1214_v8, 0.0  ;;  %v1217_v18 = vadd.f32 %v2836_v14, %v3246_v3  ;;  %v1208_v20 = vpop.f32.mrb[11].mxu1  ;;  %v1436_v21 = vmax.f32 %v950_v11, 0.0  ;;  %v953_v23 = vadd.f32 %v3246_v3, %v952_v19 }
  0xff   : > { %v1500_v22 = vmax.f32 %v1206_v12, 0.0  ;;  %v1209_v24 = vadd.f32 %v3246_v3, %v1208_v20  ;;  %v2570_v25 = vpack.c.bf16 %v1438_v15, %v1438_v15  ;;  %v1439_v27 = vmax.f32 %v961_v17, 0.0 }
 0x100   : > { %v2634_v26 = vpack.c.bf16 %v1502_v16, %v1502_v16  ;;  %v1503_v28 = vmax.f32 %v1217_v18, 0.0  ;;  %v2568_v29 = vpack.c.bf16 %v1436_v21, %v1436_v21  ;;  %v1437_v31 = vmax.f32 %v953_v23, 0.0 }
 0x101   : > { %v2632_v30 = vpack.c.bf16 %v1500_v22, %v1500_v22  ;;  %v1501_v32 = vmax.f32 %v1209_v24, 0.0  ;;  %2079 = vst.msk [vmem:[%s3259_s9 + $0x28] sm:$0xf] %vm2068_vm1, %v2570_v25  ;;  %v2571_v33 = vpack.c.bf16 %v1439_v27, %v1439_v27 }
 0x102   : > { %2143 = vst.msk [vmem:[%s3259_s9 + $0x128] sm:$0xf] %vm2068_vm1, %v2634_v26  ;;  %v2635_v34 = vpack.c.bf16 %v1503_v28, %v1503_v28  ;;  %2077 = vst.msk [vmem:[%s3259_s9 + $0x20] sm:$0xf] %vm2068_vm1, %v2568_v29  ;;  %v2569_v35 = vpack.c.bf16 %v1437_v31, %v1437_v31  ;;  %v2775_v37 = vpop.f32.mrb[12].mxu0 }
 0x103   : > { %2141 = vst.msk [vmem:[%s3259_s9 + $0x120] sm:$0xf] %vm2068_vm1, %v2632_v30  ;;  %v2633_v36 = vpack.c.bf16 %v1501_v32, %v1501_v32  ;;  %v2839_v38 = vpop.f32.mrb[12].mxu1  ;;  %2080 = vst.msk [vmem:[%s3259_s9 + $0x2c] sm:$0xf] %vm2068_vm1, %v2571_v33  ;;  %v974_v39 = vadd.f32 %v2775_v37, %v3246_v3  ;;  %v965_v41 = vpop.f32.mrb[13].mxu0 }
 0x104   : > { %2144 = vst.msk [vmem:[%s3259_s9 + $0x12c] sm:$0xf] %vm2068_vm1, %v2635_v34  ;;  %v1230_v40 = vadd.f32 %v2839_v38, %v3246_v3  ;;  %v1221_v42 = vpop.f32.mrb[13].mxu1  ;;  %2078 = vst.msk [vmem:[%s3259_s9 + $0x24] sm:$0xf] %vm2068_vm1, %v2569_v35  ;;  %v966_v43 = vadd.f32 %v3246_v3, %v965_v41  ;;  %v2776_v45 = vpop.f32.mrb[14].mxu0 }
 0x105   : > { %2142 = vst.msk [vmem:[%s3259_s9 + $0x124] sm:$0xf] %vm2068_vm1, %v2633_v36  ;;  %v1222_v44 = vadd.f32 %v3246_v3, %v1221_v42  ;;  %v2840_v46 = vpop.f32.mrb[14].mxu1  ;;  %v1442_v47 = vmax.f32 %v974_v39, 0.0  ;;  %v977_v49 = vadd.f32 %v2776_v45, %v3246_v3  ;;  %v968_v51 = vpop.f32.mrb[15].mxu0 }
 0x106   : > { %v1506_v48 = vmax.f32 %v1230_v40, 0.0  ;;  %v1233_v50 = vadd.f32 %v2840_v46, %v3246_v3  ;;  %v1224_v52 = vpop.f32.mrb[15].mxu1  ;;  %v1440_v53 = vmax.f32 %v966_v43, 0.0  ;;  %v969_v55 = vadd.f32 %v3246_v3, %v968_v51 }
 0x107   : > { %v1504_v54 = vmax.f32 %v1222_v44, 0.0  ;;  %v1225_v56 = vadd.f32 %v3246_v3, %v1224_v52  ;;  %v2574_v57 = vpack.c.bf16 %v1442_v47, %v1442_v47  ;;  %v1443_v59 = vmax.f32 %v977_v49, 0.0 }
 0x108   : > { %v2638_v58 = vpack.c.bf16 %v1506_v48, %v1506_v48  ;;  %v1507_v60 = vmax.f32 %v1233_v50, 0.0  ;;  %v2572_v61 = vpack.c.bf16 %v1440_v53, %v1440_v53  ;;  %v1441_v63 = vmax.f32 %v969_v55, 0.0 }
 0x109   : > { %v2636_v62 = vpack.c.bf16 %v1504_v54, %v1504_v54  ;;  %v1505_v0 = vmax.f32 %v1225_v56, 0.0  ;;  %2083 = vst.msk [vmem:[%s3259_s9 + $0x38] sm:$0xf] %vm2068_vm1, %v2574_v57  ;;  %v2575_v1 = vpack.c.bf16 %v1443_v59, %v1443_v59 }
 0x10a   : > { %2147 = vst.msk [vmem:[%s3259_s9 + $0x138] sm:$0xf] %vm2068_vm1, %v2638_v58  ;;  %v2639_v2 = vpack.c.bf16 %v1507_v60, %v1507_v60  ;;  %2081 = vst.msk [vmem:[%s3259_s9 + $0x30] sm:$0xf] %vm2068_vm1, %v2572_v61  ;;  %v2573_v4 = vpack.c.bf16 %v1441_v63, %v1441_v63  ;;  %v2779_v6 = vpop.f32.mrb[16].mxu0 }
 0x10b   : > { %2145 = vst.msk [vmem:[%s3259_s9 + $0x130] sm:$0xf] %vm2068_vm1, %v2636_v62  ;;  %v2637_v5 = vpack.c.bf16 %v1505_v0, %v1505_v0  ;;  %v2843_v7 = vpop.f32.mrb[16].mxu1  ;;  %2084 = vst.msk [vmem:[%s3259_s9 + $0x3c] sm:$0xf] %vm2068_vm1, %v2575_v1  ;;  %v990_v8 = vadd.f32 %v2779_v6, %v3246_v3  ;;  %v981_v10 = vpop.f32.mrb[17].mxu0 }
 0x10c   : > { %2148 = vst.msk [vmem:[%s3259_s9 + $0x13c] sm:$0xf] %vm2068_vm1, %v2639_v2  ;;  %v1246_v9 = vadd.f32 %v2843_v7, %v3246_v3  ;;  %v1237_v11 = vpop.f32.mrb[17].mxu1  ;;  %2082 = vst.msk [vmem:[%s3259_s9 + $0x34] sm:$0xf] %vm2068_vm1, %v2573_v4  ;;  %v982_v12 = vadd.f32 %v3246_v3, %v981_v10  ;;  %v2780_v14 = vpop.f32.mrb[18].mxu0 }
 0x10d   : > { %2146 = vst.msk [vmem:[%s3259_s9 + $0x134] sm:$0xf] %vm2068_vm1, %v2637_v5  ;;  %v1238_v13 = vadd.f32 %v3246_v3, %v1237_v11  ;;  %v2844_v15 = vpop.f32.mrb[18].mxu1  ;;  %v1446_v16 = vmax.f32 %v990_v8, 0.0  ;;  %v993_v18 = vadd.f32 %v2780_v14, %v3246_v3  ;;  %v984_v20 = vpop.f32.mrb[19].mxu0 }
 0x10e   : > { %v1510_v17 = vmax.f32 %v1246_v9, 0.0  ;;  %v1249_v19 = vadd.f32 %v2844_v15, %v3246_v3  ;;  %v1240_v21 = vpop.f32.mrb[19].mxu1  ;;  %v1444_v22 = vmax.f32 %v982_v12, 0.0  ;;  %v985_v24 = vadd.f32 %v3246_v3, %v984_v20 }
 0x10f   : > { %v1508_v23 = vmax.f32 %v1238_v13, 0.0  ;;  %v1241_v25 = vadd.f32 %v3246_v3, %v1240_v21  ;;  %v2578_v26 = vpack.c.bf16 %v1446_v16, %v1446_v16  ;;  %v1447_v28 = vmax.f32 %v993_v18, 0.0 }
 0x110   : > { %v2642_v27 = vpack.c.bf16 %v1510_v17, %v1510_v17  ;;  %v1511_v29 = vmax.f32 %v1249_v19, 0.0  ;;  %v2576_v30 = vpack.c.bf16 %v1444_v22, %v1444_v22  ;;  %v1445_v32 = vmax.f32 %v985_v24, 0.0 }
 0x111   : > { %v2640_v31 = vpack.c.bf16 %v1508_v23, %v1508_v23  ;;  %v1509_v33 = vmax.f32 %v1241_v25, 0.0  ;;  %2087 = vst.msk [vmem:[%s3259_s9 + $0x48] sm:$0xf] %vm2068_vm1, %v2578_v26  ;;  %v2579_v34 = vpack.c.bf16 %v1447_v28, %v1447_v28 }
 0x112   : > { %2151 = vst.msk [vmem:[%s3259_s9 + $0x148] sm:$0xf] %vm2068_vm1, %v2642_v27  ;;  %v2643_v35 = vpack.c.bf16 %v1511_v29, %v1511_v29  ;;  %2085 = vst.msk [vmem:[%s3259_s9 + $0x40] sm:$0xf] %vm2068_vm1, %v2576_v30  ;;  %v2577_v36 = vpack.c.bf16 %v1445_v32, %v1445_v32  ;;  %v2783_v38 = vpop.f32.mrb[20].mxu0 }
 0x113   : > { %2149 = vst.msk [vmem:[%s3259_s9 + $0x140] sm:$0xf] %vm2068_vm1, %v2640_v31  ;;  %v2641_v37 = vpack.c.bf16 %v1509_v33, %v1509_v33  ;;  %v2847_v39 = vpop.f32.mrb[20].mxu1  ;;  %2088 = vst.msk [vmem:[%s3259_s9 + $0x4c] sm:$0xf] %vm2068_vm1, %v2579_v34  ;;  %v1006_v40 = vadd.f32 %v2783_v38, %v3246_v3  ;;  %v997_v42 = vpop.f32.mrb[21].mxu0 }
 0x114   : > { %2152 = vst.msk [vmem:[%s3259_s9 + $0x14c] sm:$0xf] %vm2068_vm1, %v2643_v35  ;;  %v1262_v41 = vadd.f32 %v2847_v39, %v3246_v3  ;;  %v1253_v43 = vpop.f32.mrb[21].mxu1  ;;  %2086 = vst.msk [vmem:[%s3259_s9 + $0x44] sm:$0xf] %vm2068_vm1, %v2577_v36  ;;  %v998_v44 = vadd.f32 %v3246_v3, %v997_v42  ;;  %v2784_v46 = vpop.f32.mrb[22].mxu0 }
 0x115   : > { %2150 = vst.msk [vmem:[%s3259_s9 + $0x144] sm:$0xf] %vm2068_vm1, %v2641_v37  ;;  %v1254_v45 = vadd.f32 %v3246_v3, %v1253_v43  ;;  %v2848_v47 = vpop.f32.mrb[22].mxu1  ;;  %v1450_v48 = vmax.f32 %v1006_v40, 0.0  ;;  %v1009_v50 = vadd.f32 %v2784_v46, %v3246_v3  ;;  %v1000_v52 = vpop.f32.mrb[23].mxu0 }
 0x116   : > { %v1514_v49 = vmax.f32 %v1262_v41, 0.0  ;;  %v1265_v51 = vadd.f32 %v2848_v47, %v3246_v3  ;;  %v1256_v53 = vpop.f32.mrb[23].mxu1  ;;  %v1448_v54 = vmax.f32 %v998_v44, 0.0  ;;  %v1001_v56 = vadd.f32 %v3246_v3, %v1000_v52 }
 0x117   : > { %v1512_v55 = vmax.f32 %v1254_v45, 0.0  ;;  %v1257_v57 = vadd.f32 %v3246_v3, %v1256_v53  ;;  %v2582_v58 = vpack.c.bf16 %v1450_v48, %v1450_v48  ;;  %v1451_v60 = vmax.f32 %v1009_v50, 0.0 }
 0x118   : > { %v2646_v59 = vpack.c.bf16 %v1514_v49, %v1514_v49  ;;  %v1515_v61 = vmax.f32 %v1265_v51, 0.0  ;;  %v2580_v62 = vpack.c.bf16 %v1448_v54, %v1448_v54  ;;  %v1449_v0 = vmax.f32 %v1001_v56, 0.0 }
 0x119   : > { %v2644_v63 = vpack.c.bf16 %v1512_v55, %v1512_v55  ;;  %v1513_v1 = vmax.f32 %v1257_v57, 0.0  ;;  %2091 = vst.msk [vmem:[%s3259_s9 + $0x58] sm:$0xf] %vm2068_vm1, %v2582_v58  ;;  %v2583_v2 = vpack.c.bf16 %v1451_v60, %v1451_v60 }
 0x11a   : > { %2155 = vst.msk [vmem:[%s3259_s9 + $0x158] sm:$0xf] %vm2068_vm1, %v2646_v59  ;;  %v2647_v4 = vpack.c.bf16 %v1515_v61, %v1515_v61  ;;  %2089 = vst.msk [vmem:[%s3259_s9 + $0x50] sm:$0xf] %vm2068_vm1, %v2580_v62  ;;  %v2581_v5 = vpack.c.bf16 %v1449_v0, %v1449_v0  ;;  %v2787_v7 = vpop.f32.mrb[24].mxu0 }
 0x11b   : > { %2153 = vst.msk [vmem:[%s3259_s9 + $0x150] sm:$0xf] %vm2068_vm1, %v2644_v63  ;;  %v2645_v6 = vpack.c.bf16 %v1513_v1, %v1513_v1  ;;  %v2851_v8 = vpop.f32.mrb[24].mxu1  ;;  %2092 = vst.msk [vmem:[%s3259_s9 + $0x5c] sm:$0xf] %vm2068_vm1, %v2583_v2  ;;  %v1022_v9 = vadd.f32 %v2787_v7, %v3246_v3  ;;  %v1013_v11 = vpop.f32.mrb[25].mxu0 }
 0x11c   : > { %2156 = vst.msk [vmem:[%s3259_s9 + $0x15c] sm:$0xf] %vm2068_vm1, %v2647_v4  ;;  %v1278_v10 = vadd.f32 %v2851_v8, %v3246_v3  ;;  %v1269_v12 = vpop.f32.mrb[25].mxu1  ;;  %2090 = vst.msk [vmem:[%s3259_s9 + $0x54] sm:$0xf] %vm2068_vm1, %v2581_v5  ;;  %v1014_v13 = vadd.f32 %v3246_v3, %v1013_v11  ;;  %v2788_v15 = vpop.f32.mrb[26].mxu0 }
 0x11d   : > { %2154 = vst.msk [vmem:[%s3259_s9 + $0x154] sm:$0xf] %vm2068_vm1, %v2645_v6  ;;  %v1270_v14 = vadd.f32 %v3246_v3, %v1269_v12  ;;  %v2852_v16 = vpop.f32.mrb[26].mxu1  ;;  %v1454_v17 = vmax.f32 %v1022_v9, 0.0  ;;  %v1025_v19 = vadd.f32 %v2788_v15, %v3246_v3  ;;  %v1016_v21 = vpop.f32.mrb[27].mxu0 }
 0x11e   : > { %v1518_v18 = vmax.f32 %v1278_v10, 0.0  ;;  %v1281_v20 = vadd.f32 %v2852_v16, %v3246_v3  ;;  %v1272_v22 = vpop.f32.mrb[27].mxu1  ;;  %v1452_v23 = vmax.f32 %v1014_v13, 0.0  ;;  %v1017_v25 = vadd.f32 %v3246_v3, %v1016_v21 }
 0x11f   : > { %v1516_v24 = vmax.f32 %v1270_v14, 0.0  ;;  %v1273_v26 = vadd.f32 %v3246_v3, %v1272_v22  ;;  %v2586_v27 = vpack.c.bf16 %v1454_v17, %v1454_v17  ;;  %v1455_v29 = vmax.f32 %v1025_v19, 0.0 }
 0x120   : > { %v2650_v28 = vpack.c.bf16 %v1518_v18, %v1518_v18  ;;  %v1519_v30 = vmax.f32 %v1281_v20, 0.0  ;;  %v2584_v31 = vpack.c.bf16 %v1452_v23, %v1452_v23  ;;  %v1453_v33 = vmax.f32 %v1017_v25, 0.0 }
 0x121   : > { %v2648_v32 = vpack.c.bf16 %v1516_v24, %v1516_v24  ;;  %v1517_v34 = vmax.f32 %v1273_v26, 0.0  ;;  %2095 = vst.msk [vmem:[%s3259_s9 + $0x68] sm:$0xf] %vm2068_vm1, %v2586_v27  ;;  %v2587_v35 = vpack.c.bf16 %v1455_v29, %v1455_v29 }
 0x122   : > { %2159 = vst.msk [vmem:[%s3259_s9 + $0x168] sm:$0xf] %vm2068_vm1, %v2650_v28  ;;  %v2651_v36 = vpack.c.bf16 %v1519_v30, %v1519_v30  ;;  %2093 = vst.msk [vmem:[%s3259_s9 + $0x60] sm:$0xf] %vm2068_vm1, %v2584_v31  ;;  %v2585_v37 = vpack.c.bf16 %v1453_v33, %v1453_v33  ;;  %v2791_v39 = vpop.f32.mrb[28].mxu0 }
 0x123   : > { %2157 = vst.msk [vmem:[%s3259_s9 + $0x160] sm:$0xf] %vm2068_vm1, %v2648_v32  ;;  %v2649_v38 = vpack.c.bf16 %v1517_v34, %v1517_v34  ;;  %v2855_v40 = vpop.f32.mrb[28].mxu1  ;;  %2096 = vst.msk [vmem:[%s3259_s9 + $0x6c] sm:$0xf] %vm2068_vm1, %v2587_v35  ;;  %v1038_v41 = vadd.f32 %v2791_v39, %v3246_v3  ;;  %v1029_v43 = vpop.f32.mrb[29].mxu0 }
 0x124   : > { %2160 = vst.msk [vmem:[%s3259_s9 + $0x16c] sm:$0xf] %vm2068_vm1, %v2651_v36  ;;  %v1294_v42 = vadd.f32 %v2855_v40, %v3246_v3  ;;  %v1285_v44 = vpop.f32.mrb[29].mxu1  ;;  %2094 = vst.msk [vmem:[%s3259_s9 + $0x64] sm:$0xf] %vm2068_vm1, %v2585_v37  ;;  %v1030_v45 = vadd.f32 %v3246_v3, %v1029_v43  ;;  %v2792_v47 = vpop.f32.mrb[30].mxu0 }
 0x125   : > { %2158 = vst.msk [vmem:[%s3259_s9 + $0x164] sm:$0xf] %vm2068_vm1, %v2649_v38  ;;  %v1286_v46 = vadd.f32 %v3246_v3, %v1285_v44  ;;  %v2856_v48 = vpop.f32.mrb[30].mxu1  ;;  %v1458_v49 = vmax.f32 %v1038_v41, 0.0  ;;  %v1041_v51 = vadd.f32 %v2792_v47, %v3246_v3  ;;  %v1032_v53 = vpop.f32.mrb[31].mxu0 }
 0x126   : > { %v1522_v50 = vmax.f32 %v1294_v42, 0.0  ;;  %v1297_v52 = vadd.f32 %v2856_v48, %v3246_v3  ;;  %v1288_v54 = vpop.f32.mrb[31].mxu1  ;;  %v1456_v55 = vmax.f32 %v1030_v45, 0.0  ;;  %v1033_v57 = vadd.f32 %v3246_v3, %v1032_v53 }
 0x127   : > { %v1520_v56 = vmax.f32 %v1286_v46, 0.0  ;;  %v1289_v58 = vadd.f32 %v3246_v3, %v1288_v54  ;;  %v2590_v59 = vpack.c.bf16 %v1458_v49, %v1458_v49  ;;  %v1459_v61 = vmax.f32 %v1041_v51, 0.0 }
 0x128   : > { %v2654_v60 = vpack.c.bf16 %v1522_v50, %v1522_v50  ;;  %v1523_v62 = vmax.f32 %v1297_v52, 0.0  ;;  %v2588_v63 = vpack.c.bf16 %v1456_v55, %v1456_v55  ;;  %v1457_v1 = vmax.f32 %v1033_v57, 0.0 }
 0x129   : > { %v2652_v0 = vpack.c.bf16 %v1520_v56, %v1520_v56  ;;  %v1521_v2 = vmax.f32 %v1289_v58, 0.0  ;;  %2099 = vst.msk [vmem:[%s3259_s9 + $0x78] sm:$0xf] %vm2068_vm1, %v2590_v59  ;;  %v2591_v4 = vpack.c.bf16 %v1459_v61, %v1459_v61 }
 0x12a   : > { %2163 = vst.msk [vmem:[%s3259_s9 + $0x178] sm:$0xf] %vm2068_vm1, %v2654_v60  ;;  %v2655_v5 = vpack.c.bf16 %v1523_v62, %v1523_v62  ;;  %2097 = vst.msk [vmem:[%s3259_s9 + $0x70] sm:$0xf] %vm2068_vm1, %v2588_v63  ;;  %v2589_v6 = vpack.c.bf16 %v1457_v1, %v1457_v1  ;;  %v2795_v8 = vpop.f32.mrb[32].mxu0 }
 0x12b   : > { %2161 = vst.msk [vmem:[%s3259_s9 + $0x170] sm:$0xf] %vm2068_vm1, %v2652_v0  ;;  %v2653_v7 = vpack.c.bf16 %v1521_v2, %v1521_v2  ;;  %v2859_v9 = vpop.f32.mrb[32].mxu1  ;;  %2100 = vst.msk [vmem:[%s3259_s9 + $0x7c] sm:$0xf] %vm2068_vm1, %v2591_v4  ;;  %v1054_v10 = vadd.f32 %v2795_v8, %v3246_v3  ;;  %v1045_v12 = vpop.f32.mrb[33].mxu0 }
 0x12c   : > { %2164 = vst.msk [vmem:[%s3259_s9 + $0x17c] sm:$0xf] %vm2068_vm1, %v2655_v5  ;;  %v1310_v11 = vadd.f32 %v2859_v9, %v3246_v3  ;;  %v1301_v13 = vpop.f32.mrb[33].mxu1  ;;  %2098 = vst.msk [vmem:[%s3259_s9 + $0x74] sm:$0xf] %vm2068_vm1, %v2589_v6  ;;  %v1046_v14 = vadd.f32 %v3246_v3, %v1045_v12  ;;  %v2796_v16 = vpop.f32.mrb[34].mxu0 }
 0x12d   : > { %2162 = vst.msk [vmem:[%s3259_s9 + $0x174] sm:$0xf] %vm2068_vm1, %v2653_v7  ;;  %v1302_v15 = vadd.f32 %v3246_v3, %v1301_v13  ;;  %v2860_v17 = vpop.f32.mrb[34].mxu1  ;;  %v1462_v18 = vmax.f32 %v1054_v10, 0.0  ;;  %v1057_v20 = vadd.f32 %v2796_v16, %v3246_v3  ;;  %v1048_v22 = vpop.f32.mrb[35].mxu0 }
 0x12e   : > { %v1526_v19 = vmax.f32 %v1310_v11, 0.0  ;;  %v1313_v21 = vadd.f32 %v2860_v17, %v3246_v3  ;;  %v1304_v23 = vpop.f32.mrb[35].mxu1  ;;  %v1460_v24 = vmax.f32 %v1046_v14, 0.0  ;;  %v1049_v26 = vadd.f32 %v3246_v3, %v1048_v22 }
 0x12f   : > { %v1524_v25 = vmax.f32 %v1302_v15, 0.0  ;;  %v1305_v27 = vadd.f32 %v3246_v3, %v1304_v23  ;;  %v2594_v28 = vpack.c.bf16 %v1462_v18, %v1462_v18  ;;  %v1463_v30 = vmax.f32 %v1057_v20, 0.0 }
 0x130   : > { %v2658_v29 = vpack.c.bf16 %v1526_v19, %v1526_v19  ;;  %v1527_v31 = vmax.f32 %v1313_v21, 0.0  ;;  %v2592_v32 = vpack.c.bf16 %v1460_v24, %v1460_v24  ;;  %v1461_v34 = vmax.f32 %v1049_v26, 0.0 }
 0x131   : > { %v2656_v33 = vpack.c.bf16 %v1524_v25, %v1524_v25  ;;  %v1525_v35 = vmax.f32 %v1305_v27, 0.0  ;;  %2103 = vst.msk [vmem:[%s3259_s9 + $0x88] sm:$0xf] %vm2068_vm1, %v2594_v28  ;;  %v2595_v36 = vpack.c.bf16 %v1463_v30, %v1463_v30 }
 0x132   : > { %2167 = vst.msk [vmem:[%s3259_s9 + $0x188] sm:$0xf] %vm2068_vm1, %v2658_v29  ;;  %v2659_v37 = vpack.c.bf16 %v1527_v31, %v1527_v31  ;;  %2101 = vst.msk [vmem:[%s3259_s9 + $0x80] sm:$0xf] %vm2068_vm1, %v2592_v32  ;;  %v2593_v38 = vpack.c.bf16 %v1461_v34, %v1461_v34  ;;  %v2799_v40 = vpop.f32.mrb[36].mxu0 }
 0x133   : > { %2165 = vst.msk [vmem:[%s3259_s9 + $0x180] sm:$0xf] %vm2068_vm1, %v2656_v33  ;;  %v2657_v39 = vpack.c.bf16 %v1525_v35, %v1525_v35  ;;  %v2863_v41 = vpop.f32.mrb[36].mxu1  ;;  %2104 = vst.msk [vmem:[%s3259_s9 + $0x8c] sm:$0xf] %vm2068_vm1, %v2595_v36  ;;  %v1070_v42 = vadd.f32 %v2799_v40, %v3246_v3  ;;  %v1061_v44 = vpop.f32.mrb[37].mxu0 }
 0x134   : > { %2168 = vst.msk [vmem:[%s3259_s9 + $0x18c] sm:$0xf] %vm2068_vm1, %v2659_v37  ;;  %v1326_v43 = vadd.f32 %v2863_v41, %v3246_v3  ;;  %v1317_v45 = vpop.f32.mrb[37].mxu1  ;;  %2102 = vst.msk [vmem:[%s3259_s9 + $0x84] sm:$0xf] %vm2068_vm1, %v2593_v38  ;;  %v1062_v46 = vadd.f32 %v3246_v3, %v1061_v44  ;;  %v2800_v48 = vpop.f32.mrb[38].mxu0 }
 0x135   : > { %2166 = vst.msk [vmem:[%s3259_s9 + $0x184] sm:$0xf] %vm2068_vm1, %v2657_v39  ;;  %v1318_v47 = vadd.f32 %v3246_v3, %v1317_v45  ;;  %v2864_v49 = vpop.f32.mrb[38].mxu1  ;;  %v1466_v50 = vmax.f32 %v1070_v42, 0.0  ;;  %v1073_v52 = vadd.f32 %v2800_v48, %v3246_v3  ;;  %v1064_v54 = vpop.f32.mrb[39].mxu0 }
 0x136   : > { %v1530_v51 = vmax.f32 %v1326_v43, 0.0  ;;  %v1329_v53 = vadd.f32 %v2864_v49, %v3246_v3  ;;  %v1320_v55 = vpop.f32.mrb[39].mxu1  ;;  %v1464_v56 = vmax.f32 %v1062_v46, 0.0  ;;  %v1065_v58 = vadd.f32 %v3246_v3, %v1064_v54 }
 0x137   : > { %v1528_v57 = vmax.f32 %v1318_v47, 0.0  ;;  %v1321_v59 = vadd.f32 %v3246_v3, %v1320_v55  ;;  %v2598_v60 = vpack.c.bf16 %v1466_v50, %v1466_v50  ;;  %v1467_v62 = vmax.f32 %v1073_v52, 0.0 }
 0x138   : > { %v2662_v61 = vpack.c.bf16 %v1530_v51, %v1530_v51  ;;  %v1531_v63 = vmax.f32 %v1329_v53, 0.0  ;;  %v2596_v0 = vpack.c.bf16 %v1464_v56, %v1464_v56  ;;  %v1465_v2 = vmax.f32 %v1065_v58, 0.0 }
 0x139   : > { %v2660_v1 = vpack.c.bf16 %v1528_v57, %v1528_v57  ;;  %v1529_v4 = vmax.f32 %v1321_v59, 0.0  ;;  %2107 = vst.msk [vmem:[%s3259_s9 + $0x98] sm:$0xf] %vm2068_vm1, %v2598_v60  ;;  %v2599_v5 = vpack.c.bf16 %v1467_v62, %v1467_v62 }
 0x13a   : > { %2171 = vst.msk [vmem:[%s3259_s9 + $0x198] sm:$0xf] %vm2068_vm1, %v2662_v61  ;;  %v2663_v6 = vpack.c.bf16 %v1531_v63, %v1531_v63  ;;  %2105 = vst.msk [vmem:[%s3259_s9 + $0x90] sm:$0xf] %vm2068_vm1, %v2596_v0  ;;  %v2597_v7 = vpack.c.bf16 %v1465_v2, %v1465_v2  ;;  %v2803_v9 = vpop.f32.mrb[40].mxu0 }
 0x13b   : > { %2169 = vst.msk [vmem:[%s3259_s9 + $0x190] sm:$0xf] %vm2068_vm1, %v2660_v1  ;;  %v2661_v8 = vpack.c.bf16 %v1529_v4, %v1529_v4  ;;  %v2867_v10 = vpop.f32.mrb[40].mxu1  ;;  %2108 = vst.msk [vmem:[%s3259_s9 + $0x9c] sm:$0xf] %vm2068_vm1, %v2599_v5  ;;  %v1086_v11 = vadd.f32 %v2803_v9, %v3246_v3  ;;  %v1077_v13 = vpop.f32.mrb[41].mxu0 }
 0x13c   : > { %2172 = vst.msk [vmem:[%s3259_s9 + $0x19c] sm:$0xf] %vm2068_vm1, %v2663_v6  ;;  %v1342_v12 = vadd.f32 %v2867_v10, %v3246_v3  ;;  %v1333_v14 = vpop.f32.mrb[41].mxu1  ;;  %2106 = vst.msk [vmem:[%s3259_s9 + $0x94] sm:$0xf] %vm2068_vm1, %v2597_v7  ;;  %v1078_v15 = vadd.f32 %v3246_v3, %v1077_v13  ;;  %v2804_v17 = vpop.f32.mrb[42].mxu0 }
 0x13d   : > { %2170 = vst.msk [vmem:[%s3259_s9 + $0x194] sm:$0xf] %vm2068_vm1, %v2661_v8  ;;  %v1334_v16 = vadd.f32 %v3246_v3, %v1333_v14  ;;  %v2868_v18 = vpop.f32.mrb[42].mxu1  ;;  %v1470_v19 = vmax.f32 %v1086_v11, 0.0  ;;  %v1089_v21 = vadd.f32 %v2804_v17, %v3246_v3  ;;  %v1080_v23 = vpop.f32.mrb[43].mxu0 }
 0x13e   : > { %v1534_v20 = vmax.f32 %v1342_v12, 0.0  ;;  %v1345_v22 = vadd.f32 %v2868_v18, %v3246_v3  ;;  %v1336_v24 = vpop.f32.mrb[43].mxu1  ;;  %v1468_v25 = vmax.f32 %v1078_v15, 0.0  ;;  %v1081_v27 = vadd.f32 %v3246_v3, %v1080_v23 }
 0x13f   : > { %v1532_v26 = vmax.f32 %v1334_v16, 0.0  ;;  %v1337_v28 = vadd.f32 %v3246_v3, %v1336_v24  ;;  %v2602_v29 = vpack.c.bf16 %v1470_v19, %v1470_v19  ;;  %v1471_v31 = vmax.f32 %v1089_v21, 0.0 }
 0x140   : > { %v2666_v30 = vpack.c.bf16 %v1534_v20, %v1534_v20  ;;  %v1535_v32 = vmax.f32 %v1345_v22, 0.0  ;;  %v2600_v33 = vpack.c.bf16 %v1468_v25, %v1468_v25  ;;  %v1469_v35 = vmax.f32 %v1081_v27, 0.0 }
 0x141   : > { %v2664_v34 = vpack.c.bf16 %v1532_v26, %v1532_v26  ;;  %v1533_v36 = vmax.f32 %v1337_v28, 0.0  ;;  %2111 = vst.msk [vmem:[%s3259_s9 + $0xa8] sm:$0xf] %vm2068_vm1, %v2602_v29  ;;  %v2603_v37 = vpack.c.bf16 %v1471_v31, %v1471_v31 }
 0x142   : > { %2175 = vst.msk [vmem:[%s3259_s9 + $0x1a8] sm:$0xf] %vm2068_vm1, %v2666_v30  ;;  %v2667_v38 = vpack.c.bf16 %v1535_v32, %v1535_v32  ;;  %2109 = vst.msk [vmem:[%s3259_s9 + $0xa0] sm:$0xf] %vm2068_vm1, %v2600_v33  ;;  %v2601_v39 = vpack.c.bf16 %v1469_v35, %v1469_v35  ;;  %v2807_v41 = vpop.f32.mrb[44].mxu0 }
 0x143   : > { %2173 = vst.msk [vmem:[%s3259_s9 + $0x1a0] sm:$0xf] %vm2068_vm1, %v2664_v34  ;;  %v2665_v40 = vpack.c.bf16 %v1533_v36, %v1533_v36  ;;  %v2871_v42 = vpop.f32.mrb[44].mxu1  ;;  %2112 = vst.msk [vmem:[%s3259_s9 + $0xac] sm:$0xf] %vm2068_vm1, %v2603_v37  ;;  %v1102_v43 = vadd.f32 %v2807_v41, %v3246_v3  ;;  %v1093_v45 = vpop.f32.mrb[45].mxu0 }
 0x144   : > { %2176 = vst.msk [vmem:[%s3259_s9 + $0x1ac] sm:$0xf] %vm2068_vm1, %v2667_v38  ;;  %v1358_v44 = vadd.f32 %v2871_v42, %v3246_v3  ;;  %v1349_v46 = vpop.f32.mrb[45].mxu1  ;;  %2110 = vst.msk [vmem:[%s3259_s9 + $0xa4] sm:$0xf] %vm2068_vm1, %v2601_v39  ;;  %v1094_v47 = vadd.f32 %v3246_v3, %v1093_v45  ;;  %v2808_v49 = vpop.f32.mrb[46].mxu0 }
 0x145   : > { %2174 = vst.msk [vmem:[%s3259_s9 + $0x1a4] sm:$0xf] %vm2068_vm1, %v2665_v40  ;;  %v1350_v48 = vadd.f32 %v3246_v3, %v1349_v46  ;;  %v2872_v50 = vpop.f32.mrb[46].mxu1  ;;  %v1474_v51 = vmax.f32 %v1102_v43, 0.0  ;;  %v1105_v53 = vadd.f32 %v2808_v49, %v3246_v3  ;;  %v1096_v55 = vpop.f32.mrb[47].mxu0 }
 0x146   : > { %v1538_v52 = vmax.f32 %v1358_v44, 0.0  ;;  %v1361_v54 = vadd.f32 %v2872_v50, %v3246_v3  ;;  %v1352_v56 = vpop.f32.mrb[47].mxu1  ;;  %v1472_v57 = vmax.f32 %v1094_v47, 0.0  ;;  %v1097_v59 = vadd.f32 %v3246_v3, %v1096_v55  ;;  %v3566_v43 = vld [vmem:[%s3661_s2] ss:$0 sm:$0xff] }
 0x147   : > { %v1536_v58 = vmax.f32 %v1350_v48, 0.0  ;;  %v1353_v60 = vadd.f32 %v3246_v3, %v1352_v56  ;;  %v2606_v61 = vpack.c.bf16 %v1474_v51, %v1474_v51  ;;  %v1475_v63 = vmax.f32 %v1105_v53, 0.0 }
 0x148   : > { %v2670_v62 = vpack.c.bf16 %v1538_v52, %v1538_v52  ;;  %v1539_v0 = vmax.f32 %v1361_v54, 0.0  ;;  %v2604_v1 = vpack.c.bf16 %v1472_v57, %v1472_v57  ;;  %v1473_v4 = vmax.f32 %v1097_v59, 0.0 }
 0x149   : > { %v2668_v2 = vpack.c.bf16 %v1536_v58, %v1536_v58  ;;  %v1537_v5 = vmax.f32 %v1353_v60, 0.0  ;;  %2115 = vst.msk [vmem:[%s3259_s9 + $0xb8] sm:$0xf] %vm2068_vm1, %v2606_v61  ;;  %v2607_v6 = vpack.c.bf16 %v1475_v63, %v1475_v63 }
 0x14a   : > { %2179 = vst.msk [vmem:[%s3259_s9 + $0x1b8] sm:$0xf] %vm2068_vm1, %v2670_v62  ;;  %v2671_v7 = vpack.c.bf16 %v1539_v0, %v1539_v0  ;;  %2113 = vst.msk [vmem:[%s3259_s9 + $0xb0] sm:$0xf] %vm2068_vm1, %v2604_v1  ;;  %v2605_v8 = vpack.c.bf16 %v1473_v4, %v1473_v4  ;;  %v2811_v10 = vpop.f32.mrb[48].mxu0 }
 0x14b   : > { %2177 = vst.msk [vmem:[%s3259_s9 + $0x1b0] sm:$0xf] %vm2068_vm1, %v2668_v2  ;;  %v2669_v9 = vpack.c.bf16 %v1537_v5, %v1537_v5  ;;  %v2875_v11 = vpop.f32.mrb[48].mxu1  ;;  %2116 = vst.msk [vmem:[%s3259_s9 + $0xbc] sm:$0xf] %vm2068_vm1, %v2607_v6  ;;  %v1118_v12 = vadd.f32 %v2811_v10, %v3246_v3  ;;  %v1109_v14 = vpop.f32.mrb[49].mxu0 }
 0x14c   : > { %2180 = vst.msk [vmem:[%s3259_s9 + $0x1bc] sm:$0xf] %vm2068_vm1, %v2671_v7  ;;  %v1374_v13 = vadd.f32 %v2875_v11, %v3246_v3  ;;  %v1365_v15 = vpop.f32.mrb[49].mxu1  ;;  %2114 = vst.msk [vmem:[%s3259_s9 + $0xb4] sm:$0xf] %vm2068_vm1, %v2605_v8  ;;  %v1110_v16 = vadd.f32 %v3246_v3, %v1109_v14  ;;  %v2812_v18 = vpop.f32.mrb[50].mxu0 }
 0x14d   : > { %2178 = vst.msk [vmem:[%s3259_s9 + $0x1b4] sm:$0xf] %vm2068_vm1, %v2669_v9  ;;  %v1366_v17 = vadd.f32 %v3246_v3, %v1365_v15  ;;  %v2876_v19 = vpop.f32.mrb[50].mxu1  ;;  %v1478_v20 = vmax.f32 %v1118_v12, 0.0  ;;  %v1121_v22 = vadd.f32 %v2812_v18, %v3246_v3  ;;  %v1112_v24 = vpop.f32.mrb[51].mxu0 }
 0x14e   : > { %v1542_v21 = vmax.f32 %v1374_v13, 0.0  ;;  %v1377_v23 = vadd.f32 %v2876_v19, %v3246_v3  ;;  %v1368_v25 = vpop.f32.mrb[51].mxu1  ;;  %v1476_v26 = vmax.f32 %v1110_v16, 0.0  ;;  %v1113_v28 = vadd.f32 %v3246_v3, %v1112_v24 }
 0x14f   : > { %v1540_v27 = vmax.f32 %v1366_v17, 0.0  ;;  %v1369_v29 = vadd.f32 %v3246_v3, %v1368_v25  ;;  %v2610_v30 = vpack.c.bf16 %v1478_v20, %v1478_v20  ;;  %v1479_v32 = vmax.f32 %v1121_v22, 0.0 }
 0x150   : > { %v2674_v31 = vpack.c.bf16 %v1542_v21, %v1542_v21  ;;  %v1543_v33 = vmax.f32 %v1377_v23, 0.0  ;;  %v2608_v34 = vpack.c.bf16 %v1476_v26, %v1476_v26  ;;  %v1477_v36 = vmax.f32 %v1113_v28, 0.0 }
 0x151   : > { %v2672_v35 = vpack.c.bf16 %v1540_v27, %v1540_v27  ;;  %v1541_v37 = vmax.f32 %v1369_v29, 0.0  ;;  %2119 = vst.msk [vmem:[%s3259_s9 + $0xc8] sm:$0xf] %vm2068_vm1, %v2610_v30  ;;  %v2611_v38 = vpack.c.bf16 %v1479_v32, %v1479_v32 }
 0x152   : > { %2183 = vst.msk [vmem:[%s3259_s9 + $0x1c8] sm:$0xf] %vm2068_vm1, %v2674_v31  ;;  %v2675_v39 = vpack.c.bf16 %v1543_v33, %v1543_v33  ;;  %2117 = vst.msk [vmem:[%s3259_s9 + $0xc0] sm:$0xf] %vm2068_vm1, %v2608_v34  ;;  %v2609_v3 = vpack.c.bf16 %v1477_v36, %v1477_v36  ;;  %v2815_v41 = vpop.f32.mrb[52].mxu0 }
 0x153   : > { %2181 = vst.msk [vmem:[%s3259_s9 + $0x1c0] sm:$0xf] %vm2068_vm1, %v2672_v35  ;;  %v2673_v40 = vpack.c.bf16 %v1541_v37, %v1541_v37  ;;  %v2879_v42 = vpop.f32.mrb[52].mxu1  ;;  %2120 = vst.msk [vmem:[%s3259_s9 + $0xcc] sm:$0xf] %vm2068_vm1, %v2611_v38  ;;  %v1134_v44 = vadd.f32 %v3566_v43, %v2815_v41  ;;  %v1125_v46 = vpop.f32.mrb[53].mxu0 }
 0x154   : > { %2184 = vst.msk [vmem:[%s3259_s9 + $0x1cc] sm:$0xf] %vm2068_vm1, %v2675_v39  ;;  %v1390_v45 = vadd.f32 %v3566_v43, %v2879_v42  ;;  %v1381_v47 = vpop.f32.mrb[53].mxu1  ;;  %2118 = vst.msk [vmem:[%s3259_s9 + $0xc4] sm:$0xf] %vm2068_vm1, %v2609_v3  ;;  %v1126_v48 = vadd.f32 %v3566_v43, %v1125_v46  ;;  %v2816_v50 = vpop.f32.mrb[54].mxu0 }
 0x155   : > { %2182 = vst.msk [vmem:[%s3259_s9 + $0x1c4] sm:$0xf] %vm2068_vm1, %v2673_v40  ;;  %v1382_v49 = vadd.f32 %v3566_v43, %v1381_v47  ;;  %v2880_v51 = vpop.f32.mrb[54].mxu1  ;;  %v1482_v52 = vmax.f32 %v1134_v44, 0.0  ;;  %v1137_v54 = vadd.f32 %v3566_v43, %v2816_v50  ;;  %v1128_v56 = vpop.f32.mrb[55].mxu0 }
 0x156   : > { %v1546_v53 = vmax.f32 %v1390_v45, 0.0  ;;  %v1393_v55 = vadd.f32 %v3566_v43, %v2880_v51  ;;  %v1384_v57 = vpop.f32.mrb[55].mxu1  ;;  %v1480_v58 = vmax.f32 %v1126_v48, 0.0  ;;  %v1129_v60 = vadd.f32 %v3566_v43, %v1128_v56 }
 0x157   : > { %v1544_v59 = vmax.f32 %v1382_v49, 0.0  ;;  %v1385_v61 = vadd.f32 %v3566_v43, %v1384_v57  ;;  %v2614_v62 = vpack.c.bf16 %v1482_v52, %v1482_v52  ;;  %v1483_v0 = vmax.f32 %v1137_v54, 0.0 }
 0x158   : > { %v2678_v63 = vpack.c.bf16 %v1546_v53, %v1546_v53  ;;  %v1547_v1 = vmax.f32 %v1393_v55, 0.0  ;;  %v2612_v2 = vpack.c.bf16 %v1480_v58, %v1480_v58  ;;  %v1481_v5 = vmax.f32 %v1129_v60, 0.0 }
 0x159   : > { %v2676_v4 = vpack.c.bf16 %v1544_v59, %v1544_v59  ;;  %v1545_v6 = vmax.f32 %v1385_v61, 0.0  ;;  %2123 = vst.msk [vmem:[%s3259_s9 + $0xd8] sm:$0xf] %vm2068_vm1, %v2614_v62  ;;  %v2615_v7 = vpack.c.bf16 %v1483_v0, %v1483_v0 }
 0x15a   : > { %2187 = vst.msk [vmem:[%s3259_s9 + $0x1d8] sm:$0xf] %vm2068_vm1, %v2678_v63  ;;  %v2679_v8 = vpack.c.bf16 %v1547_v1, %v1547_v1  ;;  %2121 = vst.msk [vmem:[%s3259_s9 + $0xd0] sm:$0xf] %vm2068_vm1, %v2612_v2  ;;  %v2613_v9 = vpack.c.bf16 %v1481_v5, %v1481_v5  ;;  %v2819_v11 = vpop.f32.mrb[56].mxu0 }
 0x15b   : > { %2185 = vst.msk [vmem:[%s3259_s9 + $0x1d0] sm:$0xf] %vm2068_vm1, %v2676_v4  ;;  %v2677_v10 = vpack.c.bf16 %v1545_v6, %v1545_v6  ;;  %v2883_v12 = vpop.f32.mrb[56].mxu1  ;;  %2124 = vst.msk [vmem:[%s3259_s9 + $0xdc] sm:$0xf] %vm2068_vm1, %v2615_v7  ;;  %v1150_v13 = vadd.f32 %v3566_v43, %v2819_v11  ;;  %v1141_v15 = vpop.f32.mrb[57].mxu0 }
 0x15c   : > { %2188 = vst.msk [vmem:[%s3259_s9 + $0x1dc] sm:$0xf] %vm2068_vm1, %v2679_v8  ;;  %v1406_v14 = vadd.f32 %v3566_v43, %v2883_v12  ;;  %v1397_v16 = vpop.f32.mrb[57].mxu1  ;;  %2122 = vst.msk [vmem:[%s3259_s9 + $0xd4] sm:$0xf] %vm2068_vm1, %v2613_v9  ;;  %v1142_v17 = vadd.f32 %v3566_v43, %v1141_v15  ;;  %v2820_v19 = vpop.f32.mrb[58].mxu0 }
 0x15d   : > { %2186 = vst.msk [vmem:[%s3259_s9 + $0x1d4] sm:$0xf] %vm2068_vm1, %v2677_v10  ;;  %v1398_v18 = vadd.f32 %v3566_v43, %v1397_v16  ;;  %v2884_v20 = vpop.f32.mrb[58].mxu1  ;;  %v1486_v21 = vmax.f32 %v1150_v13, 0.0  ;;  %v1153_v23 = vadd.f32 %v3566_v43, %v2820_v19  ;;  %v1144_v25 = vpop.f32.mrb[59].mxu0 }
 0x15e   : > { %v1550_v22 = vmax.f32 %v1406_v14, 0.0  ;;  %v1409_v24 = vadd.f32 %v3566_v43, %v2884_v20  ;;  %v1400_v26 = vpop.f32.mrb[59].mxu1  ;;  %v1484_v27 = vmax.f32 %v1142_v17, 0.0  ;;  %v1145_v29 = vadd.f32 %v3566_v43, %v1144_v25 }
 0x15f   : > { %v1548_v28 = vmax.f32 %v1398_v18, 0.0  ;;  %v1401_v30 = vadd.f32 %v3566_v43, %v1400_v26  ;;  %v2618_v31 = vpack.c.bf16 %v1486_v21, %v1486_v21  ;;  %v1487_v33 = vmax.f32 %v1153_v23, 0.0 }
 0x160   : > { %v2682_v32 = vpack.c.bf16 %v1550_v22, %v1550_v22  ;;  %v1551_v34 = vmax.f32 %v1409_v24, 0.0  ;;  %v2616_v35 = vpack.c.bf16 %v1484_v27, %v1484_v27  ;;  %v1485_v37 = vmax.f32 %v1145_v29, 0.0 }
 0x161   : > { %v2680_v36 = vpack.c.bf16 %v1548_v28, %v1548_v28  ;;  %v1549_v38 = vmax.f32 %v1401_v30, 0.0  ;;  %2127 = vst.msk [vmem:[%s3259_s9 + $0xe8] sm:$0xf] %vm2068_vm1, %v2618_v31  ;;  %v2619_v39 = vpack.c.bf16 %v1487_v33, %v1487_v33 }
 0x162   : > { %2191 = vst.msk [vmem:[%s3259_s9 + $0x1e8] sm:$0xf] %vm2068_vm1, %v2682_v32  ;;  %v2683_v3 = vpack.c.bf16 %v1551_v34, %v1551_v34  ;;  %2125 = vst.msk [vmem:[%s3259_s9 + $0xe0] sm:$0xf] %vm2068_vm1, %v2616_v35  ;;  %v2617_v40 = vpack.c.bf16 %v1485_v37, %v1485_v37  ;;  %v2823_v42 = vpop.f32.mrb[60].mxu0 }
 0x163   : > { %2189 = vst.msk [vmem:[%s3259_s9 + $0x1e0] sm:$0xf] %vm2068_vm1, %v2680_v36  ;;  %v2681_v41 = vpack.c.bf16 %v1549_v38, %v1549_v38  ;;  %v2887_v44 = vpop.f32.mrb[60].mxu1  ;;  %2128 = vst.msk [vmem:[%s3259_s9 + $0xec] sm:$0xf] %vm2068_vm1, %v2619_v39  ;;  %v1166_v45 = vadd.f32 %v3566_v43, %v2823_v42  ;;  %v1157_v47 = vpop.f32.mrb[61].mxu0 }
 0x164   : > { %2192 = vst.msk [vmem:[%s3259_s9 + $0x1ec] sm:$0xf] %vm2068_vm1, %v2683_v3  ;;  %v1422_v46 = vadd.f32 %v3566_v43, %v2887_v44  ;;  %v1413_v48 = vpop.f32.mrb[61].mxu1  ;;  %2126 = vst.msk [vmem:[%s3259_s9 + $0xe4] sm:$0xf] %vm2068_vm1, %v2617_v40  ;;  %v1158_v49 = vadd.f32 %v3566_v43, %v1157_v47  ;;  %v2824_v51 = vpop.f32.mrb[62].mxu0 }
 0x165   : > { %2190 = vst.msk [vmem:[%s3259_s9 + $0x1e4] sm:$0xf] %vm2068_vm1, %v2681_v41  ;;  %v1414_v50 = vadd.f32 %v3566_v43, %v1413_v48  ;;  %v2888_v52 = vpop.f32.mrb[62].mxu1  ;;  %v1490_v53 = vmax.f32 %v1166_v45, 0.0  ;;  %v1169_v55 = vadd.f32 %v3566_v43, %v2824_v51  ;;  %v1160_v57 = vpop.f32.mrb[63].mxu0 }
 0x166   : > { %v1554_v54 = vmax.f32 %v1422_v46, 0.0  ;;  %v1425_v56 = vadd.f32 %v3566_v43, %v2888_v52  ;;  %v1416_v58 = vpop.f32.mrb[63].mxu1  ;;  %v1488_v59 = vmax.f32 %v1158_v49, 0.0  ;;  %v1161_v61 = vadd.f32 %v3566_v43, %v1160_v57 }
 0x167   : > { %v1552_v60 = vmax.f32 %v1414_v50, 0.0  ;;  %v1417_v62 = vadd.f32 %v3566_v43, %v1416_v58  ;;  %v2622_v63 = vpack.c.bf16 %v1490_v53, %v1490_v53  ;;  %v1491_v1 = vmax.f32 %v1169_v55, 0.0 }
 0x168   : > { %v2686_v0 = vpack.c.bf16 %v1554_v54, %v1554_v54  ;;  %v1555_v2 = vmax.f32 %v1425_v56, 0.0  ;;  %v2620_v4 = vpack.c.bf16 %v1488_v59, %v1488_v59  ;;  %v1489_v6 = vmax.f32 %v1161_v61, 0.0 }
 0x169   : > { %v2684_v5 = vpack.c.bf16 %v1552_v60, %v1552_v60  ;;  %v1553_v7 = vmax.f32 %v1417_v62, 0.0  ;;  %2131 = vst.msk [vmem:[%s3259_s9 + $0xf8] sm:$0xf] %vm2068_vm1, %v2622_v63  ;;  %v2623_v8 = vpack.c.bf16 %v1491_v1, %v1491_v1 }
 0x16a   : > { %2195 = vst.msk [vmem:[%s3259_s9 + $0x1f8] sm:$0xf] %vm2068_vm1, %v2686_v0  ;;  %v2687_v9 = vpack.c.bf16 %v1555_v2, %v1555_v2  ;;  %2129 = vst.msk [vmem:[%s3259_s9 + $0xf0] sm:$0xf] %vm2068_vm1, %v2620_v4  ;;  %v2621_v43 = vpack.c.bf16 %v1489_v6, %v1489_v6 }
 0x16b   : > { %2193 = vst.msk [vmem:[%s3259_s9 + $0x1f0] sm:$0xf] %vm2068_vm1, %v2684_v5  ;;  %v2685_v10 = vpack.c.bf16 %v1553_v7, %v1553_v7  ;;  %2132 = vst.msk [vmem:[%s3259_s9 + $0xfc] sm:$0xf] %vm2068_vm1, %v2623_v8 }
 0x16c   : > { %2196 = vst.msk [vmem:[%s3259_s9 + $0x1fc] sm:$0xf] %vm2068_vm1, %v2687_v9  ;;  %2130 = vst.msk [vmem:[%s3259_s9 + $0xf4] sm:$0xf] %vm2068_vm1, %v2621_v43 }
 0x16d   : > { %2194 = vst.msk [vmem:[%s3259_s9 + $0x1f4] sm:$0xf] %vm2068_vm1, %v2685_v10 }
 0x16e PF: > { %s13_s16 = sadd.s32 1, %s3041_s16   ;;  %s3663_s12 = smov %s3033_s14 }
 0x16f   : > { %p10_p7 = scmp.ge.s32.totalorder %s13_s16, 10   ;;  %s3664_s13 = smov %s3037_s15 }
 0x170   : > { %s3665_s14 = smov %s3668_s17  ;;  %s3666_s15 = smov %s3672_s18 }
 0x171   :  { %12 = sbr.rel (!%p10_p7) target bundleno = 3 (0x3), region = 62 }

// kernel: encoder_forward.7
= control target key start
LH: loop header
LB: loop body
LE: loop exit
PB: predicated region body
PF: predicated region fallthrough
CT: control target
= control target key end

     0   :  { %s1168_s12 = smov 0   ;;  %s1170_s13 = smov 0   ;;  %s1374_s0 = inlined_call_operand.vmem [shape: bf16[2,1024,128], index: 0, kind: input, shape index: {}]   ;;  %s1375_s1 = inlined_call_operand.vmem [shape: bf16[128,16], index: 1, kind: input, shape index: {}]   ;;  %s1376_s2 = inlined_call_operand.vmem [shape: f32[1,16], index: 2, kind: input, shape index: {}]   ;;  %s1377_s3 = inlined_call_operand.vmem [shape: bf16[2,1024,16], index: 3, kind: output, shape index: {}]  }
   0x1   :  { %s1172_s14 = smov 0   ;;  %s1174_s15 = smov 0  }
   0x2   :  { %s1176_s16 = smov 0  }
   0x3 LB: > { %s22_s17 = sadd.s32 1, %s1138_s14  ;;  %s25_s18 = sadd.s32 1, %s1142_s15  ;;  %s1146_s16 = sphi %s1176_s16, %s13_s16   ;;  %s1142_s15 = sphi %s1174_s15, %s1381_s15   ;;  %s1138_s14 = sphi %s1172_s14, %s1380_s14   ;;  %s1134_s13 = sphi %s1170_s13, %s1379_s13   ;;  %s1130_s12 = sphi %s1168_s12, %s1378_s12  }
   0x4   : > { %p23_p0 = scmp.ge.s32.totalorder %s22_s17, 4  ;;  %p858_p1 = scmp.ge.s32.totalorder %s1146_s16, 1 }
   0x5   : > { %p158_p2 = scmp.lt.s32.totalorder %s1146_s16, 9 }
   0x6   : > { %s1383_s17 = smov (%p23_p0, %s22_s17), 0  ;;  %s1385_s18 = smov (!%p23_p0, %s25_s18), %s1142_s15 }
   0x7   : > { %p159_p3 = pnand %p858_p1, %p158_p2  ;;  %p27_p4 = scmp.ge.s32.totalorder %s1385_s18, 2 }
   0x8   : > { %v1084_v0 = vld [vmem:[%s1375_s1] sm:$0xff] (!%p159_p3)   ;;  %s859_s21 = sshll.u32 (!%p159_p3), %s1130_s12, 5  ;;  %v1085_v1 = vld [vmem:[%s1375_s1 + $0x8] sm:$0xff] (!%p159_p3)   ;;  %p191_p5 = scmp.lt.s32.totalorder (!%p159_p3), %s1134_s13, 1  ;;  %v1086_v2 = vld [vmem:[%s1375_s1 + $0x10] sm:$0xff] (!%p159_p3)   ;;  %vm731_vm0 = vcmask (!%p159_p3), 125952  }
   0x9   : > { %s1387_s18 = smov (%p27_p4, %s1385_s18), 0  ;;  %162 = sbr.rel (%p159_p3) target bundleno = 289 (0x121), region = 32 }
   0xa   : > { %980 = vmatprep.subr.bf16.mxu0 (!%p159_p3), %v1084_v0  ;;  %1028 = vmatprep.subr.bf16.mxu1 (!%p159_p3), %v1084_v0  ;;  %p193_p6 = scmp.lt.s32.totalorder (!%p159_p3), %s859_s21, 127  ;;  %v1087_v3 = vld [vmem:[%s1375_s1 + $0x18] sm:$0xff] (!%p159_p3)   ;;  %v1088_v6 = vld [vmem:[%s1375_s1 + $0x20] sm:$0xff] (!%p159_p3)   ;;  %v1089_v7 = vld [vmem:[%s1375_s1 + $0x28] sm:$0xff] (!%p159_p3)  }
   0xb   : > { %981 = vmatpush3.bf16.msra.mxu0 (!%p159_p3), %v1084_v0  ;;  %1036 = vmatpush3.bf16.msra.mxu1 (!%p159_p3), %v1084_v0  ;;  %v1090_v8 = vld [vmem:[%s1375_s1 + $0x30] sm:$0xff] (!%p159_p3)   ;;  %v1091_v9 = vld [vmem:[%s1375_s1 + $0x38] sm:$0xff] (!%p159_p3)   ;;  %v1254_v24 = vld [vmem:[%s1376_s2] ss:$0 sm:$0xff] (!%p159_p3) }
   0xc   : > { %982 = vmatprep.subr.bf16.mxu0 (!%p159_p3), %v1085_v1  ;;  %1029 = vmatprep.subr.bf16.mxu1 (!%p159_p3), %v1085_v1 }
   0xf   : > { %983 = vmatpush3.bf16.msra.mxu0 (!%p159_p3), %v1085_v1  ;;  %1037 = vmatpush3.bf16.msra.mxu1 (!%p159_p3), %v1085_v1 }
  0x10   : > { %s1389_s13 = smov (!%p191_p5, %s1134_s13), 1  ;;  %s1391_s21 = smov (!%p193_p6, %s859_s21), 127  ;;  %984 = vmatprep.subr.bf16.mxu0 %v1086_v2  ;;  %1030 = vmatprep.subr.bf16.mxu1 %v1086_v2 }
  0x11   : > { %s860_s26 = sshll.u32 %s1389_s13, 7 }
  0x12   : > { %s1210_s27 = sadd.s32 %s860_s26, %s1391_s21 }
  0x13   : > { %s861_s28 = sshll.u32 %s1210_s27, 2  ;;  %985 = vmatpush3.bf16.msra.mxu0 %v1086_v2  ;;  %1038 = vmatpush3.bf16.msra.mxu1 %v1086_v2 }
  0x14   : > { %s1221_s6 = scalar_lea.vmem %s1374_s0, %s861_s28  ;;  %986 = vmatprep.subr.bf16.mxu0 %v1087_v3  ;;  %1031 = vmatprep.subr.bf16.mxu1 %v1087_v3  ;;  %s1267_s24 = scalar_lea.vmem %s1377_s3, %s861_s28 }
  0x15   : > { %v1092_v4 = vld [vmem:[%s1221_s6] sm:$0xff]   ;;  %v1094_v10 = vld [vmem:[%s1221_s6 + $0x8] sm:$0xff]   ;;  %v1096_v12 = vld [vmem:[%s1221_s6 + $0x10] sm:$0xff]  }
  0x16   : > { %v1093_v5 = vld [vmem:[%s1221_s6 + $0x40] sm:$0xff]   ;;  %996 = vmatprep.mubr.bf16.mxu0 %v1092_v4  ;;  %v1095_v11 = vld [vmem:[%s1221_s6 + $0x48] sm:$0xff]   ;;  %v1097_v13 = vld [vmem:[%s1221_s6 + $0x50] sm:$0xff]  }
  0x17   : > { %1012 = vmatprep.mubr.bf16.mxu1 %v1093_v5  ;;  %987 = vmatpush3.bf16.msra.mxu0 %v1087_v3  ;;  %v1098_v14 = vld [vmem:[%s1221_s6 + $0x18] sm:$0xff]   ;;  %v1100_v16 = vld [vmem:[%s1221_s6 + $0x20] sm:$0xff]   ;;  %v1102_v18 = vld [vmem:[%s1221_s6 + $0x28] sm:$0xff]  }
  0x18   : > { %1039 = vmatpush3.bf16.msra.mxu1 %v1087_v3  ;;  %988 = vmatprep.subr.bf16.mxu0 %v1088_v6  ;;  %v1099_v15 = vld [vmem:[%s1221_s6 + $0x58] sm:$0xff]   ;;  %v1101_v17 = vld [vmem:[%s1221_s6 + $0x60] sm:$0xff]   ;;  %v1103_v19 = vld [vmem:[%s1221_s6 + $0x68] sm:$0xff]  }
  0x19   : > { %1032 = vmatprep.subr.bf16.mxu1 %v1088_v6  ;;  %v1104_v20 = vld [vmem:[%s1221_s6 + $0x30] sm:$0xff]   ;;  %v1106_v22 = vld [vmem:[%s1221_s6 + $0x38] sm:$0xff]  }
  0x1a   : > { %v1105_v21 = vld [vmem:[%s1221_s6 + $0x70] sm:$0xff]   ;;  %v1107_v23 = vld [vmem:[%s1221_s6 + $0x78] sm:$0xff]  }
  0x1b   : > { %989 = vmatpush3.bf16.msra.mxu0 %v1088_v6 }
  0x1c   : > { %1040 = vmatpush3.bf16.msra.mxu1 %v1088_v6  ;;  %990 = vmatprep.subr.bf16.mxu0 %v1089_v7 }
  0x1d   : > { %1033 = vmatprep.subr.bf16.mxu1 %v1089_v7 }
  0x1f   : > { %991 = vmatpush3.bf16.msra.mxu0 %v1089_v7 }
  0x20   : > { %1041 = vmatpush3.bf16.msra.mxu1 %v1089_v7  ;;  %992 = vmatprep.subr.bf16.mxu0 %v1090_v8 }
  0x21   : > { %1034 = vmatprep.subr.bf16.mxu1 %v1090_v8 }
  0x23   : > { %993 = vmatpush3.bf16.msra.mxu0 %v1090_v8 }
  0x24   : > { %1042 = vmatpush3.bf16.msra.mxu1 %v1090_v8  ;;  %994 = vmatprep.subr.bf16.mxu0 %v1091_v9 }
  0x25   : > { %1035 = vmatprep.subr.bf16.mxu1 %v1091_v9 }
  0x27   : > { %995 = vmatpush3.bf16.msra.mxu0 %v1091_v9 }
  0x28   : > { %1043 = vmatpush3.bf16.msra.mxu1 %v1091_v9 }
  0x2a   : > { %997 = vmatmul.mubr.bf16.vlgmr.msra.gmra.mrb[0].mxu0 %v1094_v10 }
  0x2b   : > { %1013 = vmatmul.mubr.bf16.vlgmr.msra.gmra.mrb[0].mxu1 %v1095_v11  ;;  %1000 = vmatprep.mubr.bf16.mxu0 %v1096_v12 }
  0x2c   : > { %1016 = vmatprep.mubr.bf16.mxu1 %v1097_v13 }
  0x32   : > { %1001 = vmatmul.mubr.bf16.gmra.mrb[4].mxu0 %v1098_v14 }
  0x33   : > { %1017 = vmatmul.mubr.bf16.gmra.mrb[4].mxu1 %v1099_v15  ;;  %1004 = vmatprep.mubr.bf16.mxu0 %v1100_v16 }
  0x34   : > { %1020 = vmatprep.mubr.bf16.mxu1 %v1101_v17 }
  0x3a   : > { %1005 = vmatmul.mubr.bf16.gmra.mrb[8].mxu0 %v1102_v18 }
  0x3b   : > { %1021 = vmatmul.mubr.bf16.gmra.mrb[8].mxu1 %v1103_v19  ;;  %1008 = vmatprep.mubr.bf16.mxu0 %v1104_v20 }
  0x3c   : > { %1024 = vmatprep.mubr.bf16.mxu1 %v1105_v21 }
  0x42   : > { %1009 = vmatmul.mubr.bf16.gmra.mrb[12].mxu0 %v1106_v22 }
  0x43   : > { %1025 = vmatmul.mubr.bf16.gmra.mrb[12].mxu1 %v1107_v23 }
  0xfd   : > { %v998_v25 = vpop.f32.mrb[0].mxu0 }
  0xfe   : > { %v1014_v26 = vpop.f32.mrb[0].mxu1  ;;  %v453_v27 = vadd.f32 %v998_v25, %v1254_v24  ;;  %v444_v29 = vpop.f32.mrb[1].mxu0 }
  0xff   : > { %v517_v28 = vadd.f32 %v1014_v26, %v1254_v24  ;;  %v508_v30 = vpop.f32.mrb[1].mxu1  ;;  %v445_v31 = vadd.f32 %v1254_v24, %v444_v29  ;;  %v999_v33 = vpop.f32.mrb[2].mxu0 }
 0x100   : > { %v509_v32 = vadd.f32 %v1254_v24, %v508_v30  ;;  %v1015_v34 = vpop.f32.mrb[2].mxu1  ;;  %v573_v35 = vmax.f32 %v453_v27, 0.0  ;;  %v456_v37 = vadd.f32 %v999_v33, %v1254_v24  ;;  %v447_v39 = vpop.f32.mrb[3].mxu0 }
 0x101   : > { %v589_v36 = vmax.f32 %v517_v28, 0.0  ;;  %v520_v38 = vadd.f32 %v1015_v34, %v1254_v24  ;;  %v511_v40 = vpop.f32.mrb[3].mxu1  ;;  %v571_v41 = vmax.f32 %v445_v31, 0.0  ;;  %v448_v43 = vadd.f32 %v1254_v24, %v447_v39 }
 0x102   : > { %v587_v42 = vmax.f32 %v509_v32, 0.0  ;;  %v512_v44 = vadd.f32 %v1254_v24, %v511_v40  ;;  %v926_v45 = vpack.c.bf16 %v573_v35, %v573_v35  ;;  %v574_v47 = vmax.f32 %v456_v37, 0.0 }
 0x103   : > { %v942_v46 = vpack.c.bf16 %v589_v36, %v589_v36  ;;  %v590_v48 = vmax.f32 %v520_v38, 0.0  ;;  %v924_v49 = vpack.c.bf16 %v571_v41, %v571_v41  ;;  %v572_v51 = vmax.f32 %v448_v43, 0.0 }
 0x104   : > { %v940_v50 = vpack.c.bf16 %v587_v42, %v587_v42  ;;  %v588_v52 = vmax.f32 %v512_v44, 0.0  ;;  %734 = vst.msk [vmem:[%s1267_s24 + $0x8] sm:$0xf] %vm731_vm0, %v926_v45  ;;  %v927_v53 = vpack.c.bf16 %v574_v47, %v574_v47 }
 0x105   : > { %750 = vst.msk [vmem:[%s1267_s24 + $0x48] sm:$0xf] %vm731_vm0, %v942_v46  ;;  %v943_v54 = vpack.c.bf16 %v590_v48, %v590_v48  ;;  %732 = vst.msk [vmem:[%s1267_s24] sm:$0xf] %vm731_vm0, %v924_v49  ;;  %v925_v55 = vpack.c.bf16 %v572_v51, %v572_v51  ;;  %v1002_v57 = vpop.f32.mrb[4].mxu0 }
 0x106   : > { %748 = vst.msk [vmem:[%s1267_s24 + $0x40] sm:$0xf] %vm731_vm0, %v940_v50  ;;  %v941_v56 = vpack.c.bf16 %v588_v52, %v588_v52  ;;  %v1018_v58 = vpop.f32.mrb[4].mxu1  ;;  %735 = vst.msk [vmem:[%s1267_s24 + $0xc] sm:$0xf] %vm731_vm0, %v927_v53  ;;  %v469_v59 = vadd.f32 %v1002_v57, %v1254_v24  ;;  %v460_v61 = vpop.f32.mrb[5].mxu0 }
 0x107   : > { %751 = vst.msk [vmem:[%s1267_s24 + $0x4c] sm:$0xf] %vm731_vm0, %v943_v54  ;;  %v533_v60 = vadd.f32 %v1018_v58, %v1254_v24  ;;  %v524_v62 = vpop.f32.mrb[5].mxu1  ;;  %733 = vst.msk [vmem:[%s1267_s24 + $0x4] sm:$0xf] %vm731_vm0, %v925_v55  ;;  %v461_v63 = vadd.f32 %v1254_v24, %v460_v61  ;;  %v1003_v1 = vpop.f32.mrb[6].mxu0 }
 0x108   : > { %749 = vst.msk [vmem:[%s1267_s24 + $0x44] sm:$0xf] %vm731_vm0, %v941_v56  ;;  %v525_v0 = vadd.f32 %v1254_v24, %v524_v62  ;;  %v1019_v2 = vpop.f32.mrb[6].mxu1  ;;  %v577_v3 = vmax.f32 %v469_v59, 0.0  ;;  %v472_v5 = vadd.f32 %v1003_v1, %v1254_v24  ;;  %v463_v7 = vpop.f32.mrb[7].mxu0 }
 0x109   : > { %v593_v4 = vmax.f32 %v533_v60, 0.0  ;;  %v536_v6 = vadd.f32 %v1019_v2, %v1254_v24  ;;  %v527_v8 = vpop.f32.mrb[7].mxu1  ;;  %v575_v9 = vmax.f32 %v461_v63, 0.0  ;;  %v464_v11 = vadd.f32 %v1254_v24, %v463_v7 }
 0x10a   : > { %v591_v10 = vmax.f32 %v525_v0, 0.0  ;;  %v528_v12 = vadd.f32 %v1254_v24, %v527_v8  ;;  %v930_v13 = vpack.c.bf16 %v577_v3, %v577_v3  ;;  %v578_v15 = vmax.f32 %v472_v5, 0.0 }
 0x10b   : > { %v946_v14 = vpack.c.bf16 %v593_v4, %v593_v4  ;;  %v594_v16 = vmax.f32 %v536_v6, 0.0  ;;  %v928_v17 = vpack.c.bf16 %v575_v9, %v575_v9  ;;  %v576_v19 = vmax.f32 %v464_v11, 0.0 }
 0x10c   : > { %v944_v18 = vpack.c.bf16 %v591_v10, %v591_v10  ;;  %v592_v20 = vmax.f32 %v528_v12, 0.0  ;;  %738 = vst.msk [vmem:[%s1267_s24 + $0x18] sm:$0xf] %vm731_vm0, %v930_v13  ;;  %v931_v21 = vpack.c.bf16 %v578_v15, %v578_v15 }
 0x10d   : > { %754 = vst.msk [vmem:[%s1267_s24 + $0x58] sm:$0xf] %vm731_vm0, %v946_v14  ;;  %v947_v22 = vpack.c.bf16 %v594_v16, %v594_v16  ;;  %736 = vst.msk [vmem:[%s1267_s24 + $0x10] sm:$0xf] %vm731_vm0, %v928_v17  ;;  %v929_v23 = vpack.c.bf16 %v576_v19, %v576_v19  ;;  %v1006_v26 = vpop.f32.mrb[8].mxu0 }
 0x10e   : > { %752 = vst.msk [vmem:[%s1267_s24 + $0x50] sm:$0xf] %vm731_vm0, %v944_v18  ;;  %v945_v25 = vpack.c.bf16 %v592_v20, %v592_v20  ;;  %v1022_v27 = vpop.f32.mrb[8].mxu1  ;;  %739 = vst.msk [vmem:[%s1267_s24 + $0x1c] sm:$0xf] %vm731_vm0, %v931_v21  ;;  %v485_v28 = vadd.f32 %v1006_v26, %v1254_v24  ;;  %v476_v30 = vpop.f32.mrb[9].mxu0 }
 0x10f   : > { %755 = vst.msk [vmem:[%s1267_s24 + $0x5c] sm:$0xf] %vm731_vm0, %v947_v22  ;;  %v549_v29 = vadd.f32 %v1022_v27, %v1254_v24  ;;  %v540_v31 = vpop.f32.mrb[9].mxu1  ;;  %737 = vst.msk [vmem:[%s1267_s24 + $0x14] sm:$0xf] %vm731_vm0, %v929_v23  ;;  %v477_v32 = vadd.f32 %v1254_v24, %v476_v30  ;;  %v1007_v34 = vpop.f32.mrb[10].mxu0 }
 0x110   : > { %753 = vst.msk [vmem:[%s1267_s24 + $0x54] sm:$0xf] %vm731_vm0, %v945_v25  ;;  %v541_v33 = vadd.f32 %v1254_v24, %v540_v31  ;;  %v1023_v35 = vpop.f32.mrb[10].mxu1  ;;  %v581_v36 = vmax.f32 %v485_v28, 0.0  ;;  %v488_v38 = vadd.f32 %v1007_v34, %v1254_v24  ;;  %v479_v40 = vpop.f32.mrb[11].mxu0 }
 0x111   : > { %v597_v37 = vmax.f32 %v549_v29, 0.0  ;;  %v552_v39 = vadd.f32 %v1023_v35, %v1254_v24  ;;  %v543_v41 = vpop.f32.mrb[11].mxu1  ;;  %v579_v42 = vmax.f32 %v477_v32, 0.0  ;;  %v480_v44 = vadd.f32 %v1254_v24, %v479_v40 }
 0x112   : > { %v595_v43 = vmax.f32 %v541_v33, 0.0  ;;  %v544_v45 = vadd.f32 %v1254_v24, %v543_v41  ;;  %v934_v46 = vpack.c.bf16 %v581_v36, %v581_v36  ;;  %v582_v48 = vmax.f32 %v488_v38, 0.0 }
 0x113   : > { %v950_v47 = vpack.c.bf16 %v597_v37, %v597_v37  ;;  %v598_v49 = vmax.f32 %v552_v39, 0.0  ;;  %v932_v50 = vpack.c.bf16 %v579_v42, %v579_v42  ;;  %v580_v52 = vmax.f32 %v480_v44, 0.0 }
 0x114   : > { %v948_v51 = vpack.c.bf16 %v595_v43, %v595_v43  ;;  %v596_v53 = vmax.f32 %v544_v45, 0.0  ;;  %742 = vst.msk [vmem:[%s1267_s24 + $0x28] sm:$0xf] %vm731_vm0, %v934_v46  ;;  %v935_v54 = vpack.c.bf16 %v582_v48, %v582_v48 }
 0x115   : > { %758 = vst.msk [vmem:[%s1267_s24 + $0x68] sm:$0xf] %vm731_vm0, %v950_v47  ;;  %v951_v55 = vpack.c.bf16 %v598_v49, %v598_v49  ;;  %740 = vst.msk [vmem:[%s1267_s24 + $0x20] sm:$0xf] %vm731_vm0, %v932_v50  ;;  %v933_v56 = vpack.c.bf16 %v580_v52, %v580_v52  ;;  %v1010_v58 = vpop.f32.mrb[12].mxu0 }
 0x116   : > { %756 = vst.msk [vmem:[%s1267_s24 + $0x60] sm:$0xf] %vm731_vm0, %v948_v51  ;;  %v949_v57 = vpack.c.bf16 %v596_v53, %v596_v53  ;;  %v1026_v59 = vpop.f32.mrb[12].mxu1  ;;  %743 = vst.msk [vmem:[%s1267_s24 + $0x2c] sm:$0xf] %vm731_vm0, %v935_v54  ;;  %v501_v60 = vadd.f32 %v1010_v58, %v1254_v24  ;;  %v492_v62 = vpop.f32.mrb[13].mxu0 }
 0x117   : > { %759 = vst.msk [vmem:[%s1267_s24 + $0x6c] sm:$0xf] %vm731_vm0, %v951_v55  ;;  %v565_v61 = vadd.f32 %v1026_v59, %v1254_v24  ;;  %v556_v63 = vpop.f32.mrb[13].mxu1  ;;  %741 = vst.msk [vmem:[%s1267_s24 + $0x24] sm:$0xf] %vm731_vm0, %v933_v56  ;;  %v493_v0 = vadd.f32 %v1254_v24, %v492_v62  ;;  %v1011_v2 = vpop.f32.mrb[14].mxu0 }
 0x118   : > { %757 = vst.msk [vmem:[%s1267_s24 + $0x64] sm:$0xf] %vm731_vm0, %v949_v57  ;;  %v557_v1 = vadd.f32 %v1254_v24, %v556_v63  ;;  %v1027_v3 = vpop.f32.mrb[14].mxu1  ;;  %v585_v4 = vmax.f32 %v501_v60, 0.0  ;;  %v504_v6 = vadd.f32 %v1011_v2, %v1254_v24  ;;  %v495_v8 = vpop.f32.mrb[15].mxu0 }
 0x119   : > { %v601_v5 = vmax.f32 %v565_v61, 0.0  ;;  %v568_v7 = vadd.f32 %v1027_v3, %v1254_v24  ;;  %v559_v9 = vpop.f32.mrb[15].mxu1  ;;  %v583_v10 = vmax.f32 %v493_v0, 0.0  ;;  %v496_v12 = vadd.f32 %v1254_v24, %v495_v8 }
 0x11a   : > { %v599_v11 = vmax.f32 %v557_v1, 0.0  ;;  %v560_v13 = vadd.f32 %v1254_v24, %v559_v9  ;;  %v938_v14 = vpack.c.bf16 %v585_v4, %v585_v4  ;;  %v586_v16 = vmax.f32 %v504_v6, 0.0 }
 0x11b   : > { %v954_v15 = vpack.c.bf16 %v601_v5, %v601_v5  ;;  %v602_v17 = vmax.f32 %v568_v7, 0.0  ;;  %v936_v18 = vpack.c.bf16 %v583_v10, %v583_v10  ;;  %v584_v20 = vmax.f32 %v496_v12, 0.0 }
 0x11c   : > { %v952_v19 = vpack.c.bf16 %v599_v11, %v599_v11  ;;  %v600_v21 = vmax.f32 %v560_v13, 0.0  ;;  %746 = vst.msk [vmem:[%s1267_s24 + $0x38] sm:$0xf] %vm731_vm0, %v938_v14  ;;  %v939_v22 = vpack.c.bf16 %v586_v16, %v586_v16 }
 0x11d   : > { %762 = vst.msk [vmem:[%s1267_s24 + $0x78] sm:$0xf] %vm731_vm0, %v954_v15  ;;  %v955_v23 = vpack.c.bf16 %v602_v17, %v602_v17  ;;  %744 = vst.msk [vmem:[%s1267_s24 + $0x30] sm:$0xf] %vm731_vm0, %v936_v18  ;;  %v937_v24 = vpack.c.bf16 %v584_v20, %v584_v20 }
 0x11e   : > { %760 = vst.msk [vmem:[%s1267_s24 + $0x70] sm:$0xf] %vm731_vm0, %v952_v19  ;;  %v953_v25 = vpack.c.bf16 %v600_v21, %v600_v21  ;;  %747 = vst.msk [vmem:[%s1267_s24 + $0x3c] sm:$0xf] %vm731_vm0, %v939_v22 }
 0x11f   : > { %763 = vst.msk [vmem:[%s1267_s24 + $0x7c] sm:$0xf] %vm731_vm0, %v955_v23  ;;  %745 = vst.msk [vmem:[%s1267_s24 + $0x34] sm:$0xf] %vm731_vm0, %v937_v24 }
 0x120   : > { %761 = vst.msk [vmem:[%s1267_s24 + $0x74] sm:$0xf] %vm731_vm0, %v953_v25 }
 0x121 PF: > { %s13_s16 = sadd.s32 1, %s1146_s16   ;;  %s1378_s12 = smov %s1138_s14 }
 0x122   : > { %p10_p7 = scmp.ge.s32.totalorder %s13_s16, 10   ;;  %s1379_s13 = smov %s1142_s15 }
 0x123   : > { %s1380_s14 = smov %s1383_s17  ;;  %s1381_s15 = smov %s1387_s18 }
 0x124   :  { %12 = sbr.rel (!%p10_p7) target bundleno = 3 (0x3), region = 62 }

// kernel: encoder_forward.8
= control target key start
LH: loop header
LB: loop body
LE: loop exit
PB: predicated region body
PF: predicated region fallthrough
CT: control target
= control target key end

     0   :  { %s1371_s12 = smov 0   ;;  %s1373_s13 = smov 0   ;;  %s1593_s0 = inlined_call_operand.vmem [shape: bf16[2,256,256], index: 0, kind: input, shape index: {}]   ;;  %s1594_s1 = inlined_call_operand.vmem [shape: bf16[256,32], index: 1, kind: input, shape index: {}]   ;;  %s1595_s2 = inlined_call_operand.vmem [shape: f32[1,32], index: 2, kind: input, shape index: {}]   ;;  %s1596_s3 = inlined_call_operand.vmem [shape: bf16[2,256,32], index: 3, kind: output, shape index: {}]  }
   0x1   :  { %s1375_s14 = smov 0  }
   0x2 LB: > { %s25_s15 = sadd.s32 1, %s1345_s13  ;;  %p989_p0 = scmp.ge.s32.totalorder %s1349_s14, 1  ;;  %s1349_s14 = sphi %s1375_s14, %s13_s14   ;;  %s1345_s13 = sphi %s1373_s13, %s1598_s13   ;;  %s1341_s12 = sphi %s1371_s12, %s1597_s12  }
   0x3   : > { %p27_p1 = scmp.ge.s32.totalorder %s25_s15, 2  ;;  %p159_p2 = scmp.lt.s32.totalorder %s1349_s14, 3 }
   0x5   : > { %s1600_s15 = smov (%p27_p1, %s25_s15), 0  ;;  %p160_p3 = pnand %p989_p0, %p159_p2 }
   0x6   : > { %v1263_v0 = vld [vmem:[%s1594_s1 + $0x40] sm:$0xff] (!%p160_p3)   ;;  %v1265_v2 = vld [vmem:[%s1594_s1 + $0x48] sm:$0xff] (!%p160_p3)   ;;  %p193_p4 = scmp.lt.s32.totalorder (!%p160_p3), %s1341_s12, 1  ;;  %v1267_v4 = vld [vmem:[%s1594_s1 + $0x50] sm:$0xff] (!%p160_p3)   ;;  %vm862_vm0 = vcmask (!%p160_p3), 257024  }
   0x7   : > { %163 = sbr.rel (%p160_p3) target bundleno = 319 (0x13f), region = 32  ;;  %v1264_v1 = vld [vmem:[%s1594_s1] sm:$0xff] (!%p160_p3)   ;;  %1111 = vmatprep.subr.bf16.mxu0 (!%p160_p3), %v1263_v0  ;;  %1223 = vmatprep.subr.bf16.mxu1 (!%p160_p3), %v1263_v0  ;;  %v1266_v3 = vld [vmem:[%s1594_s1 + $0x8] sm:$0xff] (!%p160_p3)   ;;  %v1268_v5 = vld [vmem:[%s1594_s1 + $0x10] sm:$0xff] (!%p160_p3)  }
   0x8   : > { %1112 = vmatpush3.bf16.msra.mxu0 (!%p160_p3), %v1264_v1  ;;  %1231 = vmatpush3.bf16.msra.mxu1 (!%p160_p3), %v1264_v1  ;;  %v1269_v6 = vld [vmem:[%s1594_s1 + $0x58] sm:$0xff] (!%p160_p3)   ;;  %v1271_v8 = vld [vmem:[%s1594_s1 + $0x60] sm:$0xff] (!%p160_p3)   ;;  %v1273_v10 = vld [vmem:[%s1594_s1 + $0x68] sm:$0xff] (!%p160_p3)  }
   0x9   : > { %1113 = vmatprep.subr.bf16.mxu0 (!%p160_p3), %v1265_v2  ;;  %1224 = vmatprep.subr.bf16.mxu1 (!%p160_p3), %v1265_v2  ;;  %v1270_v7 = vld [vmem:[%s1594_s1 + $0x18] sm:$0xff] (!%p160_p3)   ;;  %v1272_v9 = vld [vmem:[%s1594_s1 + $0x20] sm:$0xff] (!%p160_p3)   ;;  %v1274_v13 = vld [vmem:[%s1594_s1 + $0x28] sm:$0xff] (!%p160_p3)  }
   0xa   : > { %v1275_v14 = vld [vmem:[%s1594_s1 + $0x70] sm:$0xff] (!%p160_p3)   ;;  %v1277_v16 = vld [vmem:[%s1594_s1 + $0x78] sm:$0xff] (!%p160_p3)   ;;  %v1480_v50 = vld [vmem:[%s1595_s2] ss:$0 sm:$0xff] (!%p160_p3) }
   0xb   : > { %v1276_v15 = vld [vmem:[%s1594_s1 + $0x30] sm:$0xff] (!%p160_p3)   ;;  %v1278_v17 = vld [vmem:[%s1594_s1 + $0x38] sm:$0xff] (!%p160_p3)  }
   0xc   : > { %1114 = vmatpush3.bf16.msra.mxu0 (!%p160_p3), %v1266_v3  ;;  %1232 = vmatpush3.bf16.msra.mxu1 (!%p160_p3), %v1266_v3 }
   0xd   : > { %1115 = vmatprep.subr.bf16.mxu0 (!%p160_p3), %v1267_v4  ;;  %1225 = vmatprep.subr.bf16.mxu1 (!%p160_p3), %v1267_v4 }
   0xe   : > { %s1602_s12 = smov (!%p193_p4, %s1341_s12), 1 }
   0xf   : > { %s1077_s5 = sshll.u32 %s1602_s12, 8  ;;  %s1078_s4 = sshll.u32 %s1602_s12, 7 }
  0x10   : > { %1116 = vmatpush3.bf16.msra.mxu0 %v1268_v5  ;;  %1233 = vmatpush3.bf16.msra.mxu1 %v1268_v5  ;;  %s1422_s10 = scalar_lea.vmem %s1593_s0, %s1077_s5  ;;  %s1490_s7 = scalar_lea.vmem %s1596_s3, %s1078_s4 }
  0x11   : > { %1117 = vmatprep.subr.bf16.mxu0 %v1269_v6  ;;  %1226 = vmatprep.subr.bf16.mxu1 %v1269_v6  ;;  %v1281_v11 = vld [vmem:[%s1422_s10 + $0x4] ss:$8 sps:$4 sm:$0xff]   ;;  %v1279_v18 = vld [vmem:[%s1422_s10] ss:$8 sps:$4 sm:$0xff]   ;;  %v1285_v20 = vld [vmem:[%s1422_s10 + $0x14] ss:$8 sps:$4 sm:$0xff]  }
  0x12   : > { %v1284_v12 = vld [vmem:[%s1422_s10 + $0x84] ss:$8 sps:$4 sm:$0xff]   ;;  %573 = vmatprep.mubr.bf16.mxu0 %v1281_v11  ;;  %v1282_v19 = vld [vmem:[%s1422_s10 + $0x80] ss:$8 sps:$4 sm:$0xff]   ;;  %v1287_v21 = vld [vmem:[%s1422_s10 + $0x94] ss:$8 sps:$4 sm:$0xff]  }
  0x13   : > { %637 = vmatprep.mubr.bf16.mxu1 %v1284_v12  ;;  %v1289_v22 = vld [vmem:[%s1422_s10 + $0x10] ss:$8 sps:$4 sm:$0xff]   ;;  %v1291_v24 = vld [vmem:[%s1422_s10 + $0x24] ss:$8 sps:$4 sm:$0xff]   ;;  %v1295_v26 = vld [vmem:[%s1422_s10 + $0x20] ss:$8 sps:$4 sm:$0xff]  }
  0x14   : > { %1118 = vmatpush3.bf16.msra.mxu0 %v1270_v7  ;;  %1234 = vmatpush3.bf16.msra.mxu1 %v1270_v7  ;;  %v1290_v23 = vld [vmem:[%s1422_s10 + $0x90] ss:$8 sps:$4 sm:$0xff]   ;;  %v1293_v25 = vld [vmem:[%s1422_s10 + $0xa4] ss:$8 sps:$4 sm:$0xff]   ;;  %v1296_v27 = vld [vmem:[%s1422_s10 + $0xa0] ss:$8 sps:$4 sm:$0xff]  }
  0x15   : > { %1119 = vmatprep.subr.bf16.mxu0 %v1271_v8  ;;  %1227 = vmatprep.subr.bf16.mxu1 %v1271_v8  ;;  %v1297_v28 = vld [vmem:[%s1422_s10 + $0x34] ss:$8 sps:$4 sm:$0xff]   ;;  %v1301_v30 = vld [vmem:[%s1422_s10 + $0x30] ss:$8 sps:$4 sm:$0xff]   ;;  %v1303_v32 = vld [vmem:[%s1422_s10 + $0x44] ss:$8 sps:$4 sm:$0xff]  }
  0x16   : > { %v1299_v29 = vld [vmem:[%s1422_s10 + $0xb4] ss:$8 sps:$4 sm:$0xff]   ;;  %v1302_v31 = vld [vmem:[%s1422_s10 + $0xb0] ss:$8 sps:$4 sm:$0xff]   ;;  %v1305_v33 = vld [vmem:[%s1422_s10 + $0xc4] ss:$8 sps:$4 sm:$0xff]  }
  0x17   : > { %v1307_v34 = vld [vmem:[%s1422_s10 + $0x40] ss:$8 sps:$4 sm:$0xff]   ;;  %v1309_v36 = vld [vmem:[%s1422_s10 + $0x54] ss:$8 sps:$4 sm:$0xff]   ;;  %v1313_v38 = vld [vmem:[%s1422_s10 + $0x50] ss:$8 sps:$4 sm:$0xff]  }
  0x18   : > { %1120 = vmatpush3.bf16.msra.mxu0 %v1272_v9  ;;  %1235 = vmatpush3.bf16.msra.mxu1 %v1272_v9  ;;  %v1308_v35 = vld [vmem:[%s1422_s10 + $0xc0] ss:$8 sps:$4 sm:$0xff]   ;;  %v1311_v37 = vld [vmem:[%s1422_s10 + $0xd4] ss:$8 sps:$4 sm:$0xff]   ;;  %v1314_v39 = vld [vmem:[%s1422_s10 + $0xd0] ss:$8 sps:$4 sm:$0xff]  }
  0x19   : > { %1121 = vmatprep.subr.bf16.mxu0 %v1273_v10  ;;  %1228 = vmatprep.subr.bf16.mxu1 %v1273_v10  ;;  %v1315_v40 = vld [vmem:[%s1422_s10 + $0x64] ss:$8 sps:$4 sm:$0xff]   ;;  %v1319_v42 = vld [vmem:[%s1422_s10 + $0x60] ss:$8 sps:$4 sm:$0xff]   ;;  %v1321_v44 = vld [vmem:[%s1422_s10 + $0x74] ss:$8 sps:$4 sm:$0xff]  }
  0x1a   : > { %v1317_v41 = vld [vmem:[%s1422_s10 + $0xe4] ss:$8 sps:$4 sm:$0xff]   ;;  %v1320_v43 = vld [vmem:[%s1422_s10 + $0xe0] ss:$8 sps:$4 sm:$0xff]   ;;  %v1323_v45 = vld [vmem:[%s1422_s10 + $0xf4] ss:$8 sps:$4 sm:$0xff]  }
  0x1b   : > { %v1325_v46 = vld [vmem:[%s1422_s10 + $0x70] ss:$8 sps:$4 sm:$0xff]  }
  0x1c   : > { %1122 = vmatpush3.bf16.msra.mxu0 %v1274_v13  ;;  %1236 = vmatpush3.bf16.msra.mxu1 %v1274_v13  ;;  %v1326_v47 = vld [vmem:[%s1422_s10 + $0xf0] ss:$8 sps:$4 sm:$0xff]  }
  0x1d   : > { %1123 = vmatprep.subr.bf16.mxu0 %v1275_v14  ;;  %1229 = vmatprep.subr.bf16.mxu1 %v1275_v14 }
  0x20   : > { %1124 = vmatpush3.bf16.msra.mxu0 %v1276_v15  ;;  %1237 = vmatpush3.bf16.msra.mxu1 %v1276_v15 }
  0x21   : > { %1125 = vmatprep.subr.bf16.mxu0 %v1277_v16  ;;  %1230 = vmatprep.subr.bf16.mxu1 %v1277_v16 }
  0x24   : > { %1126 = vmatpush3.bf16.msra.mxu0 %v1278_v17  ;;  %1238 = vmatpush3.bf16.msra.mxu1 %v1278_v17 }
  0x27   : > { %574 = vmatmul.mubr.bf16.vlgmr.msra.gmra.mrb[0].mxu0 %v1279_v18  ;;  %638 = vmatmul.mubr.bf16.vlgmr.msra.gmra.mrb[0].mxu1 %v1282_v19 }
  0x28   : > { %581 = vmatprep.mubr.bf16.mxu0 %v1285_v20  ;;  %645 = vmatprep.mubr.bf16.mxu1 %v1287_v21 }
  0x2f   : > { %582 = vmatmul.mubr.bf16.gmra.mrb[4].mxu0 %v1289_v22  ;;  %646 = vmatmul.mubr.bf16.gmra.mrb[4].mxu1 %v1290_v23 }
  0x30   : > { %589 = vmatprep.mubr.bf16.mxu0 %v1291_v24  ;;  %653 = vmatprep.mubr.bf16.mxu1 %v1293_v25 }
  0x37   : > { %590 = vmatmul.mubr.bf16.gmra.mrb[8].mxu0 %v1295_v26  ;;  %654 = vmatmul.mubr.bf16.gmra.mrb[8].mxu1 %v1296_v27 }
  0x38   : > { %597 = vmatprep.mubr.bf16.mxu0 %v1297_v28  ;;  %661 = vmatprep.mubr.bf16.mxu1 %v1299_v29 }
  0x3f   : > { %598 = vmatmul.mubr.bf16.gmra.mrb[12].mxu0 %v1301_v30  ;;  %662 = vmatmul.mubr.bf16.gmra.mrb[12].mxu1 %v1302_v31 }
  0x40   : > { %605 = vmatprep.mubr.bf16.mxu0 %v1303_v32  ;;  %669 = vmatprep.mubr.bf16.mxu1 %v1305_v33 }
  0x47   : > { %606 = vmatmul.mubr.bf16.gmra.mrb[16].mxu0 %v1307_v34  ;;  %670 = vmatmul.mubr.bf16.gmra.mrb[16].mxu1 %v1308_v35 }
  0x48   : > { %613 = vmatprep.mubr.bf16.mxu0 %v1309_v36  ;;  %677 = vmatprep.mubr.bf16.mxu1 %v1311_v37 }
  0x4f   : > { %614 = vmatmul.mubr.bf16.gmra.mrb[20].mxu0 %v1313_v38  ;;  %678 = vmatmul.mubr.bf16.gmra.mrb[20].mxu1 %v1314_v39 }
  0x50   : > { %621 = vmatprep.mubr.bf16.mxu0 %v1315_v40  ;;  %685 = vmatprep.mubr.bf16.mxu1 %v1317_v41 }
  0x57   : > { %622 = vmatmul.mubr.bf16.gmra.mrb[24].mxu0 %v1319_v42  ;;  %686 = vmatmul.mubr.bf16.gmra.mrb[24].mxu1 %v1320_v43 }
  0x58   : > { %629 = vmatprep.mubr.bf16.mxu0 %v1321_v44  ;;  %693 = vmatprep.mubr.bf16.mxu1 %v1323_v45 }
  0x5f   : > { %630 = vmatmul.mubr.bf16.gmra.mrb[28].mxu0 %v1325_v46  ;;  %694 = vmatmul.mubr.bf16.gmra.mrb[28].mxu1 %v1326_v47 }
  0xfa   : > { %v1127_v48 = vpop.f32.mrb[0].mxu0  ;;  %v1175_v49 = vpop.f32.mrb[0].mxu1 }
  0xfb   : > { %v1128_v51 = vpop.f32.mrb[1].mxu0  ;;  %v1176_v52 = vpop.f32.mrb[1].mxu1 }
  0xfc   : > { %v1129_v53 = vadd.f32 %v1128_v51, %v1127_v48  ;;  %v1177_v54 = vadd.f32 %v1176_v52, %v1175_v49  ;;  %v1130_v55 = vpop.f32.mrb[2].mxu0  ;;  %v1178_v56 = vpop.f32.mrb[2].mxu1 }
  0xfd   : > { %v1131_v57 = vpop.f32.mrb[3].mxu0  ;;  %v1179_v58 = vpop.f32.mrb[3].mxu1 }
  0xfe   : > { %v576_v59 = vadd.f32 %v1129_v53, %v1480_v50  ;;  %v640_v60 = vadd.f32 %v1177_v54, %v1480_v50  ;;  %v1132_v61 = vadd.f32 %v1131_v57, %v1130_v55  ;;  %v1180_v62 = vadd.f32 %v1179_v58, %v1178_v56 }
 0x100   : > { %v702_v63 = vmax.f32 %v576_v59, 0.0  ;;  %v718_v0 = vmax.f32 %v640_v60, 0.0  ;;  %v579_v1 = vadd.f32 %v1132_v61, %v1480_v50  ;;  %v643_v2 = vadd.f32 %v1180_v62, %v1480_v50 }
 0x102   : > { %v1079_v3 = vpack.c.bf16 %v702_v63, %v702_v63  ;;  %v1095_v4 = vpack.c.bf16 %v718_v0, %v718_v0  ;;  %v703_v5 = vmax.f32 %v579_v1, 0.0  ;;  %v719_v6 = vmax.f32 %v643_v2, 0.0  ;;  %v1133_v7 = vpop.f32.mrb[4].mxu0  ;;  %v1181_v8 = vpop.f32.mrb[4].mxu1 }
 0x103   : > { %v1134_v9 = vpop.f32.mrb[5].mxu0  ;;  %v1182_v10 = vpop.f32.mrb[5].mxu1 }
 0x104   : > { %863 = vst.msk [vmem:[%s1490_s7] sm:$0xf] %vm862_vm0, %v1079_v3  ;;  %879 = vst.msk [vmem:[%s1490_s7 + $0x40] sm:$0xf] %vm862_vm0, %v1095_v4  ;;  %v1080_v11 = vpack.c.bf16 %v703_v5, %v703_v5  ;;  %v1096_v12 = vpack.c.bf16 %v719_v6, %v719_v6  ;;  %v1135_v13 = vadd.f32 %v1134_v9, %v1133_v7  ;;  %v1136_v15 = vpop.f32.mrb[6].mxu0  ;;  %v1184_v16 = vpop.f32.mrb[6].mxu1 }
 0x105   : > { %v1183_v14 = vadd.f32 %v1182_v10, %v1181_v8  ;;  %v1137_v17 = vpop.f32.mrb[7].mxu0  ;;  %v1185_v18 = vpop.f32.mrb[7].mxu1 }
 0x106   : > { %864 = vst.msk [vmem:[%s1490_s7 + $0x4] sm:$0xf] %vm862_vm0, %v1080_v11  ;;  %880 = vst.msk [vmem:[%s1490_s7 + $0x44] sm:$0xf] %vm862_vm0, %v1096_v12  ;;  %v584_v19 = vadd.f32 %v1135_v13, %v1480_v50  ;;  %v1138_v21 = vadd.f32 %v1137_v17, %v1136_v15  ;;  %v1186_v22 = vadd.f32 %v1185_v18, %v1184_v16 }
 0x107   : > { %v648_v20 = vadd.f32 %v1183_v14, %v1480_v50 }
 0x108   : > { %v704_v23 = vmax.f32 %v584_v19, 0.0  ;;  %v587_v25 = vadd.f32 %v1138_v21, %v1480_v50  ;;  %v651_v26 = vadd.f32 %v1186_v22, %v1480_v50 }
 0x109   : > { %v720_v24 = vmax.f32 %v648_v20, 0.0 }
 0x10a   : > { %v1081_v27 = vpack.c.bf16 %v704_v23, %v704_v23  ;;  %v705_v29 = vmax.f32 %v587_v25, 0.0  ;;  %v721_v30 = vmax.f32 %v651_v26, 0.0  ;;  %v1139_v31 = vpop.f32.mrb[8].mxu0  ;;  %v1187_v32 = vpop.f32.mrb[8].mxu1 }
 0x10b   : > { %v1097_v28 = vpack.c.bf16 %v720_v24, %v720_v24  ;;  %v1140_v33 = vpop.f32.mrb[9].mxu0  ;;  %v1188_v34 = vpop.f32.mrb[9].mxu1 }
 0x10c   : > { %865 = vst.msk [vmem:[%s1490_s7 + $0x8] sm:$0xf] %vm862_vm0, %v1081_v27  ;;  %v1082_v35 = vpack.c.bf16 %v705_v29, %v705_v29  ;;  %v1098_v36 = vpack.c.bf16 %v721_v30, %v721_v30  ;;  %v1141_v37 = vadd.f32 %v1140_v33, %v1139_v31  ;;  %v1189_v38 = vadd.f32 %v1188_v34, %v1187_v32  ;;  %v1142_v39 = vpop.f32.mrb[10].mxu0  ;;  %v1190_v40 = vpop.f32.mrb[10].mxu1 }
 0x10d   : > { %881 = vst.msk [vmem:[%s1490_s7 + $0x48] sm:$0xf] %vm862_vm0, %v1097_v28  ;;  %v1143_v41 = vpop.f32.mrb[11].mxu0  ;;  %v1191_v42 = vpop.f32.mrb[11].mxu1 }
 0x10e   : > { %866 = vst.msk [vmem:[%s1490_s7 + $0xc] sm:$0xf] %vm862_vm0, %v1082_v35  ;;  %882 = vst.msk [vmem:[%s1490_s7 + $0x4c] sm:$0xf] %vm862_vm0, %v1098_v36  ;;  %v592_v43 = vadd.f32 %v1141_v37, %v1480_v50  ;;  %v656_v44 = vadd.f32 %v1189_v38, %v1480_v50  ;;  %v1144_v45 = vadd.f32 %v1143_v41, %v1142_v39 }
 0x10f   : > { %v1192_v46 = vadd.f32 %v1191_v42, %v1190_v40 }
 0x110   : > { %v706_v47 = vmax.f32 %v592_v43, 0.0  ;;  %v722_v48 = vmax.f32 %v656_v44, 0.0  ;;  %v595_v49 = vadd.f32 %v1144_v45, %v1480_v50 }
 0x111   : > { %v659_v51 = vadd.f32 %v1192_v46, %v1480_v50 }
 0x112   : > { %v1083_v52 = vpack.c.bf16 %v706_v47, %v706_v47  ;;  %v1099_v53 = vpack.c.bf16 %v722_v48, %v722_v48  ;;  %v707_v54 = vmax.f32 %v595_v49, 0.0  ;;  %v1145_v56 = vpop.f32.mrb[12].mxu0  ;;  %v1193_v57 = vpop.f32.mrb[12].mxu1 }
 0x113   : > { %v723_v55 = vmax.f32 %v659_v51, 0.0  ;;  %v1146_v58 = vpop.f32.mrb[13].mxu0  ;;  %v1194_v59 = vpop.f32.mrb[13].mxu1 }
 0x114   : > { %867 = vst.msk [vmem:[%s1490_s7 + $0x10] sm:$0xf] %vm862_vm0, %v1083_v52  ;;  %883 = vst.msk [vmem:[%s1490_s7 + $0x50] sm:$0xf] %vm862_vm0, %v1099_v53  ;;  %v1084_v60 = vpack.c.bf16 %v707_v54, %v707_v54  ;;  %v1147_v62 = vadd.f32 %v1146_v58, %v1145_v56  ;;  %v1195_v63 = vadd.f32 %v1194_v59, %v1193_v57  ;;  %v1148_v0 = vpop.f32.mrb[14].mxu0  ;;  %v1196_v1 = vpop.f32.mrb[14].mxu1 }
 0x115   : > { %v1100_v61 = vpack.c.bf16 %v723_v55, %v723_v55  ;;  %v1149_v2 = vpop.f32.mrb[15].mxu0  ;;  %v1197_v3 = vpop.f32.mrb[15].mxu1 }
 0x116   : > { %868 = vst.msk [vmem:[%s1490_s7 + $0x14] sm:$0xf] %vm862_vm0, %v1084_v60  ;;  %v600_v4 = vadd.f32 %v1147_v62, %v1480_v50  ;;  %v664_v5 = vadd.f32 %v1195_v63, %v1480_v50  ;;  %v1150_v6 = vadd.f32 %v1149_v2, %v1148_v0  ;;  %v1198_v7 = vadd.f32 %v1197_v3, %v1196_v1 }
 0x117   : > { %884 = vst.msk [vmem:[%s1490_s7 + $0x54] sm:$0xf] %vm862_vm0, %v1100_v61 }
 0x118   : > { %v708_v8 = vmax.f32 %v600_v4, 0.0  ;;  %v724_v9 = vmax.f32 %v664_v5, 0.0  ;;  %v603_v10 = vadd.f32 %v1150_v6, %v1480_v50  ;;  %v667_v11 = vadd.f32 %v1198_v7, %v1480_v50 }
 0x11a   : > { %v1085_v12 = vpack.c.bf16 %v708_v8, %v708_v8  ;;  %v1101_v13 = vpack.c.bf16 %v724_v9, %v724_v9  ;;  %v709_v14 = vmax.f32 %v603_v10, 0.0  ;;  %v725_v15 = vmax.f32 %v667_v11, 0.0  ;;  %v1151_v16 = vpop.f32.mrb[16].mxu0  ;;  %v1199_v17 = vpop.f32.mrb[16].mxu1 }
 0x11b   : > { %v1152_v18 = vpop.f32.mrb[17].mxu0  ;;  %v1200_v19 = vpop.f32.mrb[17].mxu1 }
 0x11c   : > { %869 = vst.msk [vmem:[%s1490_s7 + $0x18] sm:$0xf] %vm862_vm0, %v1085_v12  ;;  %885 = vst.msk [vmem:[%s1490_s7 + $0x58] sm:$0xf] %vm862_vm0, %v1101_v13  ;;  %v1086_v20 = vpack.c.bf16 %v709_v14, %v709_v14  ;;  %v1102_v21 = vpack.c.bf16 %v725_v15, %v725_v15  ;;  %v1153_v22 = vadd.f32 %v1152_v18, %v1151_v16  ;;  %v1154_v24 = vpop.f32.mrb[18].mxu0  ;;  %v1202_v25 = vpop.f32.mrb[18].mxu1 }
 0x11d   : > { %v1201_v23 = vadd.f32 %v1200_v19, %v1199_v17  ;;  %v1155_v26 = vpop.f32.mrb[19].mxu0  ;;  %v1203_v27 = vpop.f32.mrb[19].mxu1 }
 0x11e   : > { %870 = vst.msk [vmem:[%s1490_s7 + $0x1c] sm:$0xf] %vm862_vm0, %v1086_v20  ;;  %886 = vst.msk [vmem:[%s1490_s7 + $0x5c] sm:$0xf] %vm862_vm0, %v1102_v21  ;;  %v608_v28 = vadd.f32 %v1153_v22, %v1480_v50  ;;  %v1156_v30 = vadd.f32 %v1155_v26, %v1154_v24  ;;  %v1204_v31 = vadd.f32 %v1203_v27, %v1202_v25 }
 0x11f   : > { %v672_v29 = vadd.f32 %v1201_v23, %v1480_v50 }
 0x120   : > { %v710_v32 = vmax.f32 %v608_v28, 0.0  ;;  %v611_v34 = vadd.f32 %v1156_v30, %v1480_v50  ;;  %v675_v35 = vadd.f32 %v1204_v31, %v1480_v50 }
 0x121   : > { %v726_v33 = vmax.f32 %v672_v29, 0.0 }
 0x122   : > { %v1087_v36 = vpack.c.bf16 %v710_v32, %v710_v32  ;;  %v711_v38 = vmax.f32 %v611_v34, 0.0  ;;  %v727_v39 = vmax.f32 %v675_v35, 0.0  ;;  %v1157_v40 = vpop.f32.mrb[20].mxu0  ;;  %v1205_v41 = vpop.f32.mrb[20].mxu1 }
 0x123   : > { %v1103_v37 = vpack.c.bf16 %v726_v33, %v726_v33  ;;  %v1158_v42 = vpop.f32.mrb[21].mxu0  ;;  %v1206_v43 = vpop.f32.mrb[21].mxu1 }
 0x124   : > { %871 = vst.msk [vmem:[%s1490_s7 + $0x20] sm:$0xf] %vm862_vm0, %v1087_v36  ;;  %v1088_v44 = vpack.c.bf16 %v711_v38, %v711_v38  ;;  %v1104_v45 = vpack.c.bf16 %v727_v39, %v727_v39  ;;  %v1159_v46 = vadd.f32 %v1158_v42, %v1157_v40  ;;  %v1207_v47 = vadd.f32 %v1206_v43, %v1205_v41  ;;  %v1160_v48 = vpop.f32.mrb[22].mxu0  ;;  %v1208_v49 = vpop.f32.mrb[22].mxu1 }
 0x125   : > { %887 = vst.msk [vmem:[%s1490_s7 + $0x60] sm:$0xf] %vm862_vm0, %v1103_v37  ;;  %v1161_v51 = vpop.f32.mrb[23].mxu0  ;;  %v1209_v52 = vpop.f32.mrb[23].mxu1 }
 0x126   : > { %872 = vst.msk [vmem:[%s1490_s7 + $0x24] sm:$0xf] %vm862_vm0, %v1088_v44  ;;  %888 = vst.msk [vmem:[%s1490_s7 + $0x64] sm:$0xf] %vm862_vm0, %v1104_v45  ;;  %v616_v53 = vadd.f32 %v1159_v46, %v1480_v50  ;;  %v680_v54 = vadd.f32 %v1207_v47, %v1480_v50  ;;  %v1162_v55 = vadd.f32 %v1161_v51, %v1160_v48 }
 0x127   : > { %v1210_v56 = vadd.f32 %v1209_v52, %v1208_v49 }
 0x128   : > { %v712_v57 = vmax.f32 %v616_v53, 0.0  ;;  %v728_v58 = vmax.f32 %v680_v54, 0.0  ;;  %v619_v59 = vadd.f32 %v1162_v55, %v1480_v50 }
 0x129   : > { %v683_v60 = vadd.f32 %v1210_v56, %v1480_v50 }
 0x12a   : > { %v1089_v61 = vpack.c.bf16 %v712_v57, %v712_v57  ;;  %v1105_v62 = vpack.c.bf16 %v728_v58, %v728_v58  ;;  %v713_v63 = vmax.f32 %v619_v59, 0.0  ;;  %v1163_v1 = vpop.f32.mrb[24].mxu0  ;;  %v1211_v2 = vpop.f32.mrb[24].mxu1 }
 0x12b   : > { %v729_v0 = vmax.f32 %v683_v60, 0.0  ;;  %v1164_v3 = vpop.f32.mrb[25].mxu0  ;;  %v1212_v4 = vpop.f32.mrb[25].mxu1 }
 0x12c   : > { %873 = vst.msk [vmem:[%s1490_s7 + $0x28] sm:$0xf] %vm862_vm0, %v1089_v61  ;;  %889 = vst.msk [vmem:[%s1490_s7 + $0x68] sm:$0xf] %vm862_vm0, %v1105_v62  ;;  %v1090_v5 = vpack.c.bf16 %v713_v63, %v713_v63  ;;  %v1165_v7 = vadd.f32 %v1164_v3, %v1163_v1  ;;  %v1213_v8 = vadd.f32 %v1212_v4, %v1211_v2  ;;  %v1166_v9 = vpop.f32.mrb[26].mxu0  ;;  %v1214_v10 = vpop.f32.mrb[26].mxu1 }
 0x12d   : > { %v1106_v6 = vpack.c.bf16 %v729_v0, %v729_v0  ;;  %v1167_v11 = vpop.f32.mrb[27].mxu0  ;;  %v1215_v12 = vpop.f32.mrb[27].mxu1 }
 0x12e   : > { %874 = vst.msk [vmem:[%s1490_s7 + $0x2c] sm:$0xf] %vm862_vm0, %v1090_v5  ;;  %v624_v13 = vadd.f32 %v1165_v7, %v1480_v50  ;;  %v688_v14 = vadd.f32 %v1213_v8, %v1480_v50  ;;  %v1168_v15 = vadd.f32 %v1167_v11, %v1166_v9  ;;  %v1216_v16 = vadd.f32 %v1215_v12, %v1214_v10 }
 0x12f   : > { %890 = vst.msk [vmem:[%s1490_s7 + $0x6c] sm:$0xf] %vm862_vm0, %v1106_v6 }
 0x130   : > { %v714_v17 = vmax.f32 %v624_v13, 0.0  ;;  %v730_v18 = vmax.f32 %v688_v14, 0.0  ;;  %v627_v19 = vadd.f32 %v1168_v15, %v1480_v50  ;;  %v691_v20 = vadd.f32 %v1216_v16, %v1480_v50 }
 0x132   : > { %v1091_v21 = vpack.c.bf16 %v714_v17, %v714_v17  ;;  %v1107_v22 = vpack.c.bf16 %v730_v18, %v730_v18  ;;  %v715_v23 = vmax.f32 %v627_v19, 0.0  ;;  %v731_v24 = vmax.f32 %v691_v20, 0.0  ;;  %v1169_v25 = vpop.f32.mrb[28].mxu0  ;;  %v1217_v26 = vpop.f32.mrb[28].mxu1 }
 0x133   : > { %v1170_v27 = vpop.f32.mrb[29].mxu0  ;;  %v1218_v28 = vpop.f32.mrb[29].mxu1 }
 0x134   : > { %875 = vst.msk [vmem:[%s1490_s7 + $0x30] sm:$0xf] %vm862_vm0, %v1091_v21  ;;  %891 = vst.msk [vmem:[%s1490_s7 + $0x70] sm:$0xf] %vm862_vm0, %v1107_v22  ;;  %v1092_v29 = vpack.c.bf16 %v715_v23, %v715_v23  ;;  %v1108_v30 = vpack.c.bf16 %v731_v24, %v731_v24  ;;  %v1171_v31 = vadd.f32 %v1170_v27, %v1169_v25  ;;  %v1172_v33 = vpop.f32.mrb[30].mxu0  ;;  %v1220_v34 = vpop.f32.mrb[30].mxu1 }
 0x135   : > { %v1219_v32 = vadd.f32 %v1218_v28, %v1217_v26  ;;  %v1173_v35 = vpop.f32.mrb[31].mxu0  ;;  %v1221_v36 = vpop.f32.mrb[31].mxu1 }
 0x136   : > { %876 = vst.msk [vmem:[%s1490_s7 + $0x34] sm:$0xf] %vm862_vm0, %v1092_v29  ;;  %892 = vst.msk [vmem:[%s1490_s7 + $0x74] sm:$0xf] %vm862_vm0, %v1108_v30  ;;  %v632_v37 = vadd.f32 %v1171_v31, %v1480_v50  ;;  %v1174_v39 = vadd.f32 %v1173_v35, %v1172_v33  ;;  %v1222_v40 = vadd.f32 %v1221_v36, %v1220_v34 }
 0x137   : > { %v696_v38 = vadd.f32 %v1219_v32, %v1480_v50 }
 0x138   : > { %v716_v41 = vmax.f32 %v632_v37, 0.0  ;;  %v635_v43 = vadd.f32 %v1174_v39, %v1480_v50  ;;  %v699_v44 = vadd.f32 %v1222_v40, %v1480_v50 }
 0x139   : > { %v732_v42 = vmax.f32 %v696_v38, 0.0 }
 0x13a   : > { %v1093_v45 = vpack.c.bf16 %v716_v41, %v716_v41  ;;  %v717_v47 = vmax.f32 %v635_v43, 0.0  ;;  %v733_v48 = vmax.f32 %v699_v44, 0.0 }
 0x13b   : > { %v1109_v46 = vpack.c.bf16 %v732_v42, %v732_v42 }
 0x13c   : > { %877 = vst.msk [vmem:[%s1490_s7 + $0x38] sm:$0xf] %vm862_vm0, %v1093_v45  ;;  %v1094_v49 = vpack.c.bf16 %v717_v47, %v717_v47  ;;  %v1110_v51 = vpack.c.bf16 %v733_v48, %v733_v48 }
 0x13d   : > { %893 = vst.msk [vmem:[%s1490_s7 + $0x78] sm:$0xf] %vm862_vm0, %v1109_v46 }
 0x13e   : > { %878 = vst.msk [vmem:[%s1490_s7 + $0x3c] sm:$0xf] %vm862_vm0, %v1094_v49  ;;  %894 = vst.msk [vmem:[%s1490_s7 + $0x7c] sm:$0xf] %vm862_vm0, %v1110_v51 }
 0x13f PF: > { %s13_s14 = sadd.s32 1, %s1349_s14   ;;  %s1597_s12 = smov %s1345_s13 }
 0x140   : > { %p10_p5 = scmp.ge.s32.totalorder %s13_s14, 4   ;;  %s1598_s13 = smov %s1600_s15 }
 0x142   :  { %12 = sbr.rel (!%p10_p5) target bundleno = 2 (0x2), region = 62 }

// kernel: encoder_forward.9
= control target key start
LH: loop header
LB: loop body
LE: loop exit
PB: predicated region body
PF: predicated region fallthrough
CT: control target
= control target key end

     0   :  { %s1124_s12 = smov 0   ;;  %s1126_s13 = smov 0   ;;  %s1310_s0 = inlined_call_operand.vmem [shape: bf16[2,64,512], index: 0, kind: input, shape index: {}]   ;;  %s1311_s1 = inlined_call_operand.vmem [shape: bf16[512,64], index: 1, kind: input, shape index: {}]   ;;  %s1312_s2 = inlined_call_operand.vmem [shape: f32[1,64], index: 2, kind: input, shape index: {}]   ;;  %s1313_s3 = inlined_call_operand.vmem [shape: bf16[2,64,64], index: 3, kind: output, shape index: {}]  }
   0x1   :  { %s1128_s14 = smov 0  }
   0x2 LB: > { %s25_s15 = sadd.s32 1, %s1098_s13  ;;  %p846_p0 = scmp.ge.s32.totalorder %s1102_s14, 1  ;;  %s1102_s14 = sphi %s1128_s14, %s13_s14   ;;  %s1098_s13 = sphi %s1126_s13, %s1315_s13   ;;  %s1094_s12 = sphi %s1124_s12, %s1314_s12  }
   0x3   : > { %p27_p1 = scmp.ge.s32.totalorder %s25_s15, 2  ;;  %p159_p2 = scmp.lt.s32.totalorder %s1102_s14, 3 }
   0x5   : > { %s1317_s15 = smov (%p27_p1, %s25_s15), 0  ;;  %p160_p3 = pnand %p846_p0, %p159_p2 }
   0x6   : > { %v1024_v0 = vld [vmem:[%s1311_s1 + $0x40] sm:$0xff] (!%p160_p3)   ;;  %v1028_v4 = vld [vmem:[%s1311_s1 + $0x48] sm:$0xff] (!%p160_p3)   ;;  %v1032_v8 = vld [vmem:[%s1311_s1 + $0x50] sm:$0xff] (!%p160_p3)   ;;  %p193_p4 = scmp.lt.s32.totalorder (!%p160_p3), %s1094_s12, 1  ;;  %vm743_vm0 = vcmask (!%p160_p3), 519168  }
   0x7   : > { %163 = sbr.rel (%p160_p3) target bundleno = 290 (0x122), region = 32  ;;  %v1025_v1 = vld [vmem:[%s1311_s1 + $0xc0] sm:$0xff] (!%p160_p3)   ;;  %920 = vmatprep.subr.bf16.mxu0 (!%p160_p3), %v1024_v0  ;;  %v1029_v5 = vld [vmem:[%s1311_s1 + $0xc8] sm:$0xff] (!%p160_p3)   ;;  %v1033_v9 = vld [vmem:[%s1311_s1 + $0xd0] sm:$0xff] (!%p160_p3)  }
   0x8   : > { %v1026_v2 = vld [vmem:[%s1311_s1] sm:$0xff] (!%p160_p3)   ;;  %960 = vmatprep.subr.bf16.mxu1 (!%p160_p3), %v1025_v1  ;;  %v1030_v6 = vld [vmem:[%s1311_s1 + $0x8] sm:$0xff] (!%p160_p3)   ;;  %v1034_v10 = vld [vmem:[%s1311_s1 + $0x10] sm:$0xff] (!%p160_p3)  }
   0x9   : > { %v1027_v3 = vld [vmem:[%s1311_s1 + $0x80] sm:$0xff] (!%p160_p3)   ;;  %921 = vmatpush3.bf16.msra.mxu0 (!%p160_p3), %v1026_v2  ;;  %v1031_v7 = vld [vmem:[%s1311_s1 + $0x88] sm:$0xff] (!%p160_p3)   ;;  %v1035_v11 = vld [vmem:[%s1311_s1 + $0x90] sm:$0xff] (!%p160_p3)  }
   0xa   : > { %961 = vmatpush3.bf16.msra.mxu1 (!%p160_p3), %v1027_v3  ;;  %922 = vmatprep.subr.bf16.mxu0 (!%p160_p3), %v1028_v4  ;;  %v1036_v12 = vld [vmem:[%s1311_s1 + $0x58] sm:$0xff] (!%p160_p3)   ;;  %v1040_v16 = vld [vmem:[%s1311_s1 + $0x60] sm:$0xff] (!%p160_p3)   ;;  %v1044_v20 = vld [vmem:[%s1311_s1 + $0x68] sm:$0xff] (!%p160_p3)  }
   0xb   : > { %962 = vmatprep.subr.bf16.mxu1 (!%p160_p3), %v1029_v5  ;;  %v1037_v13 = vld [vmem:[%s1311_s1 + $0xd8] sm:$0xff] (!%p160_p3)   ;;  %v1041_v17 = vld [vmem:[%s1311_s1 + $0xe0] sm:$0xff] (!%p160_p3)   ;;  %v1045_v21 = vld [vmem:[%s1311_s1 + $0xe8] sm:$0xff] (!%p160_p3)  }
   0xc   : > { %v1038_v14 = vld [vmem:[%s1311_s1 + $0x18] sm:$0xff] (!%p160_p3)   ;;  %v1042_v18 = vld [vmem:[%s1311_s1 + $0x20] sm:$0xff] (!%p160_p3)   ;;  %v1046_v22 = vld [vmem:[%s1311_s1 + $0x28] sm:$0xff] (!%p160_p3)  }
   0xd   : > { %923 = vmatpush3.bf16.msra.mxu0 (!%p160_p3), %v1030_v6  ;;  %v1039_v15 = vld [vmem:[%s1311_s1 + $0x98] sm:$0xff] (!%p160_p3)   ;;  %v1043_v19 = vld [vmem:[%s1311_s1 + $0xa0] sm:$0xff] (!%p160_p3)   ;;  %v1047_v23 = vld [vmem:[%s1311_s1 + $0xa8] sm:$0xff] (!%p160_p3)  }
   0xe   : > { %963 = vmatpush3.bf16.msra.mxu1 %v1031_v7  ;;  %924 = vmatprep.subr.bf16.mxu0 %v1032_v8  ;;  %s1319_s12 = smov (!%p193_p4, %s1094_s12), 1  ;;  %v1048_v24 = vld [vmem:[%s1311_s1 + $0x70] sm:$0xff]   ;;  %v1052_v28 = vld [vmem:[%s1311_s1 + $0x78] sm:$0xff]   ;;  %v1269_v50 = vld [vmem:[%s1312_s2] ss:$0 sm:$0xff] }
   0xf   : > { %964 = vmatprep.subr.bf16.mxu1 %v1033_v9  ;;  %v1049_v25 = vld [vmem:[%s1311_s1 + $0xf0] sm:$0xff]   ;;  %s910_s24 = sshll.u32 %s1319_s12, 7  ;;  %v1053_v29 = vld [vmem:[%s1311_s1 + $0xf8] sm:$0xff]   ;;  %s911_s17 = sshll.u32 %s1319_s12, 5 }
  0x10   : > { %v1050_v26 = vld [vmem:[%s1311_s1 + $0x30] sm:$0xff]   ;;  %s1242_s6 = scalar_lea.vmem %s1310_s0, %s910_s24  ;;  %v1054_v30 = vld [vmem:[%s1311_s1 + $0x38] sm:$0xff]   ;;  %s1277_s20 = scalar_lea.vmem %s1313_s3, %s911_s17 }
  0x11   : > { %925 = vmatpush3.bf16.msra.mxu0 %v1034_v10  ;;  %v1051_v27 = vld [vmem:[%s1311_s1 + $0xb0] sm:$0xff]   ;;  %v1055_v31 = vld [vmem:[%s1311_s1 + $0xb8] sm:$0xff]  }
  0x12   : > { %965 = vmatpush3.bf16.msra.mxu1 %v1035_v11  ;;  %926 = vmatprep.subr.bf16.mxu0 %v1036_v12  ;;  %v1056_v32 = vld [vmem:[%s1242_s6] ss:$16 sps:$4 sm:$0xff]   ;;  %v1058_v33 = vld [vmem:[%s1242_s6 + $0x4] ss:$16 sps:$4 sm:$0xff]   ;;  %v1059_v34 = vld [vmem:[%s1242_s6 + $0x8] ss:$16 sps:$4 sm:$0xff]  }
  0x13   : > { %966 = vmatprep.subr.bf16.mxu1 %v1037_v13  ;;  %v1061_v35 = vld [vmem:[%s1242_s6 + $0xc] ss:$16 sps:$4 sm:$0xff]   ;;  %605 = vmatprep.mubr.bf16.mxu0 %v1058_v33  ;;  %v1062_v36 = vld [vmem:[%s1242_s6 + $0x24] ss:$16 sps:$4 sm:$0xff]   ;;  %v1066_v38 = vld [vmem:[%s1242_s6 + $0x20] ss:$16 sps:$4 sm:$0xff]  }
  0x14   : > { %670 = vmatprep.mubr.bf16.mxu1 %v1061_v35  ;;  %v1064_v37 = vld [vmem:[%s1242_s6 + $0x2c] ss:$16 sps:$4 sm:$0xff]   ;;  %v1067_v39 = vld [vmem:[%s1242_s6 + $0x28] ss:$16 sps:$4 sm:$0xff]   ;;  %v1068_v40 = vld [vmem:[%s1242_s6 + $0x44] ss:$16 sps:$4 sm:$0xff]  }
  0x15   : > { %927 = vmatpush3.bf16.msra.mxu0 %v1038_v14  ;;  %v1070_v41 = vld [vmem:[%s1242_s6 + $0x4c] ss:$16 sps:$4 sm:$0xff]   ;;  %v1072_v42 = vld [vmem:[%s1242_s6 + $0x40] ss:$16 sps:$4 sm:$0xff]   ;;  %v1073_v43 = vld [vmem:[%s1242_s6 + $0x48] ss:$16 sps:$4 sm:$0xff]  }
  0x16   : > { %967 = vmatpush3.bf16.msra.mxu1 %v1039_v15  ;;  %928 = vmatprep.subr.bf16.mxu0 %v1040_v16  ;;  %v1074_v44 = vld [vmem:[%s1242_s6 + $0x64] ss:$16 sps:$4 sm:$0xff]   ;;  %v1076_v45 = vld [vmem:[%s1242_s6 + $0x6c] ss:$16 sps:$4 sm:$0xff]   ;;  %v1078_v46 = vld [vmem:[%s1242_s6 + $0x60] ss:$16 sps:$4 sm:$0xff]  }
  0x17   : > { %968 = vmatprep.subr.bf16.mxu1 %v1041_v17  ;;  %v1079_v47 = vld [vmem:[%s1242_s6 + $0x68] ss:$16 sps:$4 sm:$0xff]  }
  0x19   : > { %929 = vmatpush3.bf16.msra.mxu0 %v1042_v18 }
  0x1a   : > { %969 = vmatpush3.bf16.msra.mxu1 %v1043_v19  ;;  %930 = vmatprep.subr.bf16.mxu0 %v1044_v20 }
  0x1b   : > { %970 = vmatprep.subr.bf16.mxu1 %v1045_v21 }
  0x1d   : > { %931 = vmatpush3.bf16.msra.mxu0 %v1046_v22 }
  0x1e   : > { %971 = vmatpush3.bf16.msra.mxu1 %v1047_v23  ;;  %932 = vmatprep.subr.bf16.mxu0 %v1048_v24 }
  0x1f   : > { %972 = vmatprep.subr.bf16.mxu1 %v1049_v25 }
  0x21   : > { %933 = vmatpush3.bf16.msra.mxu0 %v1050_v26 }
  0x22   : > { %973 = vmatpush3.bf16.msra.mxu1 %v1051_v27  ;;  %934 = vmatprep.subr.bf16.mxu0 %v1052_v28 }
  0x23   : > { %974 = vmatprep.subr.bf16.mxu1 %v1053_v29 }
  0x25   : > { %935 = vmatpush3.bf16.msra.mxu0 %v1054_v30 }
  0x26   : > { %975 = vmatpush3.bf16.msra.mxu1 %v1055_v31 }
  0x28   : > { %606 = vmatmul.mubr.bf16.vlgmr.msra.gmra.mrb[0].mxu0 %v1056_v32 }
  0x29   : > { %671 = vmatmul.mubr.bf16.vlgmr.msra.gmra.mrb[0].mxu1 %v1059_v34  ;;  %613 = vmatprep.mubr.bf16.mxu0 %v1062_v36 }
  0x2a   : > { %678 = vmatprep.mubr.bf16.mxu1 %v1064_v37 }
  0x30   : > { %614 = vmatmul.mubr.bf16.gmra.mrb[4].mxu0 %v1066_v38 }
  0x31   : > { %679 = vmatmul.mubr.bf16.gmra.mrb[4].mxu1 %v1067_v39  ;;  %621 = vmatprep.mubr.bf16.mxu0 %v1068_v40 }
  0x32   : > { %686 = vmatprep.mubr.bf16.mxu1 %v1070_v41 }
  0x38   : > { %622 = vmatmul.mubr.bf16.gmra.mrb[8].mxu0 %v1072_v42 }
  0x39   : > { %687 = vmatmul.mubr.bf16.gmra.mrb[8].mxu1 %v1073_v43  ;;  %629 = vmatprep.mubr.bf16.mxu0 %v1074_v44 }
  0x3a   : > { %694 = vmatprep.mubr.bf16.mxu1 %v1076_v45 }
  0x40   : > { %630 = vmatmul.mubr.bf16.gmra.mrb[12].mxu0 %v1078_v46 }
  0x41   : > { %695 = vmatmul.mubr.bf16.gmra.mrb[12].mxu1 %v1079_v47 }
  0xfb   : > { %v936_v48 = vpop.f32.mrb[0].mxu0 }
  0xfc   : > { %v976_v49 = vpop.f32.mrb[0].mxu1  ;;  %v937_v51 = vpop.f32.mrb[1].mxu0 }
  0xfd   : > { %v938_v52 = vadd.f32 %v937_v51, %v936_v48  ;;  %v977_v53 = vpop.f32.mrb[1].mxu1  ;;  %v939_v54 = vpop.f32.mrb[2].mxu0 }
  0xfe   : > { %v978_v55 = vadd.f32 %v977_v53, %v976_v49  ;;  %v979_v56 = vpop.f32.mrb[2].mxu1  ;;  %v940_v57 = vpop.f32.mrb[3].mxu0 }
  0xff   : > { %v608_v58 = vadd.f32 %v938_v52, %v1269_v50  ;;  %v941_v59 = vadd.f32 %v940_v57, %v939_v54  ;;  %v980_v60 = vpop.f32.mrb[3].mxu1 }
 0x100   : > { %v981_v61 = vadd.f32 %v980_v60, %v979_v56 }
 0x101   : > { %v673_v62 = vadd.f32 %v978_v55, %v608_v58  ;;  %v611_v63 = vadd.f32 %v941_v59, %v1269_v50 }
 0x103   : > { %v703_v0 = vmax.f32 %v673_v62, 0.0  ;;  %v676_v1 = vadd.f32 %v981_v61, %v611_v63  ;;  %v942_v2 = vpop.f32.mrb[4].mxu0 }
 0x104   : > { %v982_v3 = vpop.f32.mrb[4].mxu1  ;;  %v943_v4 = vpop.f32.mrb[5].mxu0 }
 0x105   : > { %v912_v5 = vpack.c.bf16 %v703_v0, %v703_v0  ;;  %v704_v6 = vmax.f32 %v676_v1, 0.0  ;;  %v944_v7 = vadd.f32 %v943_v4, %v942_v2  ;;  %v983_v8 = vpop.f32.mrb[5].mxu1  ;;  %v945_v9 = vpop.f32.mrb[6].mxu0 }
 0x106   : > { %v984_v10 = vadd.f32 %v983_v8, %v982_v3  ;;  %v985_v11 = vpop.f32.mrb[6].mxu1  ;;  %v946_v12 = vpop.f32.mrb[7].mxu0 }
 0x107   : > { %744 = vst.msk [vmem:[%s1277_s20] sm:$0xf] %vm743_vm0, %v912_v5  ;;  %v913_v13 = vpack.c.bf16 %v704_v6, %v704_v6  ;;  %v616_v14 = vadd.f32 %v944_v7, %v1269_v50  ;;  %v947_v15 = vadd.f32 %v946_v12, %v945_v9  ;;  %v986_v16 = vpop.f32.mrb[7].mxu1 }
 0x108   : > { %v987_v17 = vadd.f32 %v986_v16, %v985_v11 }
 0x109   : > { %745 = vst.msk [vmem:[%s1277_s20 + $0x4] sm:$0xf] %vm743_vm0, %v913_v13  ;;  %v681_v18 = vadd.f32 %v984_v10, %v616_v14  ;;  %v619_v19 = vadd.f32 %v947_v15, %v1269_v50 }
 0x10b   : > { %v705_v20 = vmax.f32 %v681_v18, 0.0  ;;  %v684_v21 = vadd.f32 %v987_v17, %v619_v19  ;;  %v948_v22 = vpop.f32.mrb[8].mxu0 }
 0x10c   : > { %v988_v23 = vpop.f32.mrb[8].mxu1  ;;  %v949_v24 = vpop.f32.mrb[9].mxu0 }
 0x10d   : > { %v914_v25 = vpack.c.bf16 %v705_v20, %v705_v20  ;;  %v706_v26 = vmax.f32 %v684_v21, 0.0  ;;  %v950_v27 = vadd.f32 %v949_v24, %v948_v22  ;;  %v989_v28 = vpop.f32.mrb[9].mxu1  ;;  %v951_v29 = vpop.f32.mrb[10].mxu0 }
 0x10e   : > { %v990_v30 = vadd.f32 %v989_v28, %v988_v23  ;;  %v991_v31 = vpop.f32.mrb[10].mxu1  ;;  %v952_v32 = vpop.f32.mrb[11].mxu0 }
 0x10f   : > { %746 = vst.msk [vmem:[%s1277_s20 + $0x8] sm:$0xf] %vm743_vm0, %v914_v25  ;;  %v915_v33 = vpack.c.bf16 %v706_v26, %v706_v26  ;;  %v624_v34 = vadd.f32 %v950_v27, %v1269_v50  ;;  %v953_v35 = vadd.f32 %v952_v32, %v951_v29  ;;  %v992_v36 = vpop.f32.mrb[11].mxu1 }
 0x110   : > { %v993_v37 = vadd.f32 %v992_v36, %v991_v31 }
 0x111   : > { %747 = vst.msk [vmem:[%s1277_s20 + $0xc] sm:$0xf] %vm743_vm0, %v915_v33  ;;  %v689_v38 = vadd.f32 %v990_v30, %v624_v34  ;;  %v627_v39 = vadd.f32 %v953_v35, %v1269_v50 }
 0x113   : > { %v707_v40 = vmax.f32 %v689_v38, 0.0  ;;  %v692_v41 = vadd.f32 %v993_v37, %v627_v39  ;;  %v954_v42 = vpop.f32.mrb[12].mxu0 }
 0x114   : > { %v994_v43 = vpop.f32.mrb[12].mxu1  ;;  %v955_v44 = vpop.f32.mrb[13].mxu0 }
 0x115   : > { %v916_v45 = vpack.c.bf16 %v707_v40, %v707_v40  ;;  %v708_v46 = vmax.f32 %v692_v41, 0.0  ;;  %v956_v47 = vadd.f32 %v955_v44, %v954_v42  ;;  %v995_v48 = vpop.f32.mrb[13].mxu1  ;;  %v957_v49 = vpop.f32.mrb[14].mxu0 }
 0x116   : > { %v996_v51 = vadd.f32 %v995_v48, %v994_v43  ;;  %v997_v52 = vpop.f32.mrb[14].mxu1  ;;  %v958_v53 = vpop.f32.mrb[15].mxu0 }
 0x117   : > { %748 = vst.msk [vmem:[%s1277_s20 + $0x10] sm:$0xf] %vm743_vm0, %v916_v45  ;;  %v917_v54 = vpack.c.bf16 %v708_v46, %v708_v46  ;;  %v632_v55 = vadd.f32 %v956_v47, %v1269_v50  ;;  %v959_v56 = vadd.f32 %v958_v53, %v957_v49  ;;  %v998_v57 = vpop.f32.mrb[15].mxu1 }
 0x118   : > { %v999_v58 = vadd.f32 %v998_v57, %v997_v52 }
 0x119   : > { %749 = vst.msk [vmem:[%s1277_s20 + $0x14] sm:$0xf] %vm743_vm0, %v917_v54  ;;  %v697_v59 = vadd.f32 %v996_v51, %v632_v55  ;;  %v635_v60 = vadd.f32 %v959_v56, %v1269_v50 }
 0x11b   : > { %v709_v61 = vmax.f32 %v697_v59, 0.0  ;;  %v700_v62 = vadd.f32 %v999_v58, %v635_v60 }
 0x11d   : > { %v918_v63 = vpack.c.bf16 %v709_v61, %v709_v61  ;;  %v710_v0 = vmax.f32 %v700_v62, 0.0 }
 0x11f   : > { %750 = vst.msk [vmem:[%s1277_s20 + $0x18] sm:$0xf] %vm743_vm0, %v918_v63  ;;  %v919_v1 = vpack.c.bf16 %v710_v0, %v710_v0 }
 0x121   : > { %751 = vst.msk [vmem:[%s1277_s20 + $0x1c] sm:$0xf] %vm743_vm0, %v919_v1 }
 0x122 PF: > { %s13_s14 = sadd.s32 1, %s1102_s14   ;;  %s1314_s12 = smov %s1098_s13 }
 0x123   : > { %p10_p5 = scmp.ge.s32.totalorder %s13_s14, 4   ;;  %s1315_s13 = smov %s1317_s15 }
 0x125   :  { %12 = sbr.rel (!%p10_p5) target bundleno = 2 (0x2), region = 62 }

// kernel: encoder_forward.10
= control target key start
LH: loop header
LB: loop body
LE: loop exit
PB: predicated region body
PF: predicated region fallthrough
CT: control target
= control target key end

     0   :  { %s1362_s12 = smov 0   ;;  %s1364_s13 = smov 0   ;;  %s1608_s0 = inlined_call_operand.vmem [shape: bf16[2,16,1024], index: 0, kind: input, shape index: {}]   ;;  %s1609_s1 = inlined_call_operand.vmem [shape: bf16[1024,128], index: 1, kind: input, shape index: {}]   ;;  %s1610_s2 = inlined_call_operand.vmem [shape: f32[1,128], index: 2, kind: input, shape index: {}]   ;;  %s1611_s3 = inlined_call_operand.vmem [shape: bf16[2,16,128], index: 3, kind: output, shape index: {}]  }
   0x1   :  { %s1366_s14 = smov 0  }
   0x2 LB: > { %s25_s15 = sadd.s32 1, %s1336_s13  ;;  %p1051_p0 = scmp.ge.s32.totalorder %s1340_s14, 1  ;;  %s1340_s14 = sphi %s1366_s14, %s13_s14   ;;  %s1336_s13 = sphi %s1364_s13, %s1613_s13   ;;  %s1332_s12 = sphi %s1362_s12, %s1612_s12  }
   0x3   : > { %p27_p1 = scmp.ge.s32.totalorder %s25_s15, 2  ;;  %p159_p2 = scmp.lt.s32.totalorder %s1340_s14, 3 }
   0x5   : > { %s1615_s15 = smov (%p27_p1, %s25_s15), 0  ;;  %p160_p3 = pnand %p1051_p0, %p159_p2 }
   0x6   : > { %v1254_v0 = vld [vmem:[%s1609_s1 + $0x40] sm:$0xff] (!%p160_p3)   ;;  %v1258_v4 = vld [vmem:[%s1609_s1 + $0x48] sm:$0xff] (!%p160_p3)   ;;  %v1262_v8 = vld [vmem:[%s1609_s1 + $0x50] sm:$0xff] (!%p160_p3)   ;;  %p193_p4 = scmp.lt.s32.totalorder (!%p160_p3), %s1332_s12, 1 }
   0x7   : > { %163 = sbr.rel (%p160_p3) target bundleno = 298 (0x12a), region = 32  ;;  %v1255_v1 = vld [vmem:[%s1609_s1 + $0xc0] sm:$0xff] (!%p160_p3)   ;;  %1142 = vmatprep.subr.bf16.mxu0 (!%p160_p3), %v1254_v0  ;;  %v1259_v5 = vld [vmem:[%s1609_s1 + $0xc8] sm:$0xff] (!%p160_p3)   ;;  %v1263_v9 = vld [vmem:[%s1609_s1 + $0xd0] sm:$0xff] (!%p160_p3)  }
   0x8   : > { %v1256_v2 = vld [vmem:[%s1609_s1] sm:$0xff] (!%p160_p3)   ;;  %1164 = vmatprep.subr.bf16.mxu1 (!%p160_p3), %v1255_v1  ;;  %v1260_v6 = vld [vmem:[%s1609_s1 + $0x8] sm:$0xff] (!%p160_p3)   ;;  %v1264_v10 = vld [vmem:[%s1609_s1 + $0x10] sm:$0xff] (!%p160_p3)  }
   0x9   : > { %v1257_v3 = vld [vmem:[%s1609_s1 + $0x80] sm:$0xff] (!%p160_p3)   ;;  %1143 = vmatpush3.bf16.msra.mxu0 (!%p160_p3), %v1256_v2  ;;  %v1261_v7 = vld [vmem:[%s1609_s1 + $0x88] sm:$0xff] (!%p160_p3)   ;;  %v1265_v11 = vld [vmem:[%s1609_s1 + $0x90] sm:$0xff] (!%p160_p3)  }
   0xa   : > { %1165 = vmatpush3.bf16.msra.mxu1 (!%p160_p3), %v1257_v3  ;;  %1144 = vmatprep.subr.bf16.mxu0 (!%p160_p3), %v1258_v4  ;;  %v1266_v12 = vld [vmem:[%s1609_s1 + $0x58] sm:$0xff] (!%p160_p3)   ;;  %v1270_v16 = vld [vmem:[%s1609_s1 + $0x60] sm:$0xff] (!%p160_p3)   ;;  %v1274_v20 = vld [vmem:[%s1609_s1 + $0x68] sm:$0xff] (!%p160_p3)  }
   0xb   : > { %1166 = vmatprep.subr.bf16.mxu1 (!%p160_p3), %v1259_v5  ;;  %v1267_v13 = vld [vmem:[%s1609_s1 + $0xd8] sm:$0xff] (!%p160_p3)   ;;  %v1271_v17 = vld [vmem:[%s1609_s1 + $0xe0] sm:$0xff] (!%p160_p3)   ;;  %v1275_v21 = vld [vmem:[%s1609_s1 + $0xe8] sm:$0xff] (!%p160_p3)  }
   0xc   : > { %v1268_v14 = vld [vmem:[%s1609_s1 + $0x18] sm:$0xff] (!%p160_p3)   ;;  %v1272_v18 = vld [vmem:[%s1609_s1 + $0x20] sm:$0xff] (!%p160_p3)   ;;  %v1276_v22 = vld [vmem:[%s1609_s1 + $0x28] sm:$0xff] (!%p160_p3)  }
   0xd   : > { %1145 = vmatpush3.bf16.msra.mxu0 (!%p160_p3), %v1260_v6  ;;  %v1269_v15 = vld [vmem:[%s1609_s1 + $0x98] sm:$0xff] (!%p160_p3)   ;;  %v1273_v19 = vld [vmem:[%s1609_s1 + $0xa0] sm:$0xff] (!%p160_p3)   ;;  %v1277_v23 = vld [vmem:[%s1609_s1 + $0xa8] sm:$0xff] (!%p160_p3)  }
   0xe   : > { %1167 = vmatpush3.bf16.msra.mxu1 %v1261_v7  ;;  %1146 = vmatprep.subr.bf16.mxu0 %v1262_v8  ;;  %s1617_s12 = smov (!%p193_p4, %s1332_s12), 1  ;;  %v1278_v24 = vld [vmem:[%s1609_s1 + $0x70] sm:$0xff]   ;;  %v1282_v28 = vld [vmem:[%s1609_s1 + $0x78] sm:$0xff]   ;;  %v1286_v40 = vld [vmem:[%s1609_s1 + $0x140] sm:$0xff]  }
   0xf   : > { %1168 = vmatprep.subr.bf16.mxu1 %v1263_v9  ;;  %v1279_v25 = vld [vmem:[%s1609_s1 + $0xf0] sm:$0xff]   ;;  %s1133_s24 = sshll.u32 %s1617_s12, 6  ;;  %v1283_v29 = vld [vmem:[%s1609_s1 + $0xf8] sm:$0xff]   ;;  %v1287_v41 = vld [vmem:[%s1609_s1 + $0x1c0] sm:$0xff]  }
  0x10   : > { %v1280_v26 = vld [vmem:[%s1609_s1 + $0x30] sm:$0xff]   ;;  %s1480_s6 = scalar_lea.vmem %s1608_s0, %s1133_s24  ;;  %v1284_v30 = vld [vmem:[%s1609_s1 + $0x38] sm:$0xff]   ;;  %v1288_v42 = vld [vmem:[%s1609_s1 + $0x100] sm:$0xff]  }
  0x11   : > { %1147 = vmatpush3.bf16.msra.mxu0 %v1264_v10  ;;  %v1281_v27 = vld [vmem:[%s1609_s1 + $0xb0] sm:$0xff]   ;;  %v1285_v31 = vld [vmem:[%s1609_s1 + $0xb8] sm:$0xff]   ;;  %v214_v32 = vld [vmem:[%s1480_s6] sm:$0xff] }
  0x12   : > { %1169 = vmatpush3.bf16.msra.mxu1 %v1265_v11  ;;  %1148 = vmatprep.subr.bf16.mxu0 %v1266_v12  ;;  %v218_v33 = vld [vmem:[%s1480_s6 + $0x20] sm:$0xff]  ;;  %v215_v34 = vld [vmem:[%s1480_s6 + $0x8] sm:$0xff]  ;;  %v1294_v48 = vld [vmem:[%s1609_s1 + $0x150] sm:$0xff]  }
  0x13   : > { %1170 = vmatprep.subr.bf16.mxu1 %v1267_v13  ;;  %v1057_v35 = vcombine.low %v214_v32, %v218_v33  ;;  %v1058_v36 = vcombine.high %v214_v32, %v218_v33  ;;  %v219_v37 = vld [vmem:[%s1480_s6 + $0x28] sm:$0xff]  ;;  %v1289_v43 = vld [vmem:[%s1609_s1 + $0x180] sm:$0xff]   ;;  %v1295_v49 = vld [vmem:[%s1609_s1 + $0x1d0] sm:$0xff]  }
  0x14   : > { %v1059_v38 = vcombine.low %v215_v34, %v219_v37  ;;  %v1060_v39 = vcombine.high %v215_v34, %v219_v37  ;;  %v1290_v44 = vld [vmem:[%s1609_s1 + $0x148] sm:$0xff]   ;;  %v1296_v50 = vld [vmem:[%s1609_s1 + $0x110] sm:$0xff]   ;;  %v1298_v52 = vld [vmem:[%s1609_s1 + $0x158] sm:$0xff]  }
  0x15   : > { %1149 = vmatpush3.bf16.msra.mxu0 %v1268_v14  ;;  %813 = vmatprep.mubr.bf16.mxu0 %v1058_v36  ;;  %v1291_v45 = vld [vmem:[%s1609_s1 + $0x1c8] sm:$0xff]   ;;  %v1297_v51 = vld [vmem:[%s1609_s1 + $0x190] sm:$0xff]   ;;  %v1299_v53 = vld [vmem:[%s1609_s1 + $0x1d8] sm:$0xff]  }
  0x16   : > { %1171 = vmatpush3.bf16.msra.mxu1 %v1269_v15  ;;  %1150 = vmatprep.subr.bf16.mxu0 %v1270_v16  ;;  %v1292_v46 = vld [vmem:[%s1609_s1 + $0x108] sm:$0xff]   ;;  %v1300_v54 = vld [vmem:[%s1609_s1 + $0x118] sm:$0xff]   ;;  %v1302_v56 = vld [vmem:[%s1609_s1 + $0x160] sm:$0xff]  }
  0x17   : > { %1172 = vmatprep.subr.bf16.mxu1 %v1271_v17  ;;  %854 = vmatprep.mubr.bf16.mxu1 %v1060_v39  ;;  %v1293_v47 = vld [vmem:[%s1609_s1 + $0x188] sm:$0xff]   ;;  %v1301_v55 = vld [vmem:[%s1609_s1 + $0x198] sm:$0xff]   ;;  %v1303_v57 = vld [vmem:[%s1609_s1 + $0x1e0] sm:$0xff]  }
  0x18   : > { %v1304_v58 = vld [vmem:[%s1609_s1 + $0x120] sm:$0xff]   ;;  %v1306_v60 = vld [vmem:[%s1609_s1 + $0x168] sm:$0xff]   ;;  %v1310_v0 = vld [vmem:[%s1609_s1 + $0x170] sm:$0xff]  }
  0x19   : > { %1151 = vmatpush3.bf16.msra.mxu0 %v1272_v18  ;;  %v1305_v59 = vld [vmem:[%s1609_s1 + $0x1a0] sm:$0xff]   ;;  %v1307_v61 = vld [vmem:[%s1609_s1 + $0x1e8] sm:$0xff]   ;;  %v1311_v1 = vld [vmem:[%s1609_s1 + $0x1f0] sm:$0xff]  }
  0x1a   : > { %1173 = vmatpush3.bf16.msra.mxu1 %v1273_v19  ;;  %1152 = vmatprep.subr.bf16.mxu0 %v1274_v20  ;;  %v1308_v62 = vld [vmem:[%s1609_s1 + $0x128] sm:$0xff]   ;;  %v1312_v2 = vld [vmem:[%s1609_s1 + $0x130] sm:$0xff]   ;;  %v1314_v4 = vld [vmem:[%s1609_s1 + $0x178] sm:$0xff]  }
  0x1b   : > { %1174 = vmatprep.subr.bf16.mxu1 %v1275_v21  ;;  %v1309_v63 = vld [vmem:[%s1609_s1 + $0x1a8] sm:$0xff]   ;;  %v1313_v3 = vld [vmem:[%s1609_s1 + $0x1b0] sm:$0xff]   ;;  %v1315_v5 = vld [vmem:[%s1609_s1 + $0x1f8] sm:$0xff]  }
  0x1c   : > { %v1316_v6 = vld [vmem:[%s1609_s1 + $0x138] sm:$0xff]   ;;  %v216_v8 = vld [vmem:[%s1480_s6 + $0x10] sm:$0xff]  ;;  %v1056_v18 = vld [vmem:[%s1610_s2] ss:$0 sm:$0xff] }
  0x1d   : > { %1153 = vmatpush3.bf16.msra.mxu0 %v1276_v22  ;;  %v1317_v7 = vld [vmem:[%s1609_s1 + $0x1b8] sm:$0xff]   ;;  %v220_v9 = vld [vmem:[%s1480_s6 + $0x30] sm:$0xff] }
  0x1e   : > { %1175 = vmatpush3.bf16.msra.mxu1 %v1277_v23  ;;  %1154 = vmatprep.subr.bf16.mxu0 %v1278_v24  ;;  %v1061_v10 = vcombine.low %v216_v8, %v220_v9  ;;  %v1062_v11 = vcombine.high %v216_v8, %v220_v9  ;;  %v217_v12 = vld [vmem:[%s1480_s6 + $0x18] sm:$0xff] }
  0x1f   : > { %1176 = vmatprep.subr.bf16.mxu1 %v1279_v25  ;;  %v221_v13 = vld [vmem:[%s1480_s6 + $0x38] sm:$0xff]  ;;  %s1134_s6 = sshll.u32 %s1617_s12, 3 }
  0x20   : > { %v1063_v14 = vcombine.low %v217_v12, %v221_v13  ;;  %v1064_v15 = vcombine.high %v217_v12, %v221_v13  ;;  %s211_s17 = scalar_lea.vmem %s1611_s3, %s1134_s6 }
  0x21   : > { %1155 = vmatpush3.bf16.msra.mxu0 %v1280_v26 }
  0x22   : > { %1177 = vmatpush3.bf16.msra.mxu1 %v1281_v27  ;;  %1156 = vmatprep.subr.bf16.mxu0 %v1282_v28 }
  0x23   : > { %1178 = vmatprep.subr.bf16.mxu1 %v1283_v29 }
  0x25   : > { %1157 = vmatpush3.bf16.msra.mxu0 %v1284_v30 }
  0x26   : > { %1179 = vmatpush3.bf16.msra.mxu1 %v1285_v31  ;;  %1186 = vmatprep.subr.bf16.mxu0 %v1286_v40 }
  0x27   : > { %1208 = vmatprep.subr.bf16.mxu1 %v1287_v41 }
  0x28   : > { %814 = vmatmul.mubr.bf16.vlgmr.msra.gmra.mrb[0].mxu0 %v1057_v35 }
  0x29   : > { %855 = vmatmul.mubr.bf16.vlgmr.msra.gmra.mrb[0].mxu1 %v1059_v38  ;;  %1187 = vmatpush3.bf16.msra.mxu0 %v1288_v42 }
  0x2a   : > { %1209 = vmatpush3.bf16.msra.mxu1 %v1289_v43  ;;  %1188 = vmatprep.subr.bf16.mxu0 %v1290_v44 }
  0x2b   : > { %1210 = vmatprep.subr.bf16.mxu1 %v1291_v45  ;;  %895 = vmatprep.mubr.bf16.mxu0 %v1062_v11 }
  0x2c   : > { %936 = vmatprep.mubr.bf16.mxu1 %v1064_v15 }
  0x2d   : > { %1189 = vmatpush3.bf16.msra.mxu0 %v1292_v46 }
  0x2e   : > { %1211 = vmatpush3.bf16.msra.mxu1 %v1293_v47  ;;  %1190 = vmatprep.subr.bf16.mxu0 %v1294_v48 }
  0x2f   : > { %1212 = vmatprep.subr.bf16.mxu1 %v1295_v49 }
  0x31   : > { %1191 = vmatpush3.bf16.msra.mxu0 %v1296_v50 }
  0x32   : > { %1213 = vmatpush3.bf16.msra.mxu1 %v1297_v51  ;;  %1192 = vmatprep.subr.bf16.mxu0 %v1298_v52 }
  0x33   : > { %1214 = vmatprep.subr.bf16.mxu1 %v1299_v53 }
  0x35   : > { %1193 = vmatpush3.bf16.msra.mxu0 %v1300_v54 }
  0x36   : > { %1215 = vmatpush3.bf16.msra.mxu1 %v1301_v55  ;;  %1194 = vmatprep.subr.bf16.mxu0 %v1302_v56 }
  0x37   : > { %1216 = vmatprep.subr.bf16.mxu1 %v1303_v57 }
  0x39   : > { %1195 = vmatpush3.bf16.msra.mxu0 %v1304_v58 }
  0x3a   : > { %1217 = vmatpush3.bf16.msra.mxu1 %v1305_v59  ;;  %1196 = vmatprep.subr.bf16.mxu0 %v1306_v60 }
  0x3b   : > { %1218 = vmatprep.subr.bf16.mxu1 %v1307_v61 }
  0x3d   : > { %1197 = vmatpush3.bf16.msra.mxu0 %v1308_v62 }
  0x3e   : > { %1219 = vmatpush3.bf16.msra.mxu1 %v1309_v63  ;;  %1198 = vmatprep.subr.bf16.mxu0 %v1310_v0 }
  0x3f   : > { %1220 = vmatprep.subr.bf16.mxu1 %v1311_v1 }
  0x41   : > { %1199 = vmatpush3.bf16.msra.mxu0 %v1312_v2 }
  0x42   : > { %1221 = vmatpush3.bf16.msra.mxu1 %v1313_v3  ;;  %1200 = vmatprep.subr.bf16.mxu0 %v1314_v4 }
  0x43   : > { %1222 = vmatprep.subr.bf16.mxu1 %v1315_v5 }
  0x45   : > { %1201 = vmatpush3.bf16.msra.mxu0 %v1316_v6 }
  0x46   : > { %1223 = vmatpush3.bf16.msra.mxu1 %v1317_v7 }
  0x48   : > { %896 = vmatmul.mubr.bf16.vlgmr.msra.gmra.mrb[4].mxu0 %v1061_v10 }
  0x49   : > { %937 = vmatmul.mubr.bf16.vlgmr.msra.gmra.mrb[4].mxu1 %v1063_v14 }
  0xfb   : > { %v1158_v16 = vpop.f32.mrb[0].mxu0 }
  0xfc   : > { %v1180_v17 = vpop.f32.mrb[0].mxu1  ;;  %v1159_v19 = vpop.f32.mrb[1].mxu0 }
  0xfd   : > { %v1160_v20 = vadd.f32 %v1159_v19, %v1158_v16  ;;  %v1181_v21 = vpop.f32.mrb[1].mxu1  ;;  %v1161_v22 = vpop.f32.mrb[2].mxu0 }
  0xfe   : > { %v1182_v23 = vadd.f32 %v1181_v21, %v1180_v17  ;;  %v1183_v24 = vpop.f32.mrb[2].mxu1  ;;  %v1162_v25 = vpop.f32.mrb[3].mxu0 }
  0xff   : > { %v816_v26 = vadd.f32 %v1160_v20, %v1056_v18  ;;  %v1163_v27 = vadd.f32 %v1162_v25, %v1161_v22  ;;  %v1184_v28 = vpop.f32.mrb[3].mxu1 }
 0x100   : > { %v1185_v29 = vadd.f32 %v1184_v28, %v1183_v24 }
 0x101   : > { %v857_v30 = vadd.f32 %v1182_v23, %v816_v26  ;;  %v819_v31 = vadd.f32 %v1163_v27, %v1056_v18 }
 0x103   : > { %v860_v32 = vadd.f32 %v1185_v29, %v819_v31 }
 0x11b   : > { %v1202_v33 = vpop.f32.mrb[4].mxu0 }
 0x11c   : > { %v1224_v34 = vpop.f32.mrb[4].mxu1  ;;  %v1203_v35 = vpop.f32.mrb[5].mxu0 }
 0x11d   : > { %v1204_v36 = vadd.f32 %v1203_v35, %v1202_v33  ;;  %v1225_v37 = vpop.f32.mrb[5].mxu1  ;;  %v1205_v38 = vpop.f32.mrb[6].mxu0 }
 0x11e   : > { %v1226_v39 = vadd.f32 %v1225_v37, %v1224_v34  ;;  %v1227_v40 = vpop.f32.mrb[6].mxu1  ;;  %v1206_v41 = vpop.f32.mrb[7].mxu0 }
 0x11f   : > { %v898_v42 = vadd.f32 %v1204_v36, %v857_v30  ;;  %v1207_v43 = vadd.f32 %v1206_v41, %v1205_v38  ;;  %v1228_v44 = vpop.f32.mrb[7].mxu1 }
 0x120   : > { %v1229_v45 = vadd.f32 %v1228_v44, %v1227_v40 }
 0x121   : > { %v939_v46 = vadd.f32 %v1226_v39, %v898_v42  ;;  %v901_v47 = vadd.f32 %v1207_v43, %v860_v32 }
 0x123   : > { %v942_v48 = vadd.f32 %v1229_v45, %v901_v47  ;;  %v945_v49 = vmax.f32 %v939_v46, 0.0 }
 0x125   : > { %v946_v50 = vmax.f32 %v942_v48, 0.0 }
 0x127   : > { %v1140_v51 = vpack.c.bf16 %v946_v50, %v945_v49 }
 0x129   : > { %1141 = vst [vmem:[%s211_s17] sm:$0xff] %v1140_v51  }
 0x12a PF: > { %s13_s14 = sadd.s32 1, %s1340_s14   ;;  %s1612_s12 = smov %s1336_s13 }
 0x12b   : > { %p10_p5 = scmp.ge.s32.totalorder %s13_s14, 4   ;;  %s1613_s13 = smov %s1615_s15 }
 0x12d   :  { %12 = sbr.rel (!%p10_p5) target bundleno = 2 (0x2), region = 62 }

// kernel: encoder_forward.11
= control target key start
LH: loop header
LB: loop body
LE: loop exit
PB: predicated region body
PF: predicated region fallthrough
CT: control target
= control target key end

     0   :  { %v287_v28 = vlaneseq  ;;  %v1963_v36 = vmov 1966171168   ;;  %s2414_s0 = inlined_call_operand.vmem [shape: bf16[1,2,2048], index: 0, kind: input, shape index: {}]   ;;  %s2415_s1 = inlined_call_operand.vmem [shape: bf16[2048,32], index: 1, kind: input, shape index: {}]   ;;  %s2416_s2 = inlined_call_operand.vmem [shape: f32[1,32], index: 2, kind: input, shape index: {}]   ;;  %s2417_s3 = inlined_call_operand.hbm [shape: f32[1,2,32], index: 3, kind: output, shape index: {}]  }
   0x1   :  { %v1809_v0 = vld [vmem:[%s2415_s1 + $0x40] sm:$0xff]   ;;  %v1813_v4 = vld [vmem:[%s2415_s1 + $0x48] sm:$0xff]   ;;  %v1817_v8 = vld [vmem:[%s2415_s1 + $0x50] sm:$0xff]   ;;  %v285_v37 = vunpack.c.l.s4 %v1963_v36 }
   0x2   :  { %v1810_v1 = vld [vmem:[%s2415_s1 + $0xc0] sm:$0xff]   ;;  %1631 = vmatprep.subr.bf16.mxu0 %v1809_v0  ;;  %v1814_v5 = vld [vmem:[%s2415_s1 + $0xc8] sm:$0xff]   ;;  %v1818_v9 = vld [vmem:[%s2415_s1 + $0xd0] sm:$0xff]   ;;  %v288_v33 = vshrl.u32 %v287_v28, 7 }
   0x3   :  { %v1811_v2 = vld [vmem:[%s2415_s1] sm:$0xff]   ;;  %1653 = vmatprep.subr.bf16.mxu1 %v1810_v1  ;;  %v1815_v6 = vld [vmem:[%s2415_s1 + $0x8] sm:$0xff]   ;;  %v1819_v10 = vld [vmem:[%s2415_s1 + $0x10] sm:$0xff]   ;;  %v286_v40 = vunpack.c.0.s8 %v285_v37 }
   0x4   :  { %v1812_v3 = vld [vmem:[%s2415_s1 + $0x80] sm:$0xff]   ;;  %1632 = vmatpush3.bf16.msra.mxu0 %v1811_v2  ;;  %v1816_v7 = vld [vmem:[%s2415_s1 + $0x88] sm:$0xff]   ;;  %v1820_v11 = vld [vmem:[%s2415_s1 + $0x90] sm:$0xff]  }
   0x5   :  { %1654 = vmatpush3.bf16.msra.mxu1 %v1812_v3  ;;  %1633 = vmatprep.subr.bf16.mxu0 %v1813_v4  ;;  %v1821_v12 = vld [vmem:[%s2415_s1 + $0x58] sm:$0xff]   ;;  %v1825_v16 = vld [vmem:[%s2415_s1 + $0x60] sm:$0xff]   ;;  %v1829_v20 = vld [vmem:[%s2415_s1 + $0x68] sm:$0xff]   ;;  %v2090_v41 = vsub.s32 %v286_v40, %v288_v33 }
   0x6   :  { %1655 = vmatprep.subr.bf16.mxu1 %v1814_v5  ;;  %v1822_v13 = vld [vmem:[%s2415_s1 + $0xd8] sm:$0xff]   ;;  %v1826_v17 = vld [vmem:[%s2415_s1 + $0xe0] sm:$0xff]   ;;  %v1830_v21 = vld [vmem:[%s2415_s1 + $0xe8] sm:$0xff]  }
   0x7   :  { %v1823_v14 = vld [vmem:[%s2415_s1 + $0x18] sm:$0xff]   ;;  %v1827_v18 = vld [vmem:[%s2415_s1 + $0x20] sm:$0xff]   ;;  %v1831_v22 = vld [vmem:[%s2415_s1 + $0x28] sm:$0xff]  }
   0x8   :  { %1634 = vmatpush3.bf16.msra.mxu0 %v1815_v6  ;;  %v1824_v15 = vld [vmem:[%s2415_s1 + $0x98] sm:$0xff]   ;;  %v1828_v19 = vld [vmem:[%s2415_s1 + $0xa0] sm:$0xff]   ;;  %v1832_v23 = vld [vmem:[%s2415_s1 + $0xa8] sm:$0xff]  }
   0x9   :  { %1656 = vmatpush3.bf16.msra.mxu1 %v1816_v7  ;;  %1635 = vmatprep.subr.bf16.mxu0 %v1817_v8  ;;  %v1833_v24 = vld [vmem:[%s2415_s1 + $0x70] sm:$0xff]   ;;  %v1837_v29 = vld [vmem:[%s2415_s1 + $0x78] sm:$0xff]   ;;  %v16_v34 = vld [vmem:[%s2414_s0] sm:$0xff] }
   0xa   :  { %1657 = vmatprep.subr.bf16.mxu1 %v1818_v9  ;;  %v1834_v25 = vld [vmem:[%s2415_s1 + $0xf0] sm:$0xff]   ;;  %v1838_v30 = vld [vmem:[%s2415_s1 + $0xf8] sm:$0xff]   ;;  %v1842_v35 = vld [vmem:[%s2415_s1 + $0x140] sm:$0xff]   ;;  %v283_v39 = vcombine.high %v16_v34, %v16_v34  ;;  %v290_v42 = vrot.slane %v16_v34, %v2090_v41 }
   0xb   :  { %v1835_v26 = vld [vmem:[%s2415_s1 + $0x30] sm:$0xff]   ;;  %v1839_v31 = vld [vmem:[%s2415_s1 + $0x38] sm:$0xff]   ;;  %v1843_v38 = vld [vmem:[%s2415_s1 + $0x1c0] sm:$0xff]  }
   0xc   :  { %1636 = vmatpush3.bf16.msra.mxu0 %v1819_v10  ;;  %v1836_v27 = vld [vmem:[%s2415_s1 + $0xb0] sm:$0xff]   ;;  %v1840_v32 = vld [vmem:[%s2415_s1 + $0xb8] sm:$0xff]   ;;  %v2094_v43 = vrot.slane %v283_v39, %v2090_v41  ;;  %v298_v44 = vcombine.high %v290_v42, %v290_v42  ;;  %v306_v45 = vrot.slane %v290_v42, %v2090_v41  ;;  %v1844_v48 = vld [vmem:[%s2415_s1 + $0x100] sm:$0xff]  }
   0xd   :  { %1658 = vmatpush3.bf16.msra.mxu1 %v1820_v11  ;;  %1637 = vmatprep.subr.bf16.mxu0 %v1821_v12  ;;  %v1846_v51 = vld [vmem:[%s2415_s1 + $0x148] sm:$0xff]   ;;  %v1845_v53 = vld [vmem:[%s2415_s1 + $0x180] sm:$0xff]   ;;  %v1850_v57 = vld [vmem:[%s2415_s1 + $0x150] sm:$0xff]  }
   0xe   :  { %1659 = vmatprep.subr.bf16.mxu1 %v1822_v13  ;;  %v299_v46 = vcombine.high %v2094_v43, %v2094_v43  ;;  %v320_v47 = vrot.slane %v298_v44, %v2090_v41  ;;  %v328_v50 = vcombine.high %v306_v45, %v306_v45  ;;  %v1847_v54 = vld [vmem:[%s2415_s1 + $0x1c8] sm:$0xff]   ;;  %v1851_v59 = vld [vmem:[%s2415_s1 + $0x1d0] sm:$0xff]   ;;  %v1854_v61 = vld [vmem:[%s2415_s1 + $0x158] sm:$0xff]  }
   0xf   :  { %v1848_v56 = vld [vmem:[%s2415_s1 + $0x108] sm:$0xff]   ;;  %v1852_v60 = vld [vmem:[%s2415_s1 + $0x110] sm:$0xff]   ;;  %v1855_v63 = vld [vmem:[%s2415_s1 + $0x1d8] sm:$0xff]  }
  0x10   :  { %1638 = vmatpush3.bf16.msra.mxu0 %v1823_v14  ;;  %v327_v49 = vrot.slane %v299_v46, %v2090_v41  ;;  %1197 = vmatprep.mubr.bf16.mxu0 %v320_v47  ;;  %v330_v52 = vcombine.high %v320_v47, %v320_v47  ;;  %v1849_v58 = vld [vmem:[%s2415_s1 + $0x188] sm:$0xff]   ;;  %v1853_v62 = vld [vmem:[%s2415_s1 + $0x190] sm:$0xff]   ;;  %v1856_v0 = vld [vmem:[%s2415_s1 + $0x118] sm:$0xff]  }
  0x11   :  { %1660 = vmatpush3.bf16.msra.mxu1 %v1824_v15  ;;  %1639 = vmatprep.subr.bf16.mxu0 %v1825_v16  ;;  %v1858_v1 = vld [vmem:[%s2415_s1 + $0x160] sm:$0xff]   ;;  %v1857_v2 = vld [vmem:[%s2415_s1 + $0x198] sm:$0xff]   ;;  %v1862_v5 = vld [vmem:[%s2415_s1 + $0x168] sm:$0xff]  }
  0x12   :  { %1661 = vmatprep.subr.bf16.mxu1 %v1826_v17  ;;  %v331_v55 = vcombine.high %v327_v49, %v327_v49  ;;  %1237 = vmatprep.mubr.bf16.mxu1 %v330_v52  ;;  %v1859_v3 = vld [vmem:[%s2415_s1 + $0x1e0] sm:$0xff]   ;;  %v1863_v7 = vld [vmem:[%s2415_s1 + $0x1e8] sm:$0xff]   ;;  %v1866_v9 = vld [vmem:[%s2415_s1 + $0x170] sm:$0xff]   ;;  %v313_v17 = vrot.slane %v2094_v43, %v2090_v41 }
  0x13   :  { %v1860_v4 = vld [vmem:[%s2415_s1 + $0x120] sm:$0xff]   ;;  %v1864_v8 = vld [vmem:[%s2415_s1 + $0x128] sm:$0xff]   ;;  %v1867_v11 = vld [vmem:[%s2415_s1 + $0x1f0] sm:$0xff]  }
  0x14   :  { %1640 = vmatpush3.bf16.msra.mxu0 %v1827_v18  ;;  %v1861_v6 = vld [vmem:[%s2415_s1 + $0x1a0] sm:$0xff]   ;;  %v1865_v10 = vld [vmem:[%s2415_s1 + $0x1a8] sm:$0xff]   ;;  %v1868_v12 = vld [vmem:[%s2415_s1 + $0x130] sm:$0xff]  }
  0x15   :  { %1662 = vmatpush3.bf16.msra.mxu1 %v1828_v19  ;;  %1641 = vmatprep.subr.bf16.mxu0 %v1829_v20  ;;  %v1870_v13 = vld [vmem:[%s2415_s1 + $0x178] sm:$0xff]   ;;  %v1869_v14 = vld [vmem:[%s2415_s1 + $0x1b0] sm:$0xff]   ;;  %v1874_v18 = vld [vmem:[%s2415_s1 + $0x240] sm:$0xff]  }
  0x16   :  { %1663 = vmatprep.subr.bf16.mxu1 %v1830_v21  ;;  %v1871_v15 = vld [vmem:[%s2415_s1 + $0x1f8] sm:$0xff]   ;;  %v1875_v20 = vld [vmem:[%s2415_s1 + $0x2c0] sm:$0xff]   ;;  %v1881_v28 = vld [vmem:[%s2415_s1 + $0x288] sm:$0xff]  }
  0x17   :  { %v1872_v16 = vld [vmem:[%s2415_s1 + $0x138] sm:$0xff]   ;;  %v1876_v21 = vld [vmem:[%s2415_s1 + $0x200] sm:$0xff]   ;;  %v1894_v39 = vld [vmem:[%s2415_s1 + $0x268] sm:$0xff]  }
  0x18   :  { %1642 = vmatpush3.bf16.msra.mxu0 %v1831_v22  ;;  %v1873_v19 = vld [vmem:[%s2415_s1 + $0x1b8] sm:$0xff]   ;;  %v329_v22 = vcombine.high %v313_v17, %v313_v17  ;;  %v1891_v37 = vld [vmem:[%s2415_s1 + $0x2e0] sm:$0xff]   ;;  %v1895_v42 = vld [vmem:[%s2415_s1 + $0x2e8] sm:$0xff]  }
  0x19   :  { %1664 = vmatpush3.bf16.msra.mxu1 %v1832_v23  ;;  %1643 = vmatprep.subr.bf16.mxu0 %v1833_v24  ;;  %v1878_v23 = vld [vmem:[%s2415_s1 + $0x248] sm:$0xff]   ;;  %v1877_v24 = vld [vmem:[%s2415_s1 + $0x280] sm:$0xff]   ;;  %v1887_v33 = vld [vmem:[%s2415_s1 + $0x2d8] sm:$0xff]  }
  0x1a   :  { %1665 = vmatprep.subr.bf16.mxu1 %v1834_v25  ;;  %v1879_v25 = vld [vmem:[%s2415_s1 + $0x2c8] sm:$0xff]   ;;  %v1888_v34 = vld [vmem:[%s2415_s1 + $0x218] sm:$0xff]   ;;  %v1893_v40 = vld [vmem:[%s2415_s1 + $0x2a0] sm:$0xff]  }
  0x1b   :  { %v1889_v36 = vld [vmem:[%s2415_s1 + $0x298] sm:$0xff]   ;;  %v1896_v43 = vld [vmem:[%s2415_s1 + $0x228] sm:$0xff]   ;;  %v1898_v44 = vld [vmem:[%s2415_s1 + $0x270] sm:$0xff]  }
  0x1c   :  { %1644 = vmatpush3.bf16.msra.mxu0 %v1835_v26  ;;  %v1880_v26 = vld [vmem:[%s2415_s1 + $0x208] sm:$0xff]  }
  0x1d   :  { %1666 = vmatpush3.bf16.msra.mxu1 %v1836_v27  ;;  %1645 = vmatprep.subr.bf16.mxu0 %v1837_v29  ;;  %v1882_v27 = vld [vmem:[%s2415_s1 + $0x250] sm:$0xff]   ;;  %v1897_v46 = vld [vmem:[%s2415_s1 + $0x2a8] sm:$0xff]  }
  0x1e   :  { %1667 = vmatprep.subr.bf16.mxu1 %v1838_v30  ;;  %v1883_v29 = vld [vmem:[%s2415_s1 + $0x2d0] sm:$0xff]  }
  0x1f   :  { %v1884_v30 = vld [vmem:[%s2415_s1 + $0x210] sm:$0xff]  }
  0x20   :  { %1646 = vmatpush3.bf16.msra.mxu0 %v1839_v31  ;;  %v1886_v31 = vld [vmem:[%s2415_s1 + $0x258] sm:$0xff]  }
  0x21   :  { %1668 = vmatpush3.bf16.msra.mxu1 %v1840_v32  ;;  %1675 = vmatprep.subr.bf16.mxu0 %v1842_v35  ;;  %v1885_v32 = vld [vmem:[%s2415_s1 + $0x290] sm:$0xff]   ;;  %v1890_v35 = vld [vmem:[%s2415_s1 + $0x260] sm:$0xff]  }
  0x22   :  { %1697 = vmatprep.subr.bf16.mxu1 %v1843_v38  ;;  %v1892_v38 = vld [vmem:[%s2415_s1 + $0x220] sm:$0xff]  }
  0x23   :  { %1198 = vmatmul.mubr.bf16.vlgmr.msra.gmra.mrb[0].mxu0 %v306_v45  ;;  %v17_v45 = vld [vmem:[%s2414_s0 + $0x8] sm:$0xff] }
  0x24   :  { %1676 = vmatpush3.bf16.msra.mxu0 %v1844_v48  ;;  %1238 = vmatmul.mubr.bf16.vlgmr.msra.gmra.mrb[0].mxu1 %v328_v50  ;;  %v339_v47 = vrot.slane %v17_v45, %v2090_v41  ;;  %v332_v48 = vcombine.high %v17_v45, %v17_v45  ;;  %v1900_v50 = vld [vmem:[%s2415_s1 + $0x230] sm:$0xff]  }
  0x25   :  { %1677 = vmatprep.subr.bf16.mxu0 %v1846_v51  ;;  %1698 = vmatpush3.bf16.msra.mxu1 %v1845_v53  ;;  %v1902_v53 = vld [vmem:[%s2415_s1 + $0x278] sm:$0xff]  }
  0x26   :  { %1277 = vmatprep.mubr.bf16.mxu0 %v327_v49  ;;  %1699 = vmatprep.subr.bf16.mxu1 %v1847_v54  ;;  %v1899_v49 = vld [vmem:[%s2415_s1 + $0x2f0] sm:$0xff]   ;;  %v347_v51 = vcombine.high %v339_v47, %v339_v47  ;;  %v2279_v52 = vrot.slane %v332_v48, %v2090_v41 }
  0x27   :  { %1317 = vmatprep.mubr.bf16.mxu1 %v331_v55  ;;  %v1901_v54 = vld [vmem:[%s2415_s1 + $0x2b0] sm:$0xff]  }
  0x28   :  { %1678 = vmatpush3.bf16.msra.mxu0 %v1848_v56  ;;  %v369_v55 = vrot.slane %v347_v51, %v2090_v41  ;;  %v348_v56 = vcombine.high %v2279_v52, %v2279_v52 }
  0x29   :  { %1679 = vmatprep.subr.bf16.mxu0 %v1850_v57  ;;  %1700 = vmatpush3.bf16.msra.mxu1 %v1849_v58  ;;  %v1903_v57 = vld [vmem:[%s2415_s1 + $0x2f8] sm:$0xff]  }
  0x2a   :  { %1701 = vmatprep.subr.bf16.mxu1 %v1851_v59  ;;  %v1904_v58 = vld [vmem:[%s2415_s1 + $0x238] sm:$0xff]   ;;  %v379_v59 = vcombine.high %v369_v55, %v369_v55 }
  0x2c   :  { %1680 = vmatpush3.bf16.msra.mxu0 %v1852_v60  ;;  %v355_v60 = vrot.slane %v339_v47, %v2090_v41 }
  0x2d   :  { %1681 = vmatprep.subr.bf16.mxu0 %v1854_v61  ;;  %1702 = vmatpush3.bf16.msra.mxu1 %v1853_v62  ;;  %v1906_v61 = vld [vmem:[%s2415_s1 + $0x340] sm:$0xff]   ;;  %v1905_v62 = vld [vmem:[%s2415_s1 + $0x2b8] sm:$0xff]  }
  0x2e   :  { %1703 = vmatprep.subr.bf16.mxu1 %v1855_v63  ;;  %v376_v63 = vrot.slane %v348_v56, %v2090_v41 }
  0x30   :  { %1682 = vmatpush3.bf16.msra.mxu0 %v1856_v0  ;;  %v1907_v0 = vld [vmem:[%s2415_s1 + $0x3c0] sm:$0xff]  }
  0x31   :  { %1683 = vmatprep.subr.bf16.mxu0 %v1858_v1  ;;  %1704 = vmatpush3.bf16.msra.mxu1 %v1857_v2  ;;  %v1908_v1 = vld [vmem:[%s2415_s1 + $0x300] sm:$0xff]   ;;  %v377_v2 = vcombine.high %v355_v60, %v355_v60 }
  0x32   :  { %1705 = vmatprep.subr.bf16.mxu1 %v1859_v3  ;;  %v1910_v3 = vld [vmem:[%s2415_s1 + $0x348] sm:$0xff]  }
  0x34   :  { %1684 = vmatpush3.bf16.msra.mxu0 %v1860_v4  ;;  %v1909_v4 = vld [vmem:[%s2415_s1 + $0x380] sm:$0xff]  }
  0x35   :  { %1685 = vmatprep.subr.bf16.mxu0 %v1862_v5  ;;  %1706 = vmatpush3.bf16.msra.mxu1 %v1861_v6  ;;  %v380_v5 = vcombine.high %v376_v63, %v376_v63  ;;  %v1911_v6 = vld [vmem:[%s2415_s1 + $0x3c8] sm:$0xff]  }
  0x36   :  { %1707 = vmatprep.subr.bf16.mxu1 %v1863_v7  ;;  %v1912_v7 = vld [vmem:[%s2415_s1 + $0x308] sm:$0xff]  }
  0x38   :  { %1686 = vmatpush3.bf16.msra.mxu0 %v1864_v8  ;;  %v1914_v8 = vld [vmem:[%s2415_s1 + $0x350] sm:$0xff]  }
  0x39   :  { %1687 = vmatprep.subr.bf16.mxu0 %v1866_v9  ;;  %1708 = vmatpush3.bf16.msra.mxu1 %v1865_v10  ;;  %v1913_v9 = vld [vmem:[%s2415_s1 + $0x388] sm:$0xff]   ;;  %v1915_v10 = vld [vmem:[%s2415_s1 + $0x3d0] sm:$0xff]  }
  0x3a   :  { %1709 = vmatprep.subr.bf16.mxu1 %v1867_v11  ;;  %v1916_v11 = vld [vmem:[%s2415_s1 + $0x310] sm:$0xff]  }
  0x3c   :  { %1688 = vmatpush3.bf16.msra.mxu0 %v1868_v12  ;;  %v1918_v12 = vld [vmem:[%s2415_s1 + $0x358] sm:$0xff]  }
  0x3d   :  { %1689 = vmatprep.subr.bf16.mxu0 %v1870_v13  ;;  %1710 = vmatpush3.bf16.msra.mxu1 %v1869_v14  ;;  %v1917_v13 = vld [vmem:[%s2415_s1 + $0x390] sm:$0xff]   ;;  %v1919_v14 = vld [vmem:[%s2415_s1 + $0x3d8] sm:$0xff]  }
  0x3e   :  { %1711 = vmatprep.subr.bf16.mxu1 %v1871_v15  ;;  %v1920_v15 = vld [vmem:[%s2415_s1 + $0x318] sm:$0xff]  }
  0x40   :  { %1690 = vmatpush3.bf16.msra.mxu0 %v1872_v16  ;;  %v1922_v16 = vld [vmem:[%s2415_s1 + $0x360] sm:$0xff]  }
  0x41   :  { %1719 = vmatprep.subr.bf16.mxu0 %v1874_v18  ;;  %1712 = vmatpush3.bf16.msra.mxu1 %v1873_v19  ;;  %v1923_v18 = vld [vmem:[%s2415_s1 + $0x3e0] sm:$0xff]  }
  0x42   :  { %1741 = vmatprep.subr.bf16.mxu1 %v1875_v20  ;;  %v1924_v19 = vld [vmem:[%s2415_s1 + $0x320] sm:$0xff]   ;;  %v1926_v20 = vld [vmem:[%s2415_s1 + $0x368] sm:$0xff]  }
  0x43   :  { %1278 = vmatmul.mubr.bf16.vlgmr.msra.gmra.mrb[4].mxu0 %v313_v17  ;;  %v1921_v17 = vld [vmem:[%s2415_s1 + $0x398] sm:$0xff]  }
  0x44   :  { %1720 = vmatpush3.bf16.msra.mxu0 %v1876_v21  ;;  %1318 = vmatmul.mubr.bf16.vlgmr.msra.gmra.mrb[4].mxu1 %v329_v22  ;;  %v1925_v21 = vld [vmem:[%s2415_s1 + $0x3a0] sm:$0xff]   ;;  %v1927_v22 = vld [vmem:[%s2415_s1 + $0x3e8] sm:$0xff]  }
  0x45   :  { %1721 = vmatprep.subr.bf16.mxu0 %v1878_v23  ;;  %1742 = vmatpush3.bf16.msra.mxu1 %v1877_v24  ;;  %v1928_v23 = vld [vmem:[%s2415_s1 + $0x328] sm:$0xff]   ;;  %v1930_v24 = vld [vmem:[%s2415_s1 + $0x370] sm:$0xff]  }
  0x46   :  { %1743 = vmatprep.subr.bf16.mxu1 %v1879_v25  ;;  %1357 = vmatprep.mubr.bf16.mxu0 %v369_v55 }
  0x47   :  { %1397 = vmatprep.mubr.bf16.mxu1 %v379_v59 }
  0x48   :  { %1722 = vmatpush3.bf16.msra.mxu0 %v1880_v26 }
  0x49   :  { %1723 = vmatprep.subr.bf16.mxu0 %v1882_v27  ;;  %1744 = vmatpush3.bf16.msra.mxu1 %v1881_v28 }
  0x4a   :  { %1745 = vmatprep.subr.bf16.mxu1 %v1883_v29 }
  0x4c   :  { %1724 = vmatpush3.bf16.msra.mxu0 %v1884_v30 }
  0x4d   :  { %1725 = vmatprep.subr.bf16.mxu0 %v1886_v31  ;;  %1746 = vmatpush3.bf16.msra.mxu1 %v1885_v32 }
  0x4e   :  { %1747 = vmatprep.subr.bf16.mxu1 %v1887_v33 }
  0x50   :  { %1726 = vmatpush3.bf16.msra.mxu0 %v1888_v34 }
  0x51   :  { %1727 = vmatprep.subr.bf16.mxu0 %v1890_v35  ;;  %1748 = vmatpush3.bf16.msra.mxu1 %v1889_v36 }
  0x52   :  { %1749 = vmatprep.subr.bf16.mxu1 %v1891_v37 }
  0x54   :  { %1728 = vmatpush3.bf16.msra.mxu0 %v1892_v38 }
  0x55   :  { %1729 = vmatprep.subr.bf16.mxu0 %v1894_v39  ;;  %1750 = vmatpush3.bf16.msra.mxu1 %v1893_v40 }
  0x56   :  { %1751 = vmatprep.subr.bf16.mxu1 %v1895_v42 }
  0x58   :  { %1730 = vmatpush3.bf16.msra.mxu0 %v1896_v43 }
  0x59   :  { %1731 = vmatprep.subr.bf16.mxu0 %v1898_v44  ;;  %1752 = vmatpush3.bf16.msra.mxu1 %v1897_v46 }
  0x5a   :  { %1753 = vmatprep.subr.bf16.mxu1 %v1899_v49 }
  0x5c   :  { %1732 = vmatpush3.bf16.msra.mxu0 %v1900_v50 }
  0x5d   :  { %1733 = vmatprep.subr.bf16.mxu0 %v1902_v53  ;;  %1754 = vmatpush3.bf16.msra.mxu1 %v1901_v54 }
  0x5e   :  { %1755 = vmatprep.subr.bf16.mxu1 %v1903_v57 }
  0x60   :  { %1734 = vmatpush3.bf16.msra.mxu0 %v1904_v58 }
  0x61   :  { %1763 = vmatprep.subr.bf16.mxu0 %v1906_v61  ;;  %1756 = vmatpush3.bf16.msra.mxu1 %v1905_v62 }
  0x62   :  { %1785 = vmatprep.subr.bf16.mxu1 %v1907_v0 }
  0x63   :  { %1358 = vmatmul.mubr.bf16.vlgmr.msra.gmra.mrb[8].mxu0 %v355_v60 }
  0x64   :  { %1764 = vmatpush3.bf16.msra.mxu0 %v1908_v1  ;;  %1437 = vmatprep.mubr.bf16.mxu0 %v376_v63 }
  0x65   :  { %1398 = vmatmul.mubr.bf16.vlgmr.msra.gmra.mrb[8].mxu1 %v377_v2  ;;  %1765 = vmatprep.subr.bf16.mxu0 %v1910_v3 }
  0x66   :  { %1786 = vmatpush3.bf16.msra.mxu1 %v1909_v4  ;;  %1477 = vmatprep.mubr.bf16.mxu1 %v380_v5 }
  0x67   :  { %1787 = vmatprep.subr.bf16.mxu1 %v1911_v6 }
  0x68   :  { %1766 = vmatpush3.bf16.msra.mxu0 %v1912_v7 }
  0x69   :  { %1767 = vmatprep.subr.bf16.mxu0 %v1914_v8 }
  0x6a   :  { %1788 = vmatpush3.bf16.msra.mxu1 %v1913_v9 }
  0x6b   :  { %1789 = vmatprep.subr.bf16.mxu1 %v1915_v10 }
  0x6c   :  { %1768 = vmatpush3.bf16.msra.mxu0 %v1916_v11 }
  0x6d   :  { %1769 = vmatprep.subr.bf16.mxu0 %v1918_v12 }
  0x6e   :  { %1790 = vmatpush3.bf16.msra.mxu1 %v1917_v13 }
  0x6f   :  { %1791 = vmatprep.subr.bf16.mxu1 %v1919_v14 }
  0x70   :  { %1770 = vmatpush3.bf16.msra.mxu0 %v1920_v15 }
  0x71   :  { %1771 = vmatprep.subr.bf16.mxu0 %v1922_v16 }
  0x72   :  { %1792 = vmatpush3.bf16.msra.mxu1 %v1921_v17 }
  0x73   :  { %1793 = vmatprep.subr.bf16.mxu1 %v1923_v18 }
  0x74   :  { %1772 = vmatpush3.bf16.msra.mxu0 %v1924_v19 }
  0x75   :  { %1773 = vmatprep.subr.bf16.mxu0 %v1926_v20 }
  0x76   :  { %8 = vsyncpa [#allocation3], 0  ;;  %1794 = vmatpush3.bf16.msra.mxu1 %v1925_v21  ;;  %v1929_v25 = vld [vmem:[%s2415_s1 + $0x3a8] sm:$0xff]   ;;  %v1931_v26 = vld [vmem:[%s2415_s1 + $0x3f0] sm:$0xff]   ;;  %v362_v32 = vrot.slane %v2279_v52, %v2090_v41  ;;  %vm1486_vm0 = vcmask 254976  }
  0x77   :  { %1795 = vmatprep.subr.bf16.mxu1 %v1927_v22  ;;  %v1932_v27 = vld [vmem:[%s2415_s1 + $0x330] sm:$0xff]   ;;  %v1934_v28 = vld [vmem:[%s2415_s1 + $0x378] sm:$0xff]   ;;  %v1502_v36 = vld [vmem:[%s2416_s2] ss:$0 sm:$0xff] }
  0x78   :  { %1774 = vmatpush3.bf16.msra.mxu0 %v1928_v23  ;;  %v1933_v29 = vld [vmem:[%s2415_s1 + $0x3b0] sm:$0xff]   ;;  %v1935_v30 = vld [vmem:[%s2415_s1 + $0x3f8] sm:$0xff]   ;;  %v378_v34 = vcombine.high %v362_v32, %v362_v32 }
  0x79   :  { %1775 = vmatprep.subr.bf16.mxu0 %v1930_v24  ;;  %v1936_v31 = vld [vmem:[%s2415_s1 + $0x338] sm:$0xff]  }
  0x7a   :  { %1796 = vmatpush3.bf16.msra.mxu1 %v1929_v25  ;;  %v1937_v33 = vld [vmem:[%s2415_s1 + $0x3b8] sm:$0xff]   ;;  %s1964_s1 = smov [#allocation2]  }
  0x7b   :  { %1797 = vmatprep.subr.bf16.mxu1 %v1931_v26  ;;  %s1494_s2 = sshll.u32 %s1964_s1, 4  ;;  %s1495_s2 = int_to_ptr.vmem [resolvable:$true] %s1494_s2 }
  0x7c   :  { %1776 = vmatpush3.bf16.msra.mxu0 %v1932_v27  ;;  %s1939_s28 = scalar_lea.vmem %s1495_s2, 32  ;;  %p1944_p1 = scmp.lt.s32.totalorder %s1495_s2, %s1495_s2 }
  0x7d   :  { %1777 = vmatprep.subr.bf16.mxu0 %v1934_v28  ;;  %p1940_p0 = scmp.ne.s32.totalorder %s1495_s2, %s1939_s28  ;;  %p1945_p2 = scmp.lt.s32.totalorder %s1939_s28, %s1939_s28 }
  0x7e   :  { %1798 = vmatpush3.bf16.msra.mxu1 %v1933_v29 }
  0x7f   :  { %1799 = vmatprep.subr.bf16.mxu1 %v1935_v30  ;;  %p1946_p3 = por %p1945_p2, %p1944_p1 }
  0x80   :  { %1778 = vmatpush3.bf16.msra.mxu0 %v1936_v31 }
  0x81   :  { %p1947_p4 = pnand %p1946_p3, %p1940_p0 }
  0x82   :  { %1800 = vmatpush3.bf16.msra.mxu1 %v1937_v33 }
  0x83   :  { %1438 = vmatmul.mubr.bf16.vlgmr.msra.gmra.mrb[12].mxu0 %v362_v32 }
  0x85   :  { %1478 = vmatmul.mubr.bf16.vlgmr.msra.gmra.mrb[12].mxu1 %v378_v34 }
  0xf6   :  { %v1647_v35 = vpop.f32.mrb[0].mxu0 }
  0xf7   :  { %v1648_v37 = vpop.f32.mrb[1].mxu0  ;;  %v1669_v38 = vpop.f32.mrb[0].mxu1 }
  0xf8   :  { %v1649_v39 = vadd.f32 %v1648_v37, %v1647_v35  ;;  %v1650_v41 = vpop.f32.mrb[2].mxu0  ;;  %v1670_v40 = vpop.f32.mrb[1].mxu1 }
  0xf9   :  { %v1651_v42 = vpop.f32.mrb[3].mxu0  ;;  %v1671_v44 = vadd.f32 %v1670_v40, %v1669_v38  ;;  %v1672_v45 = vpop.f32.mrb[2].mxu1 }
  0xfa   :  { %v1200_v43 = vadd.f32 %v1649_v39, %v1502_v36  ;;  %v1673_v46 = vpop.f32.mrb[3].mxu1 }
  0xfc   :  { %v1240_v47 = vadd.f32 %v1671_v44, %v1200_v43 }
 0x116   :  { %v1691_v48 = vpop.f32.mrb[4].mxu0 }
 0x117   :  { %v1692_v49 = vpop.f32.mrb[5].mxu0  ;;  %v1713_v50 = vpop.f32.mrb[4].mxu1 }
 0x118   :  { %v1693_v51 = vadd.f32 %v1692_v49, %v1691_v48  ;;  %v1694_v52 = vpop.f32.mrb[6].mxu0  ;;  %v1714_v53 = vpop.f32.mrb[5].mxu1 }
 0x119   :  { %v1695_v54 = vpop.f32.mrb[7].mxu0  ;;  %v1715_v56 = vadd.f32 %v1714_v53, %v1713_v50  ;;  %v1716_v57 = vpop.f32.mrb[6].mxu1 }
 0x11a   :  { %v1280_v55 = vadd.f32 %v1693_v51, %v1240_v47  ;;  %v1717_v58 = vpop.f32.mrb[7].mxu1 }
 0x11c   :  { %v1320_v59 = vadd.f32 %v1715_v56, %v1280_v55 }
 0x136   :  { %v1735_v60 = vpop.f32.mrb[8].mxu0 }
 0x137   :  { %v1736_v61 = vpop.f32.mrb[9].mxu0 }
 0x138   :  { %v1757_v62 = vpop.f32.mrb[8].mxu1  ;;  %v1737_v63 = vadd.f32 %v1736_v61, %v1735_v60  ;;  %v1738_v0 = vpop.f32.mrb[10].mxu0 }
 0x139   :  { %v1758_v1 = vpop.f32.mrb[9].mxu1  ;;  %v1739_v2 = vpop.f32.mrb[11].mxu0 }
 0x13a   :  { %v1360_v3 = vadd.f32 %v1737_v63, %v1320_v59  ;;  %v1759_v4 = vadd.f32 %v1758_v1, %v1757_v62  ;;  %v1760_v5 = vpop.f32.mrb[10].mxu1 }
 0x13b   :  { %v1761_v6 = vpop.f32.mrb[11].mxu1 }
 0x13c   :  { %v1400_v7 = vadd.f32 %v1759_v4, %v1360_v3 }
 0x156   :  { %v1779_v8 = vpop.f32.mrb[12].mxu0 }
 0x157   :  { %v1780_v9 = vpop.f32.mrb[13].mxu0 }
 0x158   :  { %v1801_v10 = vpop.f32.mrb[12].mxu1  ;;  %v1781_v11 = vadd.f32 %v1780_v9, %v1779_v8  ;;  %v1782_v12 = vpop.f32.mrb[14].mxu0 }
 0x159   :  { %v1802_v13 = vpop.f32.mrb[13].mxu1  ;;  %v1783_v14 = vpop.f32.mrb[15].mxu0 }
 0x15a   :  { %v1440_v15 = vadd.f32 %v1781_v11, %v1400_v7  ;;  %v1803_v16 = vadd.f32 %v1802_v13, %v1801_v10  ;;  %v1804_v17 = vpop.f32.mrb[14].mxu1 }
 0x15b   :  { %v1805_v18 = vpop.f32.mrb[15].mxu1 }
 0x15c   :  { %v1480_v19 = vadd.f32 %v1803_v16, %v1440_v15 }
 0x15e   :  { %v1485_v20 = vmax.f32 %v1480_v19, 0.0 }
 0x160   :  { %1487 = vst.msk [vmem:[#allocation2] sm:$0x3] %vm1486_vm0, %v1485_v20 }
 0x161   :  { %1950 = shalt.err (!%p1947_p4)
}
 0x162   :  { %s1951_s4 = scalar_lea.hbm %s2417_s3, 32 }
 0x163   :  { %p1952_p5 = scmp.ne.s32.totalorder %s2417_s3, %s1951_s4  ;;  %p1955_p6 = scmp.lt.u32.totalorder %s1951_s4, %s2417_s3 }
 0x165   :  { %p1957_p7 = pnand %p1955_p6, %p1952_p5 }
 0x167   :  { %1960 = shalt.err (!%p1957_p7)
}
 0x168   :  { %1497 = dma.vmem_to_hbm [thread:$0]  %s1495_s2, 32, %s2417_s3, [#allocation3]  }
 0x169   :  { %1961 = dma.done.wait [#allocation3], 32  }
 0x16a   :  { %1962 = vsyncadd [#allocation3], 4294967264 }
 0x16b   :  { %1501 = vsyncpa [#allocation3], 1 }

</bundles_post_ra>
